<compile_context>
chip_gen: v7x
topology: tpu7x:2x2x1
jax: 0.10.0
libtpu: 0.0.40
codegen_flags: <defaults>
</compile_context>

<pallas_src>
import jax
import jax.numpy as jnp
from jax import lax
from jax.experimental import pallas as pl
from jax.experimental.pallas import tpu as pltpu

NEG_SLOPE = 0.01   # InPlaceABNSync default activation: leaky_relu(0.01)


# ------------------------------- kernel --------------------------------------

def _decoder_kernel(xt_ref, xl_ref, up_ref,
                    w1_ref, b1_ref, w2_ref, b2_ref,
                    w4t_ref, w4l_ref, b4a_ref,
                    w4b_ref, b4b_ref, w5_ref, b5_ref,
                    seg_ref, x_ref):
    """One batch element per grid step; all refs live in VMEM."""
    bf16 = jnp.bfloat16

    def lrelu(v):
        return jnp.maximum(v, NEG_SLOPE * v)

    # conv1 (1x1, BN-scale folded) on the low-res branch        -> [256, Ht*Wt]
    h1 = jnp.dot(w1_ref[...], xt_ref[0], preferred_element_type=jnp.float32)
    h1 = lrelu(h1 + b1_ref[...])

    # bilinear upsample (align_corners=True) as a single matmul -> [256, H*W]
    h1u = jnp.dot(h1.astype(bf16), up_ref[...],
                  preferred_element_type=jnp.float32)

    # conv2 (1x1, BN-scale folded) on the high-res branch       -> [48, H*W]
    h2 = jnp.dot(w2_ref[...], xl_ref[0], preferred_element_type=jnp.float32)
    h2 = lrelu(h2 + b2_ref[...])

    # conv4[0]: concat([h1u, h2]) @ W fused as two accumulated matmuls
    h4 = jnp.dot(w4t_ref[...], h1u.astype(bf16),
                 preferred_element_type=jnp.float32)
    h4 = h4 + jnp.dot(w4l_ref[...], h2.astype(bf16),
                      preferred_element_type=jnp.float32)
    h4 = lrelu(h4 + b4a_ref[...])

    # conv4[1]                                                  -> [256, H*W]
    h5 = jnp.dot(w4b_ref[...], h4.astype(bf16),
                 preferred_element_type=jnp.float32)
    h5 = lrelu(h5 + b4b_ref[...])
    x_ref[0] = h5

    # conv5 (1x1, with bias)                                    -> [NC, H*W]
    seg = jnp.dot(w5_ref[...], h5.astype(bf16),
                  preferred_element_type=jnp.float32)
    seg_ref[0] = seg + b5_ref[...]


# ------------------------------- wrapper --------------------------------------

def _interp_matrix(out_size, in_size):
    """1-D bilinear interpolation matrix R[out, in], PyTorch align_corners=True."""
    if in_size == 1 or out_size == 1:
        return jnp.zeros((out_size, in_size), jnp.float32).at[:, 0].set(1.0)
    pos = jnp.arange(out_size, dtype=jnp.float32) * (in_size - 1) / (out_size - 1)
    lo = jnp.clip(jnp.floor(pos).astype(jnp.int32), 0, in_size - 2)
    frac = pos - lo.astype(jnp.float32)
    rows = jnp.arange(out_size)
    r = jnp.zeros((out_size, in_size), jnp.float32)
    r = r.at[rows, lo].add(1.0 - frac)
    r = r.at[rows, lo + 1].add(frac)
    return r


def decoder_pallas(xt, xl, kparams, num_classes):
    (w1f, b1, w2f, b2, w4tf, w4lf, b4a, w4bf, b4b, w5f, b5) = kparams
    N, Cxt, Ht, Wt = xt.shape
    N2, Cxl, H, W = xl.shape
    assert N == N2
    HtWt, HW = Ht * Wt, H * W

    # Precomputed bilinear-interpolation matrix (no in-kernel index math).
    Rh = _interp_matrix(H, Ht)
    Rw = _interp_matrix(W, Wt)
    up = jnp.kron(Rh, Rw).T.astype(jnp.bfloat16)          # [Ht*Wt, H*W]

    xt_flat = xt.reshape(N, Cxt, HtWt).astype(jnp.bfloat16)
    xl_flat = xl.reshape(N, Cxl, HW).astype(jnp.bfloat16)

    def rep(shape):
        return pl.BlockSpec(shape, lambda n: (0, 0))

    seg, x = pl.pallas_call(
        _decoder_kernel,
        out_shape=(jax.ShapeDtypeStruct((N, num_classes, HW), jnp.float32),
                   jax.ShapeDtypeStruct((N, 256, HW), jnp.float32)),
        grid_spec=pltpu.PrefetchScalarGridSpec(
            num_scalar_prefetch=0,
            grid=(N,),
            in_specs=[
                pl.BlockSpec((1, Cxt, HtWt), lambda n: (n, 0, 0)),
                pl.BlockSpec((1, Cxl, HW), lambda n: (n, 0, 0)),
                rep(up.shape),
                rep(w1f.shape), rep(b1.shape),
                rep(w2f.shape), rep(b2.shape),
                rep(w4tf.shape), rep(w4lf.shape), rep(b4a.shape),
                rep(w4bf.shape), rep(b4b.shape),
                rep(w5f.shape), rep(b5.shape),
            ],
            out_specs=[
                pl.BlockSpec((1, num_classes, HW), lambda n: (n, 0, 0)),
                pl.BlockSpec((1, 256, HW), lambda n: (n, 0, 0)),
            ],
        ),
        compiler_params=pltpu.CompilerParams(
            dimension_semantics=("parallel",)),
    )(xt_flat, xl_flat, up,
      w1f, b1, w2f, b2, w4tf, w4lf, b4a, w4bf, b4b, w5f, b5)

    return (seg.reshape(N, num_classes, H, W),
            x.reshape(N, 256, H, W))


# ------------------------------ parameters ------------------------------------

def make_params(key, num_classes):
    """Deterministic synthetic weights (Conv2d OIHW) + eval-mode ABN params."""
    ks = list(jax.random.split(key, 32))
    it = iter(ks)

    def conv_w(cout, cin):
        return 0.05 * jax.random.normal(next(it), (cout, cin, 1, 1), jnp.float32)

    def bn(c):
        gamma = 1.0 + 0.1 * jax.random.normal(next(it), (c,), jnp.float32)
        beta = 0.1 * jax.random.normal(next(it), (c,), jnp.float32)
        mean = 0.1 * jax.random.normal(next(it), (c,), jnp.float32)
        var = jax.random.uniform(next(it), (c,), jnp.float32, minval=0.5, maxval=1.5)
        scale = gamma / jnp.sqrt(var + 1e-5)
        bias = beta - mean * scale
        return scale, bias

    w1 = conv_w(256, 512);            s1, b1 = bn(256)
    w2 = conv_w(48, 256);             s2, b2 = bn(48)
    w4a = conv_w(256, 304);           s4a, b4a = bn(256)
    w4b = conv_w(256, 256);           s4b, b4b = bn(256)
    w5 = conv_w(num_classes, 256)
    b5 = 0.1 * jax.random.normal(next(it), (num_classes,), jnp.float32)

    torch_params = (w1, (s1, b1), w2, (s2, b2), w4a, (s4a, b4a),
                    w4b, (s4b, b4b), w5, b5)

    # Kernel-layout weights: BN scale folded into conv rows, bf16 MXU operands,
    # conv4[0] split into xt / xl parts (fuses the channel concat).
    def fold(w, s):
        return (w[:, :, 0, 0] * s[:, None]).astype(jnp.bfloat16)

    w4af = w4a[:, :, 0, 0] * s4a[:, None]
    kparams = (
        fold(w1, s1), b1.reshape(-1, 1),
        fold(w2, s2), b2.reshape(-1, 1),
        w4af[:, :256].astype(jnp.bfloat16),
        w4af[:, 256:].astype(jnp.bfloat16),
        b4a.reshape(-1, 1),
        fold(w4b, s4b), b4b.reshape(-1, 1),
        w5[:, :, 0, 0].astype(jnp.bfloat16), b5.reshape(-1, 1),
    )
    return torch_params, kparams


# --------------------------- pure-JAX reference --------------------------------

def decoder_ref(xt, xl, torch_params):
    (w1, bn1, w2, bn2, w4a, bn4a, w4b, bn4b, w5, b5) = torch_params
    dn = ('NCHW', 'OIHW', 'NCHW')

    def conv1x1(t, w):
        return lax.conv_general_dilated(t, w, (1, 1), 'VALID',
                                        dimension_numbers=dn)

    def abn(t, sb):
        s, b = sb
        t = t * s[None, :, None, None] + b[None, :, None, None]
        return jnp.where(t > 0, t, NEG_SLOPE * t)

    _, _, Ht, Wt = xt.shape
    _, _, H, W = xl.shape
    h1 = abn(conv1x1(xt, w1), bn1)
    Rh = _interp_matrix(H, Ht)
    Rw = _interp_matrix(W, Wt)
    h1u = jnp.einsum('hp,wq,ncpq->nchw', Rh, Rw, h1)     # bilinear, align_corners
    h2 = abn(conv1x1(xl, w2), bn2)
    x = jnp.concatenate([h1u, h2], axis=1)
    x = abn(conv1x1(x, w4a), bn4a)
    x = abn(conv1x1(x, w4b), bn4b)
    seg = conv1x1(x, w5) + b5[None, :, None, None]
    return seg, x


# ----------------------------------- main --------------------------------------

if __name__ == "__main__":
    key = jax.random.PRNGKey(0)
    k_xt, k_xl, k_p = jax.random.split(key, 3)

    N, num_classes = 2, 7
    Ht, Wt, H, W = 8, 8, 16, 16
    xt = jax.random.normal(k_xt, (N, 512, Ht, Wt), jnp.float32)
    xl = jax.random.normal(k_xl, (N, 256, H, W), jnp.float32)

    torch_params, kparams = make_params(k_p, num_classes)

    seg, x = decoder_pallas(xt, xl, kparams, num_classes)
    seg, x = jax.block_until_ready((seg, x))

    ref_seg, ref_x = decoder_ref(xt, xl, torch_params)
    ref_seg, ref_x = jax.block_until_ready((ref_seg, ref_x))

    assert seg.shape == (N, num_classes, H, W)
    assert x.shape == (N, 256, H, W)
    err_seg = float(jnp.max(jnp.abs(seg - ref_seg)))
    err_x = float(jnp.max(jnp.abs(x - ref_x)))
    # bf16 MXU operands (f32 accumulation) -> loosened tolerance vs f32 reference.
    assert jnp.allclose(seg, ref_seg, rtol=5e-2, atol=5e-2), (
        "seg mismatch, max abs diff = %e" % err_seg)
    assert jnp.allclose(x, ref_x, rtol=5e-2, atol=5e-2), (
        "x mismatch, max abs diff = %e" % err_x)

    print("KERNEL_OK")
</pallas_src>

<mosaic_0001>
module attributes {stable_mosaic.version = 11 : i64} {
  func.func @_decoder_kernel(%arg0: i32, %arg1: memref<1x512x64xbf16, #tpu.memory_space<vmem>>, %arg2: memref<1x256x256xbf16, #tpu.memory_space<vmem>>, %arg3: memref<64x256xbf16, #tpu.memory_space<vmem>>, %arg4: memref<256x512xbf16, #tpu.memory_space<vmem>>, %arg5: memref<256x1xf32, #tpu.memory_space<vmem>>, %arg6: memref<48x256xbf16, #tpu.memory_space<vmem>>, %arg7: memref<48x1xf32, #tpu.memory_space<vmem>>, %arg8: memref<256x256xbf16, #tpu.memory_space<vmem>>, %arg9: memref<256x48xbf16, #tpu.memory_space<vmem>>, %arg10: memref<256x1xf32, #tpu.memory_space<vmem>>, %arg11: memref<256x256xbf16, #tpu.memory_space<vmem>>, %arg12: memref<256x1xf32, #tpu.memory_space<vmem>>, %arg13: memref<7x256xbf16, #tpu.memory_space<vmem>>, %arg14: memref<7x1xf32, #tpu.memory_space<vmem>>, %arg15: memref<1x7x256xf32, #tpu.memory_space<vmem>>, %arg16: memref<1x256x256xf32, #tpu.memory_space<vmem>>) attributes {dimension_semantics = [#tpu.dimension_semantics<parallel>], iteration_bounds = array<i64: 2>, scalar_prefetch = 0 : i64, scratch_operands = 0 : i64, tpu.core_type = #tpu.core_type<tc>, window_params = [{transform_indices = @transform_0, window_bounds = array<i64: 1, 512, 64>}, {transform_indices = @transform_1, window_bounds = array<i64: 1, 256, 256>}, {pipeline_mode = #tpu.pipeline_mode<synchronous>, transform_indices = @transform_2, window_bounds = array<i64: 64, 256>}, {pipeline_mode = #tpu.pipeline_mode<synchronous>, transform_indices = @transform_3, window_bounds = array<i64: 256, 512>}, {pipeline_mode = #tpu.pipeline_mode<synchronous>, transform_indices = @transform_4, window_bounds = array<i64: 256, 1>}, {pipeline_mode = #tpu.pipeline_mode<synchronous>, transform_indices = @transform_5, window_bounds = array<i64: 48, 256>}, {pipeline_mode = #tpu.pipeline_mode<synchronous>, transform_indices = @transform_6, window_bounds = array<i64: 48, 1>}, {pipeline_mode = #tpu.pipeline_mode<synchronous>, transform_indices = @transform_7, window_bounds = array<i64: 256, 256>}, {pipeline_mode = #tpu.pipeline_mode<synchronous>, transform_indices = @transform_8, window_bounds = array<i64: 256, 48>}, {pipeline_mode = #tpu.pipeline_mode<synchronous>, transform_indices = @transform_9, window_bounds = array<i64: 256, 1>}, {pipeline_mode = #tpu.pipeline_mode<synchronous>, transform_indices = @transform_10, window_bounds = array<i64: 256, 256>}, {pipeline_mode = #tpu.pipeline_mode<synchronous>, transform_indices = @transform_11, window_bounds = array<i64: 256, 1>}, {pipeline_mode = #tpu.pipeline_mode<synchronous>, transform_indices = @transform_12, window_bounds = array<i64: 7, 256>}, {pipeline_mode = #tpu.pipeline_mode<synchronous>, transform_indices = @transform_13, window_bounds = array<i64: 7, 1>}, {transform_indices = @transform_14, window_bounds = array<i64: 1, 7, 256>}, {transform_indices = @transform_15, window_bounds = array<i64: 1, 256, 256>}]} {
    %c0 = arith.constant 0 : index
    %c0_0 = arith.constant 0 : index
    %0 = vector.load %arg4[%c0, %c0_0] : memref<256x512xbf16, #tpu.memory_space<vmem>>, vector<256x512xbf16>
    %c0_1 = arith.constant 0 : index
    %c0_2 = arith.constant 0 : index
    %c0_3 = arith.constant 0 : index
    %1 = vector.load %arg1[%c0_1, %c0_2, %c0_3] : memref<1x512x64xbf16, #tpu.memory_space<vmem>>, vector<1x512x64xbf16>
    %2 = vector.shape_cast %1 : vector<1x512x64xbf16> to vector<512x64xbf16>
    %cst = arith.constant dense<0.000000e+00> : vector<256x64xf32>
    %3 = tpu.matmul %0, %2, %cst {dimension_numbers = #tpu.dot_dimension_numbers<[1], [0], [0], [1], [0, 0, 1, 1], [], []>} : vector<256x512xbf16>, vector<512x64xbf16>, vector<256x64xf32> -> vector<256x64xf32>
    %c0_4 = arith.constant 0 : index
    %c0_5 = arith.constant 0 : index
    %4 = vector.load %arg5[%c0_4, %c0_5] : memref<256x1xf32, #tpu.memory_space<vmem>>, vector<256x1xf32>
    %5 = vector.broadcast %4 : vector<256x1xf32> to vector<256x64xf32>
    %6 = arith.addf %3, %5 : vector<256x64xf32>
    %cst_6 = arith.constant 0.00999999977 : f32
    %7 = vector.broadcast %cst_6 : f32 to vector<256x64xf32>
    %8 = arith.mulf %7, %6 : vector<256x64xf32>
    %9 = arith.maximumf %6, %8 : vector<256x64xf32>
    %10 = arith.truncf %9 : vector<256x64xf32> to vector<256x64xbf16>
    %c0_7 = arith.constant 0 : index
    %c0_8 = arith.constant 0 : index
    %11 = vector.load %arg3[%c0_7, %c0_8] : memref<64x256xbf16, #tpu.memory_space<vmem>>, vector<64x256xbf16>
    %cst_9 = arith.constant dense<0.000000e+00> : vector<256x256xf32>
    %12 = tpu.matmul %10, %11, %cst_9 {dimension_numbers = #tpu.dot_dimension_numbers<[1], [0], [0], [1], [0, 0, 1, 1], [], []>} : vector<256x64xbf16>, vector<64x256xbf16>, vector<256x256xf32> -> vector<256x256xf32>
    %c0_10 = arith.constant 0 : index
    %c0_11 = arith.constant 0 : index
    %13 = vector.load %arg6[%c0_10, %c0_11] : memref<48x256xbf16, #tpu.memory_space<vmem>>, vector<48x256xbf16>
    %c0_12 = arith.constant 0 : index
    %c0_13 = arith.constant 0 : index
    %c0_14 = arith.constant 0 : index
    %14 = vector.load %arg2[%c0_12, %c0_13, %c0_14] : memref<1x256x256xbf16, #tpu.memory_space<vmem>>, vector<1x256x256xbf16>
    %15 = vector.shape_cast %14 : vector<1x256x256xbf16> to vector<256x256xbf16>
    %cst_15 = arith.constant dense<0.000000e+00> : vector<48x256xf32>
    %16 = tpu.matmul %13, %15, %cst_15 {dimension_numbers = #tpu.dot_dimension_numbers<[1], [0], [0], [1], [0, 0, 1, 1], [], []>} : vector<48x256xbf16>, vector<256x256xbf16>, vector<48x256xf32> -> vector<48x256xf32>
    %c0_16 = arith.constant 0 : index
    %c0_17 = arith.constant 0 : index
    %17 = vector.load %arg7[%c0_16, %c0_17] : memref<48x1xf32, #tpu.memory_space<vmem>>, vector<48x1xf32>
    %18 = vector.broadcast %17 : vector<48x1xf32> to vector<48x256xf32>
    %19 = arith.addf %16, %18 : vector<48x256xf32>
    %cst_18 = arith.constant 0.00999999977 : f32
    %20 = vector.broadcast %cst_18 : f32 to vector<48x256xf32>
    %21 = arith.mulf %20, %19 : vector<48x256xf32>
    %22 = arith.maximumf %19, %21 : vector<48x256xf32>
    %c0_19 = arith.constant 0 : index
    %c0_20 = arith.constant 0 : index
    %23 = vector.load %arg8[%c0_19, %c0_20] : memref<256x256xbf16, #tpu.memory_space<vmem>>, vector<256x256xbf16>
    %24 = arith.truncf %12 : vector<256x256xf32> to vector<256x256xbf16>
    %cst_21 = arith.constant dense<0.000000e+00> : vector<256x256xf32>
    %25 = tpu.matmul %23, %24, %cst_21 {dimension_numbers = #tpu.dot_dimension_numbers<[1], [0], [0], [1], [0, 0, 1, 1], [], []>} : vector<256x256xbf16>, vector<256x256xbf16>, vector<256x256xf32> -> vector<256x256xf32>
    %c0_22 = arith.constant 0 : index
    %c0_23 = arith.constant 0 : index
    %26 = vector.load %arg9[%c0_22, %c0_23] : memref<256x48xbf16, #tpu.memory_space<vmem>>, vector<256x48xbf16>
    %27 = arith.truncf %22 : vector<48x256xf32> to vector<48x256xbf16>
    %cst_24 = arith.constant dense<0.000000e+00> : vector<256x256xf32>
    %28 = tpu.matmul %26, %27, %cst_24 {dimension_numbers = #tpu.dot_dimension_numbers<[1], [0], [0], [1], [0, 0, 1, 1], [], []>} : vector<256x48xbf16>, vector<48x256xbf16>, vector<256x256xf32> -> vector<256x256xf32>
    %29 = arith.addf %25, %28 : vector<256x256xf32>
    %c0_25 = arith.constant 0 : index
    %c0_26 = arith.constant 0 : index
    %30 = vector.load %arg10[%c0_25, %c0_26] : memref<256x1xf32, #tpu.memory_space<vmem>>, vector<256x1xf32>
    %31 = vector.broadcast %30 : vector<256x1xf32> to vector<256x256xf32>
    %32 = arith.addf %29, %31 : vector<256x256xf32>
    %cst_27 = arith.constant 0.00999999977 : f32
    %33 = vector.broadcast %cst_27 : f32 to vector<256x256xf32>
    %34 = arith.mulf %33, %32 : vector<256x256xf32>
    %35 = arith.maximumf %32, %34 : vector<256x256xf32>
    %c0_28 = arith.constant 0 : index
    %c0_29 = arith.constant 0 : index
    %36 = vector.load %arg11[%c0_28, %c0_29] : memref<256x256xbf16, #tpu.memory_space<vmem>>, vector<256x256xbf16>
    %37 = arith.truncf %35 : vector<256x256xf32> to vector<256x256xbf16>
    %cst_30 = arith.constant dense<0.000000e+00> : vector<256x256xf32>
    %38 = tpu.matmul %36, %37, %cst_30 {dimension_numbers = #tpu.dot_dimension_numbers<[1], [0], [0], [1], [0, 0, 1, 1], [], []>} : vector<256x256xbf16>, vector<256x256xbf16>, vector<256x256xf32> -> vector<256x256xf32>
    %c0_31 = arith.constant 0 : index
    %c0_32 = arith.constant 0 : index
    %39 = vector.load %arg12[%c0_31, %c0_32] : memref<256x1xf32, #tpu.memory_space<vmem>>, vector<256x1xf32>
    %40 = vector.broadcast %39 : vector<256x1xf32> to vector<256x256xf32>
    %41 = arith.addf %38, %40 : vector<256x256xf32>
    %cst_33 = arith.constant 0.00999999977 : f32
    %42 = vector.broadcast %cst_33 : f32 to vector<256x256xf32>
    %43 = arith.mulf %42, %41 : vector<256x256xf32>
    %44 = arith.maximumf %41, %43 : vector<256x256xf32>
    %c0_34 = arith.constant 0 : index
    %c0_35 = arith.constant 0 : index
    %c0_36 = arith.constant 0 : index
    %45 = vector.load %arg16[%c0_34, %c0_35, %c0_36] : memref<1x256x256xf32, #tpu.memory_space<vmem>>, vector<1x256x256xf32>
    %46 = vector.shape_cast %45 : vector<1x256x256xf32> to vector<256x256xf32>
    %47 = vector.shape_cast %44 : vector<256x256xf32> to vector<1x256x256xf32>
    tpu.vector_store %arg16[%c0_34, %c0_35, %c0_36], %47 {strides = array<i32>} : memref<1x256x256xf32, #tpu.memory_space<vmem>>, vector<1x256x256xf32>,
    %c0_37 = arith.constant 0 : index
    %c0_38 = arith.constant 0 : index
    %48 = vector.load %arg13[%c0_37, %c0_38] : memref<7x256xbf16, #tpu.memory_space<vmem>>, vector<7x256xbf16>
    %49 = arith.truncf %44 : vector<256x256xf32> to vector<256x256xbf16>
    %cst_39 = arith.constant dense<0.000000e+00> : vector<7x256xf32>
    %50 = tpu.matmul %48, %49, %cst_39 {dimension_numbers = #tpu.dot_dimension_numbers<[1], [0], [0], [1], [0, 0, 1, 1], [], []>} : vector<7x256xbf16>, vector<256x256xbf16>, vector<7x256xf32> -> vector<7x256xf32>
    %c0_40 = arith.constant 0 : index
    %c0_41 = arith.constant 0 : index
    %51 = vector.load %arg14[%c0_40, %c0_41] : memref<7x1xf32, #tpu.memory_space<vmem>>, vector<7x1xf32>
    %52 = vector.broadcast %51 : vector<7x1xf32> to vector<7x256xf32>
    %53 = arith.addf %50, %52 : vector<7x256xf32>
    %c0_42 = arith.constant 0 : index
    %c0_43 = arith.constant 0 : index
    %c0_44 = arith.constant 0 : index
    %54 = vector.load %arg15[%c0_42, %c0_43, %c0_44] : memref<1x7x256xf32, #tpu.memory_space<vmem>>, vector<1x7x256xf32>
    %55 = vector.shape_cast %54 : vector<1x7x256xf32> to vector<7x256xf32>
    %56 = vector.shape_cast %53 : vector<7x256xf32> to vector<1x7x256xf32>
    tpu.vector_store %arg15[%c0_42, %c0_43, %c0_44], %56 {strides = array<i32>} : memref<1x7x256xf32, #tpu.memory_space<vmem>>, vector<1x7x256xf32>,
    return
  }
  func.func @transform_0(%arg0: i32) -> (i32, i32, i32) {
    %c0_i32 = arith.constant 0 : i32
    %c0_i32_0 = arith.constant 0 : i32
    %c0_i32_1 = arith.constant 0 : i32
    return %arg0, %c0_i32, %c0_i32_0 : i32, i32, i32
  }
  func.func @transform_1(%arg0: i32) -> (i32, i32, i32) {
    %c0_i32 = arith.constant 0 : i32
    %c0_i32_0 = arith.constant 0 : i32
    %c0_i32_1 = arith.constant 0 : i32
    return %arg0, %c0_i32, %c0_i32_0 : i32, i32, i32
  }
  func.func @transform_2(%arg0: i32) -> (i32, i32) {
    %c0_i32 = arith.constant 0 : i32
    %c0_i32_0 = arith.constant 0 : i32
    %c0_i32_1 = arith.constant 0 : i32
    return %c0_i32, %c0_i32_0 : i32, i32
  }
  func.func @transform_3(%arg0: i32) -> (i32, i32) {
    %c0_i32 = arith.constant 0 : i32
    %c0_i32_0 = arith.constant 0 : i32
    %c0_i32_1 = arith.constant 0 : i32
    return %c0_i32, %c0_i32_0 : i32, i32
  }
  func.func @transform_4(%arg0: i32) -> (i32, i32) {
    %c0_i32 = arith.constant 0 : i32
    %c0_i32_0 = arith.constant 0 : i32
    %c0_i32_1 = arith.constant 0 : i32
    return %c0_i32, %c0_i32_0 : i32, i32
  }
  func.func @transform_5(%arg0: i32) -> (i32, i32) {
    %c0_i32 = arith.constant 0 : i32
    %c0_i32_0 = arith.constant 0 : i32
    %c0_i32_1 = arith.constant 0 : i32
    return %c0_i32, %c0_i32_0 : i32, i32
  }
  func.func @transform_6(%arg0: i32) -> (i32, i32) {
    %c0_i32 = arith.constant 0 : i32
    %c0_i32_0 = arith.constant 0 : i32
    %c0_i32_1 = arith.constant 0 : i32
    return %c0_i32, %c0_i32_0 : i32, i32
  }
  func.func @transform_7(%arg0: i32) -> (i32, i32) {
    %c0_i32 = arith.constant 0 : i32
    %c0_i32_0 = arith.constant 0 : i32
    %c0_i32_1 = arith.constant 0 : i32
    return %c0_i32, %c0_i32_0 : i32, i32
  }
  func.func @transform_8(%arg0: i32) -> (i32, i32) {
    %c0_i32 = arith.constant 0 : i32
    %c0_i32_0 = arith.constant 0 : i32
    %c0_i32_1 = arith.constant 0 : i32
    return %c0_i32, %c0_i32_0 : i32, i32
  }
  func.func @transform_9(%arg0: i32) -> (i32, i32) {
    %c0_i32 = arith.constant 0 : i32
    %c0_i32_0 = arith.constant 0 : i32
    %c0_i32_1 = arith.constant 0 : i32
    return %c0_i32, %c0_i32_0 : i32, i32
  }
  func.func @transform_10(%arg0: i32) -> (i32, i32) {
    %c0_i32 = arith.constant 0 : i32
    %c0_i32_0 = arith.constant 0 : i32
    %c0_i32_1 = arith.constant 0 : i32
    return %c0_i32, %c0_i32_0 : i32, i32
  }
  func.func @transform_11(%arg0: i32) -> (i32, i32) {
    %c0_i32 = arith.constant 0 : i32
    %c0_i32_0 = arith.constant 0 : i32
    %c0_i32_1 = arith.constant 0 : i32
    return %c0_i32, %c0_i32_0 : i32, i32
  }
  func.func @transform_12(%arg0: i32) -> (i32, i32) {
    %c0_i32 = arith.constant 0 : i32
    %c0_i32_0 = arith.constant 0 : i32
    %c0_i32_1 = arith.constant 0 : i32
    return %c0_i32, %c0_i32_0 : i32, i32
  }
  func.func @transform_13(%arg0: i32) -> (i32, i32) {
    %c0_i32 = arith.constant 0 : i32
    %c0_i32_0 = arith.constant 0 : i32
    %c0_i32_1 = arith.constant 0 : i32
    return %c0_i32, %c0_i32_0 : i32, i32
  }
  func.func @transform_14(%arg0: i32) -> (i32, i32, i32) {
    %c0_i32 = arith.constant 0 : i32
    %c0_i32_0 = arith.constant 0 : i32
    %c0_i32_1 = arith.constant 0 : i32
    return %arg0, %c0_i32, %c0_i32_0 : i32, i32, i32
  }
  func.func @transform_15(%arg0: i32) -> (i32, i32, i32) {
    %c0_i32 = arith.constant 0 : i32
    %c0_i32_0 = arith.constant 0 : i32
    %c0_i32_1 = arith.constant 0 : i32
    return %arg0, %c0_i32, %c0_i32_0 : i32, i32, i32
  }
}

</mosaic_0001>

<bundles_post_ra>
// kernel: tpu_custom_call.1
= control target key start
LH: loop header
LB: loop body
LE: loop exit
PB: predicated region body
PF: predicated region fallthrough
CT: control target
= control target key end

     0   :  { %s6932_s0 = inlined_call_operand.vmem [shape: bf16[2,512,64], index: 0, kind: input, shape index: {}]   ;;  %s6933_s1 = inlined_call_operand.vmem [shape: bf16[2,256,256], index: 1, kind: input, shape index: {}]   ;;  %s6934_s2 = inlined_call_operand.hbm [shape: bf16[64,256], index: 2, kind: input, shape index: {}]   ;;  %s6935_s3 = inlined_call_operand.vmem [shape: bf16[256,512], index: 3, kind: input, shape index: {}]   ;;  %s6936_s4 = inlined_call_operand.vmem [shape: f32[256,1], index: 4, kind: input, shape index: {}]   ;;  %s6937_s5 = inlined_call_operand.hbm [shape: bf16[48,256], index: 5, kind: input, shape index: {}]   ;;  %s6938_s6 = inlined_call_operand.vmem [shape: f32[48,1], index: 6, kind: input, shape index: {}]   ;;  %s6939_s7 = inlined_call_operand.vmem [shape: bf16[256,256], index: 7, kind: input, shape index: {}]   ;;  %s6940_s8 = inlined_call_operand.vmem [shape: bf16[256,48], index: 8, kind: input, shape index: {}]   ;;  %s6941_s9 = inlined_call_operand.vmem [shape: f32[256,1], index: 9, kind: input, shape index: {}]   ;;  %s6942_s10 = inlined_call_operand.vmem [shape: bf16[256,256], index: 10, kind: input, shape index: {}]   ;;  %s6943_s11 = inlined_call_operand.vmem [shape: f32[256,1], index: 11, kind: input, shape index: {}]   ;;  %s6944_s12 = inlined_call_operand.vmem [shape: bf16[7,256], index: 12, kind: input, shape index: {}]   ;;  %s6945_s13 = inlined_call_operand.vmem [shape: f32[7,1], index: 13, kind: input, shape index: {}]   ;;  %s6946_s14 = inlined_call_operand.vmem [shape: f32[2,7,256], index: 14, kind: output, shape index: {0}]   ;;  %s6947_s15 = inlined_call_operand.hbm [shape: f32[2,256,256], index: 15, kind: output, shape index: {1}]  }
   0x1   :  { %6960 = sst [smem:[#allocation18_spill]] %s6946_s14 }
   0x2   :  { %6961 = sst [smem:[#allocation19_spill]] %s6947_s15 }
   0x3   :  { %21 = vsyncpa [#allocation3], 0 }
   0x4   :  { %22 = vsyncpa [#allocation6], 0 }
   0x5   :  { %23 = vsyncpa [#allocation4], 0 }
   0x6   :  { %25 = vsyncpa [#allocation4 + $0x1], 0  ;;  %s5788_s18 = smov 0   ;;  %s5790_s19 = smov 0  }
   0x7   :  { %s5792_s20 = smov 0   ;;  %s5794_s21 = smov 0  }
   0x8 LB: > { %6962 = sst [smem:[#allocation11_spill]] %s5686_s18  ;;  %s5809_s22 = sadd.s32 4294967295, %s5698_s21   ;;  %s5698_s21 = sphi %s5794_s21, %s6986_s21   ;;  %s5694_s20 = sphi %s5792_s20, %s6988_s20   ;;  %s5690_s19 = sphi %s5790_s19, %s6990_s19   ;;  %s5686_s18 = sphi %s5788_s18, %s6989_s18  }
   0x9   : > { %6963 = sst [smem:[#allocation12_spill]] %s5694_s20  ;;  %s4626_s23 = sadd.s32 4294967294, %s5698_s21  }
   0xa   : > { %6964 = sst [smem:[#allocation13_spill]] %s5698_s21  ;;  %s5813_s24 = sadd.s32 1, %s5698_s21  }
   0xb   : > { %6965 = sst [smem:[#allocation14_spill]] %s5813_s24  ;;  %s368_s25 = sadd.s32 1, %s5694_s20 }
   0xc   : > { %s365_s26 = ssub.s32 %s5698_s21, %s5813_s24  ;;  %p378_p0 = scmp.ne.s32.totalorder %s5694_s20, %s5690_s19 }
   0xd   : > { %p366_p1 = scmp.eq.s32.totalorder %s365_s26, 0  ;;  %p379_p2 = scmp.eq.s32.totalorder %s5809_s22, 1 }
   0xe   : > { %p384_p3 = scmp.ne.s32.totalorder %s5690_s19, %s5686_s18  ;;  %p385_p4 = scmp.eq.s32.totalorder %s4626_s23, 1 }
   0xf   : > { %s5824_s27 = scalar_select %p366_p1, %s5694_s20, %s368_s25  }
  0x10   : > { %p5826_p5 = por %p379_p2, %p378_p0  ;;  %p5830_p6 = por %p385_p4, %p384_p3 }
  0x11   : > { %6966 = sst [smem:[#allocation15_spill]] %s5824_s27  ;;  %p4627_p7 = scmp.ge.s32.totalorder %s5698_s21, 1 }
  0x12   : > { %s6967_s28 = scalar_select %p5826_p5, 1, 0 }
  0x13   : > { %s6969_s29 = scalar_select %p5830_p6, 1, 0 }
  0x14   : > { %6968 = sst [smem:[#allocation16_spill]] %s6967_s28  ;;  %p392_p8 = scmp.lt.s32.totalorder %s5698_s21, 3 }
  0x15   : > { %6970 = sst [smem:[#allocation17_spill]] %s6969_s29  ;;  %p6954_p9 = scmp.eq.s32.totalorder %s5809_s22, 0 }
  0x16   : > { %p5837_p10 = pnand %p4627_p7, %p392_p8  ;;  %s5700_s16 = smov [#allocation2]  }
  0x17   : > { %s404_s17 = sshll.u32 %s5700_s16, 4  ;;  %s5701_s25 = smov [#allocation5]   ;;  %s405_s17 = int_to_ptr.vmem [resolvable:$true] %s404_s17 }
  0x18   : > { %s6971_s30 = scalar_select %p5837_p10, 1, 0 }
  0x19   : > { %p5204_p11 = pneg %p5837_p10  ;;  %s423_s26 = sshll.u32 %s5701_s25, 4  ;;  %s5849_s26 = int_to_ptr.vmem [resolvable:$true] %s423_s26 }
  0x1a   : > { %s5572_s24 = scalar_lea.hbm %s6934_s2, 1024 }
  0x1b   : > { %p5845_p12 = pnand %p6954_p9, %p5204_p11  ;;  %p5573_p13 = scmp.ne.s32.totalorder %s6934_s2, %s5572_s24 }
  0x1c   : > { %p5579_p3 = scmp.lt.u32.totalorder %s5572_s24, %s6934_s2 }
  0x1d   : > { %p5574_p0 = pneg %p5845_p12 }
  0x1f   : > { %p5575_p1 = pnand %p5574_p0, %p5573_p13 }
  0x21   : > { %p5576_p2 = pneg %p5575_p1 }
  0x23   : > { %p5581_p4 = pnand %p5579_p3, %p5576_p2 }
  0x25   : > { %5584 = shalt.err (!%p5581_p4)
}
  0x26   : > { %s5585_s25 = scalar_lea.vmem %s405_s17, 1024  ;;  %p5593_p9 = scmp.lt.s32.totalorder %s405_s17, %s405_s17 }
  0x27   : > { %p5586_p7 = scmp.ne.s32.totalorder %s405_s17, %s5585_s25  ;;  %p5594_p6 = scmp.lt.s32.totalorder %s5585_s25, %s5585_s25 }
  0x29   : > { %p5588_p8 = pnand %p5586_p7, %p5574_p0  ;;  %p5595_p5 = por %p5594_p6, %p5593_p9 }
  0x2b   : > { %p5589_p11 = pneg %p5588_p8 }
  0x2d   : > { %p5596_p10 = pnand %p5595_p5, %p5589_p11 }
  0x2f   : > { %5599 = shalt.err (!%p5596_p10)
}
  0x30   : > { %s5702_s20 = smov 128   ;;  %s5703_s27 = smov 8  }
  0x31   : > { %5207 = dma.hbm_to_vmem [thread:$0]  (!%p5845_p12), %s6934_s2, 1024, %s405_s17, [#allocation3], %s5702_s20, %s5702_s20, %s5703_s27  }
  0x32   : > { %s5600_s16 = scalar_lea.hbm %s6937_s5, 768 }
  0x33   : > { %p5601_p13 = scmp.ne.s32.totalorder %s6937_s5, %s5600_s16  ;;  %p5607_p9 = scmp.lt.u32.totalorder %s5600_s16, %s6937_s5 }
  0x35   : > { %p5603_p5 = pnand %p5601_p13, %p5574_p0 }
  0x37   : > { %p5604_p6 = pneg %p5603_p5 }
  0x39   : > { %p5609_p10 = pnand %p5607_p9, %p5604_p6 }
  0x3b   : > { %5612 = shalt.err (!%p5609_p10)
}
  0x3c   : > { %s5613_s17 = scalar_lea.vmem %s5849_s26, 768  ;;  %p5621_p4 = scmp.lt.s32.totalorder %s5849_s26, %s5849_s26 }
  0x3d   : > { %p5614_p1 = scmp.ne.s32.totalorder %s5849_s26, %s5613_s17  ;;  %p5622_p7 = scmp.lt.s32.totalorder %s5613_s17, %s5613_s17 }
  0x3f   : > { %p5616_p2 = pnand %p5614_p1, %p5574_p0  ;;  %p5623_p8 = por %p5622_p7, %p5621_p4 }
  0x41   : > { %p5617_p3 = pneg %p5616_p2 }
  0x43   : > { %p5624_p11 = pnand %p5623_p8, %p5617_p3 }
  0x45   : > { %5627 = shalt.err (!%p5624_p11)
}
  0x46   : > { %5210 = dma.hbm_to_vmem [thread:$0]  (!%p5845_p12), %s6937_s5, 768, %s5849_s26, [#allocation6], %s5702_s20, %s5702_s20, %s5703_s27  }
  0x47   : > { %p6973_p13 = scmp.ne.s32.totalorder %s6971_s30, 0 }
  0x48   : > { %p6974_p5 = scmp.eq.s32.totalorder (!%p6973_p13), %s5809_s22, 0 }
  0x49   : > { %479 = sbr.rel (%p6973_p13) target bundleno = 1603 (0x643), region = 76 }
  0x50   : > { %5673 = dma.done.wait (%p6974_p5), [#allocation3], 1024   ;;  %p6975_p0 = pmov %p6974_p5 }
  0x52   : > { %5675 = vsyncadd (%p6975_p0), [#allocation3], 4294966272  ;;  %p6976_p6 = pmov %p6975_p0 }
  0x53   : > { %p6977_p9 = pmov %p6975_p0 }
  0x54   : > { %5677 = dma.done.wait (%p6976_p6), [#allocation6], 768  }
  0x55   : > { %5679 = vsyncadd (%p6977_p9), [#allocation6], 4294966528  ;;  %p541_p10 = scmp.lt.s32.totalorder %s5809_s22, 1  ;;  %v5704_v0 = vmov 0   ;;  %v687_v1 = vld [vmem:[%s6936_s4 + $0x10] sm:$0xff]  ;;  %v685_v2 = vld [vmem:[%s6936_s4] sm:$0xff] }
  0x56   : > { %5260 = vset.pattern.permute.xlu1 %v5704_v0  ;;  %5259 = vset.pattern.permute.xlu0 %v5704_v0  ;;  %v688_v7 = vld [vmem:[%s6936_s4 + $0x18] sm:$0xff]  ;;  %v686_v8 = vld [vmem:[%s6936_s4 + $0x8] sm:$0xff]  ;;  %v689_v14 = vld [vmem:[%s6936_s4 + $0x20] sm:$0xff]  ;;  %vm1839_vm0 = vcmask 523264   ;;  %vm2614_vm1 = vcmask 392192   ;;  %s4905_s29 = sshll.u32 %s5809_s22, 13 }
  0x57   : > { %s5912_s28 = scalar_select %p541_p10, %s5809_s22, 1  ;;  %729 = vperm.xlu1 %5260, %v687_v1   ;;  %719 = vperm.xlu0 %5259, %v685_v2   ;;  %v690_v13 = vld [vmem:[%s6936_s4 + $0x28] sm:$0xff]  ;;  %v692_v19 = vld [vmem:[%s6936_s4 + $0x38] sm:$0xff]  ;;  %v691_v20 = vld [vmem:[%s6936_s4 + $0x30] sm:$0xff] }
  0x58   : > { %v694_v25 = vld [vmem:[%s6936_s4 + $0x48] sm:$0xff]  ;;  %v693_v26 = vld [vmem:[%s6936_s4 + $0x40] sm:$0xff]  ;;  %v696_v31 = vld [vmem:[%s6936_s4 + $0x58] sm:$0xff]  ;;  %s6979_s15 = sld [smem:[#allocation19_spill]]  ;;  %s5705_s22 = smov [#allocation7]  }
  0x59   : > { %s4902_s30 = sshll.u32 %s5912_s28, 8  ;;  %v695_v32 = vld [vmem:[%s6936_s4 + $0x50] sm:$0xff]  ;;  %v698_v37 = vld [vmem:[%s6936_s4 + $0x68] sm:$0xff]  ;;  %v697_v38 = vld [vmem:[%s6936_s4 + $0x60] sm:$0xff] }
  0x5a   : > { %s5920_s20 = scalar_lea.vmem %s6932_s0, %s4902_s30  ;;  %v700_v43 = vld [vmem:[%s6936_s4 + $0x78] sm:$0xff]  ;;  %v699_v44 = vld [vmem:[%s6936_s4 + $0x70] sm:$0xff]  ;;  %v702_v49 = vld [vmem:[%s6936_s4 + $0x88] sm:$0xff]  ;;  %s6121_s14 = scalar_lea.vmem %s6933_s1, %s4902_s30 }
  0x5b   : > { %v5261_v3 = vld [vmem:[%s5920_s20 + $0x40] sm:$0xff]   ;;  %734 = vperm.xlu1 %5260, %v688_v7   ;;  %724 = vperm.xlu0 %5259, %v686_v8   ;;  %v5265_v9 = vld [vmem:[%s5920_s20 + $0x48] sm:$0xff]   ;;  %v5269_v15 = vld [vmem:[%s5920_s20 + $0x50] sm:$0xff]  }
  0x5c   : > { %v5262_v4 = vld [vmem:[%s5920_s20 + $0xc0] sm:$0xff]   ;;  %4906 = vmatprep.subr.bf16.mxu0 %v5261_v3  ;;  %v5266_v10 = vld [vmem:[%s5920_s20 + $0xc8] sm:$0xff]   ;;  %v5270_v16 = vld [vmem:[%s5920_s20 + $0xd0] sm:$0xff]  }
  0x5d   : > { %v5263_v5 = vld [vmem:[%s5920_s20] sm:$0xff]   ;;  %5018 = vmatprep.subr.bf16.mxu1 %v5262_v4  ;;  %v5267_v11 = vld [vmem:[%s5920_s20 + $0x8] sm:$0xff]   ;;  %v5271_v17 = vld [vmem:[%s5920_s20 + $0x10] sm:$0xff]  }
  0x5e   : > { %v5264_v6 = vld [vmem:[%s5920_s20 + $0x80] sm:$0xff]   ;;  %4907 = vmatpush3.bf16.msra.mxu0 %v5263_v5  ;;  %v5268_v12 = vld [vmem:[%s5920_s20 + $0x88] sm:$0xff]   ;;  %v5272_v18 = vld [vmem:[%s5920_s20 + $0x90] sm:$0xff]   ;;  %s6881_s23 = scalar_lea.hbm %s6979_s15, %s4905_s29 }
  0x5f   : > { %5019 = vmatpush3.bf16.msra.mxu1 %v5264_v6  ;;  %4908 = vmatprep.subr.bf16.mxu0 %v5265_v9  ;;  %v5273_v21 = vld [vmem:[%s5920_s20 + $0x58] sm:$0xff]   ;;  %v5277_v27 = vld [vmem:[%s5920_s20 + $0x60] sm:$0xff]   ;;  %v5281_v33 = vld [vmem:[%s5920_s20 + $0x68] sm:$0xff]  }
  0x60   : > { %5020 = vmatprep.subr.bf16.mxu1 %v5266_v10  ;;  %744 = vperm.xlu1 %5260, %v690_v13   ;;  %v5274_v22 = vld [vmem:[%s5920_s20 + $0xd8] sm:$0xff]   ;;  %v5278_v28 = vld [vmem:[%s5920_s20 + $0xe0] sm:$0xff]   ;;  %v5282_v34 = vld [vmem:[%s5920_s20 + $0xe8] sm:$0xff]  }
  0x61   : > { %739 = vperm.xlu0 %5259, %v689_v14   ;;  %v5275_v23 = vld [vmem:[%s5920_s20 + $0x18] sm:$0xff]   ;;  %v5279_v29 = vld [vmem:[%s5920_s20 + $0x20] sm:$0xff]   ;;  %v5283_v35 = vld [vmem:[%s5920_s20 + $0x28] sm:$0xff]  }
  0x62   : > { %4909 = vmatpush3.bf16.msra.mxu0 %v5267_v11  ;;  %v5276_v24 = vld [vmem:[%s5920_s20 + $0x98] sm:$0xff]   ;;  %v5280_v30 = vld [vmem:[%s5920_s20 + $0xa0] sm:$0xff]   ;;  %v5284_v36 = vld [vmem:[%s5920_s20 + $0xa8] sm:$0xff]  }
  0x63   : > { %5021 = vmatpush3.bf16.msra.mxu1 %v5268_v12  ;;  %4910 = vmatprep.subr.bf16.mxu0 %v5269_v15  ;;  %v5285_v39 = vld [vmem:[%s5920_s20 + $0x70] sm:$0xff]   ;;  %v5289_v45 = vld [vmem:[%s5920_s20 + $0x78] sm:$0xff]   ;;  %v701_v50 = vld [vmem:[%s6936_s4 + $0x80] sm:$0xff] }
  0x64   : > { %5022 = vmatprep.subr.bf16.mxu1 %v5270_v16  ;;  %754 = vperm.xlu1 %5260, %v692_v19   ;;  %v5286_v40 = vld [vmem:[%s5920_s20 + $0xf0] sm:$0xff]   ;;  %v5290_v46 = vld [vmem:[%s5920_s20 + $0xf8] sm:$0xff]   ;;  %v706_v59 = vld [vmem:[%s6936_s4 + $0xa8] sm:$0xff] }
  0x65   : > { %749 = vperm.xlu0 %5259, %v691_v20   ;;  %v5287_v41 = vld [vmem:[%s5920_s20 + $0x30] sm:$0xff]   ;;  %v5291_v47 = vld [vmem:[%s5920_s20 + $0x38] sm:$0xff]   ;;  %v705_v60 = vld [vmem:[%s6936_s4 + $0xa0] sm:$0xff] }
  0x66   : > { %4911 = vmatpush3.bf16.msra.mxu0 %v5271_v17  ;;  %v5288_v42 = vld [vmem:[%s5920_s20 + $0xb0] sm:$0xff]   ;;  %v5292_v48 = vld [vmem:[%s5920_s20 + $0xb8] sm:$0xff]   ;;  %v710_v4 = vld [vmem:[%s6936_s4 + $0xc8] sm:$0xff]  ;;  %s6978_s20 = sld [smem:[#allocation16_spill]] }
  0x67   : > { %5023 = vmatpush3.bf16.msra.mxu1 %v5272_v18  ;;  %4912 = vmatprep.subr.bf16.mxu0 %v5273_v21  ;;  %v5293_v51 = vld [vmem:[%s6935_s3] ss:$16 sps:$4 sm:$0xff]   ;;  %v5295_v52 = vld [vmem:[%s6935_s3 + $0x4] ss:$16 sps:$4 sm:$0xff]   ;;  %v5296_v53 = vld [vmem:[%s6935_s3 + $0x8] ss:$16 sps:$4 sm:$0xff]  }
  0x68   : > { %5024 = vmatprep.subr.bf16.mxu1 %v5274_v22  ;;  %764 = vperm.xlu1 %5260, %v694_v25   ;;  %v5298_v54 = vld [vmem:[%s6935_s3 + $0xc] ss:$16 sps:$4 sm:$0xff]   ;;  %v703_v56 = vld [vmem:[%s6936_s4 + $0x90] sm:$0xff]  ;;  %v5304_v62 = vld [vmem:[%s6935_s3 + $0x28] ss:$16 sps:$4 sm:$0xff]  }
  0x69   : > { %759 = vperm.xlu0 %5259, %v693_v26   ;;  %v704_v55 = vld [vmem:[%s6936_s4 + $0x98] sm:$0xff]  ;;  %1421 = vmatprep.mubr.bf16.mxu0 %v5295_v52  ;;  %v5299_v57 = vld [vmem:[%s6935_s3 + $0x24] ss:$16 sps:$4 sm:$0xff]   ;;  %v5303_v61 = vld [vmem:[%s6935_s3 + $0x20] ss:$16 sps:$4 sm:$0xff]  }
  0x6a   : > { %4913 = vmatpush3.bf16.msra.mxu0 %v5275_v23  ;;  %1582 = vmatprep.mubr.bf16.mxu1 %v5298_v54  ;;  %v5301_v58 = vld [vmem:[%s6935_s3 + $0x2c] ss:$16 sps:$4 sm:$0xff]   ;;  %v5305_v1 = vld [vmem:[%s6935_s3 + $0x44] ss:$16 sps:$4 sm:$0xff]   ;;  %v5309_v6 = vld [vmem:[%s6935_s3 + $0x40] ss:$16 sps:$4 sm:$0xff]  }
  0x6b   : > { %5025 = vmatpush3.bf16.msra.mxu1 %v5276_v24  ;;  %4914 = vmatprep.subr.bf16.mxu0 %v5277_v27  ;;  %v708_v63 = vld [vmem:[%s6936_s4 + $0xb8] sm:$0xff]  ;;  %v707_v2 = vld [vmem:[%s6936_s4 + $0xb0] sm:$0xff]  ;;  %v709_v5 = vld [vmem:[%s6936_s4 + $0xc0] sm:$0xff] }
  0x6c   : > { %5026 = vmatprep.subr.bf16.mxu1 %v5278_v28  ;;  %774 = vperm.xlu1 %5260, %v696_v31   ;;  %v5307_v3 = vld [vmem:[%s6935_s3 + $0x4c] ss:$16 sps:$4 sm:$0xff]   ;;  %v5310_v7 = vld [vmem:[%s6935_s3 + $0x48] ss:$16 sps:$4 sm:$0xff]   ;;  %v5311_v9 = vld [vmem:[%s6935_s3 + $0x64] ss:$16 sps:$4 sm:$0xff]  }
  0x6d   : > { %769 = vperm.xlu0 %5259, %v695_v32   ;;  %v712_v8 = vld [vmem:[%s6936_s4 + $0xd8] sm:$0xff]  ;;  %v711_v10 = vld [vmem:[%s6936_s4 + $0xd0] sm:$0xff]  ;;  %v714_v12 = vld [vmem:[%s6936_s4 + $0xe8] sm:$0xff]  ;;  %p6980_p1 = scmp.ne.s32.totalorder %s6978_s20, 0 }
  0x6e   : > { %4915 = vmatpush3.bf16.msra.mxu0 %v5279_v29  ;;  %v5313_v11 = vld [vmem:[%s6935_s3 + $0x6c] ss:$16 sps:$4 sm:$0xff]   ;;  %v713_v13 = vld [vmem:[%s6936_s4 + $0xe0] sm:$0xff]  ;;  %v5316_v15 = vld [vmem:[%s6935_s3 + $0x68] ss:$16 sps:$4 sm:$0xff]  }
  0x6f   : > { %5027 = vmatpush3.bf16.msra.mxu1 %v5280_v30  ;;  %4916 = vmatprep.subr.bf16.mxu0 %v5281_v33  ;;  %v5315_v14 = vld [vmem:[%s6935_s3 + $0x60] ss:$16 sps:$4 sm:$0xff]   ;;  %v716_v16 = vld [vmem:[%s6936_s4 + $0xf8] sm:$0xff]  ;;  %v5317_v17 = vld [vmem:[%s6935_s3 + $0x84] ss:$16 sps:$4 sm:$0xff]  }
  0x70   : > { %5028 = vmatprep.subr.bf16.mxu1 %v5282_v34  ;;  %784 = vperm.xlu1 %5260, %v698_v37   ;;  %v715_v18 = vld [vmem:[%s6936_s4 + $0xf0] sm:$0xff]  ;;  %v5319_v19 = vld [vmem:[%s6935_s3 + $0x8c] ss:$16 sps:$4 sm:$0xff]   ;;  %v2119_v21 = vld [vmem:[%s6938_s6] sm:$0xff] }
  0x71   : > { %779 = vperm.xlu0 %5259, %v697_v38   ;;  %v2120_v20 = vld [vmem:[%s6938_s6 + $0x8] sm:$0xff]  ;;  %v5321_v22 = vld [vmem:[%s6935_s3 + $0x80] ss:$16 sps:$4 sm:$0xff]   ;;  %v2122_v24 = vld [vmem:[%s6938_s6 + $0x18] sm:$0xff] }
  0x72   : > { %4917 = vmatpush3.bf16.msra.mxu0 %v5283_v35  ;;  %v5322_v23 = vld [vmem:[%s6935_s3 + $0x88] ss:$16 sps:$4 sm:$0xff]   ;;  %v2121_v25 = vld [vmem:[%s6938_s6 + $0x10] sm:$0xff]  ;;  %v5325_v27 = vld [vmem:[%s6935_s3 + $0xac] ss:$16 sps:$4 sm:$0xff]  }
  0x73   : > { %5029 = vmatpush3.bf16.msra.mxu1 %v5284_v36  ;;  %4918 = vmatprep.subr.bf16.mxu0 %v5285_v39  ;;  %v5323_v26 = vld [vmem:[%s6935_s3 + $0xa4] ss:$16 sps:$4 sm:$0xff]   ;;  %v5347_v29 = vld [vmem:[%s6121_s14] ss:$8 sps:$4 sm:$0xff]   ;;  %v5350_v35 = vld [vmem:[%s6121_s14 + $0x10] ss:$8 sps:$4 sm:$0xff]  }
  0x74   : > { %5030 = vmatprep.subr.bf16.mxu1 %v5286_v40  ;;  %794 = vperm.xlu1 %5260, %v700_v43   ;;  %v5349_v28 = vld [vmem:[%s6121_s14 + $0x4] ss:$8 sps:$4 sm:$0xff]   ;;  %v5352_v30 = vld [vmem:[%s6121_s14 + $0x14] ss:$8 sps:$4 sm:$0xff]   ;;  %v5327_v33 = vld [vmem:[%s6935_s3 + $0xa0] ss:$16 sps:$4 sm:$0xff]  }
  0x75   : > { %789 = vperm.xlu0 %5259, %v699_v44   ;;  %v2124_v31 = vld [vmem:[%s6938_s6 + $0x28] sm:$0xff]  ;;  %v2123_v32 = vld [vmem:[%s6938_s6 + $0x20] sm:$0xff]  ;;  %v3212_v43 = vld [vmem:[%s6941_s9 + $0x18] sm:$0xff] }
  0x76   : > { %4919 = vmatpush3.bf16.msra.mxu0 %v5287_v41  ;;  %v5328_v34 = vld [vmem:[%s6935_s3 + $0xa8] ss:$16 sps:$4 sm:$0xff]   ;;  %v3209_v37 = vld [vmem:[%s6941_s9] sm:$0xff]  ;;  %v5331_v39 = vld [vmem:[%s6935_s3 + $0xcc] ss:$16 sps:$4 sm:$0xff]  }
  0x77   : > { %5031 = vmatpush3.bf16.msra.mxu1 %v5288_v42  ;;  %4920 = vmatprep.subr.bf16.mxu0 %v5289_v45  ;;  %v3210_v36 = vld [vmem:[%s6941_s9 + $0x8] sm:$0xff]  ;;  %v5329_v38 = vld [vmem:[%s6935_s3 + $0xc4] ss:$16 sps:$4 sm:$0xff]   ;;  %v5333_v45 = vld [vmem:[%s6935_s3 + $0xc0] ss:$16 sps:$4 sm:$0xff]  }
  0x78   : > { %5032 = vmatprep.subr.bf16.mxu1 %v5290_v46  ;;  %804 = vperm.xlu1 %5260, %v702_v49   ;;  %v5361_v40 = vld [vmem:[%s6121_s14 + $0x24] ss:$8 sps:$4 sm:$0xff]   ;;  %v5359_v41 = vld [vmem:[%s6121_s14 + $0x20] ss:$8 sps:$4 sm:$0xff]   ;;  %v5364_v42 = vld [vmem:[%s6121_s14 + $0x34] ss:$8 sps:$4 sm:$0xff]  }
  0x79   : > { %799 = vperm.xlu0 %5259, %v701_v50   ;;  %v3211_v44 = vld [vmem:[%s6941_s9 + $0x10] sm:$0xff]  ;;  %v3213_v50 = vld [vmem:[%s6941_s9 + $0x20] sm:$0xff] }
  0x7a   : > { %4921 = vmatpush3.bf16.msra.mxu0 %v5291_v47  ;;  %v5362_v46 = vld [vmem:[%s6121_s14 + $0x30] ss:$8 sps:$4 sm:$0xff]   ;;  %v5335_v49 = vld [vmem:[%s6935_s3 + $0xe4] ss:$16 sps:$4 sm:$0xff]  }
  0x7b   : > { %5033 = vmatpush3.bf16.msra.mxu1 %v5292_v48  ;;  %v5334_v47 = vld [vmem:[%s6935_s3 + $0xc8] ss:$16 sps:$4 sm:$0xff]   ;;  %v5373_v52 = vld [vmem:[%s6121_s14 + $0x44] ss:$8 sps:$4 sm:$0xff]   ;;  %v5376_v54 = vld [vmem:[%s6121_s14 + $0x54] ss:$8 sps:$4 sm:$0xff]  }
  0x7c   : > { %814 = vperm.xlu1 %5260, %v704_v55   ;;  %2345 = vmatprep.subr.bf16.mxu1 %v5349_v28  ;;  %v3214_v48 = vld [vmem:[%s6941_s9 + $0x28] sm:$0xff]  ;;  %v3216_v55 = vld [vmem:[%s6941_s9 + $0x38] sm:$0xff] }
  0x7d   : > { %1422 = vmatmul.mubr.bf16.vlgmr.msra.gmra.mrb[0].mxu0 %v5293_v51  ;;  %809 = vperm.xlu0 %5259, %v703_v56   ;;  %v5337_v51 = vld [vmem:[%s6935_s3 + $0xec] ss:$16 sps:$4 sm:$0xff]   ;;  %v3215_v56 = vld [vmem:[%s6941_s9 + $0x30] sm:$0xff]  ;;  %v5410_v28 = vld [vmem:[%s6121_s14 + $0xa0] ss:$8 sps:$4 sm:$0xff]  }
  0x7e   : > { %1583 = vmatmul.mubr.bf16.vlgmr.msra.gmra.mrb[0].mxu1 %v5296_v53  ;;  %1429 = vmatprep.mubr.bf16.mxu0 %v5299_v57  ;;  %v5371_v53 = vld [vmem:[%s6121_s14 + $0x40] ss:$8 sps:$4 sm:$0xff]  }
  0x7f   : > { %1590 = vmatprep.mubr.bf16.mxu1 %v5301_v58  ;;  %2346 = vmatpush1.bf16.msra.mxu1 %v5347_v29  ;;  %v5339_v57 = vld [vmem:[%s6935_s3 + $0xe0] ss:$16 sps:$4 sm:$0xff]   ;;  %v5340_v58 = vld [vmem:[%s6935_s3 + $0xe8] ss:$16 sps:$4 sm:$0xff]   ;;  %v5415_v29 = vld [vmem:[%s6121_s14 + $0xb4] ss:$8 sps:$4 sm:$0xff]  }
  0x80   : > { %824 = vperm.xlu1 %5260, %v706_v59   ;;  %2347 = vmatprep.subr.bf16.mxu1 %v5352_v30  ;;  %v5374_v59 = vld [vmem:[%s6121_s14 + $0x50] ss:$8 sps:$4 sm:$0xff]  }
  0x81   : > { %819 = vperm.xlu0 %5259, %v705_v60   ;;  %v3218_v60 = vld [vmem:[%s6941_s9 + $0x48] sm:$0xff]  ;;  %v3228_v30 = vld [vmem:[%s6941_s9 + $0x98] sm:$0xff] }
  0x83   : > { %2348 = vmatpush1.bf16.msra.mxu1 %v5350_v35  ;;  %v3230_v35 = vld [vmem:[%s6941_s9 + $0xa8] sm:$0xff] }
  0x84   : > { %834 = vperm.xlu1 %5260, %v708_v63   ;;  %2349 = vmatprep.subr.bf16.mxu1 %v5361_v40  ;;  %v5343_v63 = vld [vmem:[%s6935_s3 + $0x10c] ss:$16 sps:$4 sm:$0xff]   ;;  %v5422_v40 = vld [vmem:[%s6121_s14 + $0xc0] ss:$8 sps:$4 sm:$0xff]  }
  0x85   : > { %1430 = vmatmul.mubr.bf16.gmra.mrb[4].mxu0 %v5303_v61  ;;  %829 = vperm.xlu0 %5259, %v707_v2   ;;  %v3217_v61 = vld [vmem:[%s6941_s9 + $0x40] sm:$0xff] }
  0x86   : > { %1591 = vmatmul.mubr.bf16.gmra.mrb[4].mxu1 %v5304_v62  ;;  %1437 = vmatprep.mubr.bf16.mxu0 %v5305_v1  ;;  %v5341_v62 = vld [vmem:[%s6935_s3 + $0x104] ss:$16 sps:$4 sm:$0xff]   ;;  %v5383_v2 = vld [vmem:[%s6121_s14 + $0x60] ss:$8 sps:$4 sm:$0xff]  }
  0x87   : > { %1598 = vmatprep.mubr.bf16.mxu1 %v5307_v3  ;;  %2350 = vmatpush1.bf16.msra.mxu1 %v5359_v41  ;;  %v5385_v1 = vld [vmem:[%s6121_s14 + $0x64] ss:$8 sps:$4 sm:$0xff]   ;;  %v5388_v3 = vld [vmem:[%s6121_s14 + $0x74] ss:$8 sps:$4 sm:$0xff]  }
  0x88   : > { %844 = vperm.xlu1 %5260, %v710_v4   ;;  %2351 = vmatprep.subr.bf16.mxu1 %v5364_v42  ;;  %v3220_v4 = vld [vmem:[%s6941_s9 + $0x58] sm:$0xff] }
  0x89   : > { %839 = vperm.xlu0 %5259, %v709_v5   ;;  %v3219_v5 = vld [vmem:[%s6941_s9 + $0x50] sm:$0xff]  ;;  %v3232_v42 = vld [vmem:[%s6941_s9 + $0xb8] sm:$0xff] }
  0x8a   : > { %v5427_v41 = vld [vmem:[%s6121_s14 + $0xd4] ss:$8 sps:$4 sm:$0xff]  }
  0x8b   : > { %2352 = vmatpush1.bf16.msra.mxu1 %v5362_v46  ;;  %v5425_v46 = vld [vmem:[%s6121_s14 + $0xd0] ss:$8 sps:$4 sm:$0xff]  }
  0x8c   : > { %854 = vperm.xlu1 %5260, %v712_v8   ;;  %2353 = vmatprep.subr.bf16.mxu1 %v5373_v52  ;;  %v3222_v8 = vld [vmem:[%s6941_s9 + $0x68] sm:$0xff] }
  0x8d   : > { %1438 = vmatmul.mubr.bf16.gmra.mrb[8].mxu0 %v5309_v6  ;;  %849 = vperm.xlu0 %5259, %v711_v10   ;;  %v5345_v6 = vld [vmem:[%s6935_s3 + $0x100] ss:$16 sps:$4 sm:$0xff]  }
  0x8e   : > { %1599 = vmatmul.mubr.bf16.gmra.mrb[8].mxu1 %v5310_v7  ;;  %1445 = vmatprep.mubr.bf16.mxu0 %v5311_v9  ;;  %v5346_v7 = vld [vmem:[%s6935_s3 + $0x108] ss:$16 sps:$4 sm:$0xff]   ;;  %v3221_v10 = vld [vmem:[%s6941_s9 + $0x60] sm:$0xff] }
  0x8f   : > { %1606 = vmatprep.mubr.bf16.mxu1 %v5313_v11  ;;  %2354 = vmatpush1.bf16.msra.mxu1 %v5371_v53  ;;  %v5386_v9 = vld [vmem:[%s6121_s14 + $0x70] ss:$8 sps:$4 sm:$0xff]   ;;  %v5353_v11 = vld [vmem:[%s6935_s3 + $0x124] ss:$16 sps:$4 sm:$0xff]   ;;  %v5434_v52 = vld [vmem:[%s6121_s14 + $0xe0] ss:$8 sps:$4 sm:$0xff]  }
  0x90   : > { %864 = vperm.xlu1 %5260, %v714_v12   ;;  %2355 = vmatprep.subr.bf16.mxu1 %v5376_v54  ;;  %v5355_v12 = vld [vmem:[%s6935_s3 + $0x12c] ss:$16 sps:$4 sm:$0xff]  }
  0x91   : > { %859 = vperm.xlu0 %5259, %v713_v13   ;;  %v5397_v13 = vld [vmem:[%s6121_s14 + $0x84] ss:$8 sps:$4 sm:$0xff]   ;;  %v5445_v53 = vld [vmem:[#allocation2 + $0x14] ss:$8 sps:$4 sm:$0xff]  }
  0x92   : > { %v5439_v54 = vld [vmem:[%s6121_s14 + $0xf4] ss:$8 sps:$4 sm:$0xff]  }
  0x93   : > { %2356 = vmatpush1.bf16.msra.mxu1 %v5374_v59  ;;  %v5437_v59 = vld [vmem:[%s6121_s14 + $0xf0] ss:$8 sps:$4 sm:$0xff]  }
  0x94   : > { %874 = vperm.xlu1 %5260, %v716_v16   ;;  %2357 = vmatprep.subr.bf16.mxu1 %v5385_v1  ;;  %v5400_v16 = vld [vmem:[%s6121_s14 + $0x94] ss:$8 sps:$4 sm:$0xff]  }
  0x95   : > { %1446 = vmatmul.mubr.bf16.gmra.mrb[12].mxu0 %v5315_v14  ;;  %869 = vperm.xlu0 %5259, %v715_v18   ;;  %v5395_v14 = vld [vmem:[%s6121_s14 + $0x80] ss:$8 sps:$4 sm:$0xff]   ;;  %v5403_v1 = vld [vmem:[%s6935_s3 + $0x1ac] ss:$16 sps:$4 sm:$0xff]  }
  0x96   : > { %1607 = vmatmul.mubr.bf16.gmra.mrb[12].mxu1 %v5316_v15  ;;  %1453 = vmatprep.mubr.bf16.mxu0 %v5317_v17  ;;  %v5407_v15 = vld [vmem:[#allocation2 + $0x4] ss:$8 sps:$4 sm:$0xff]   ;;  %v3224_v17 = vld [vmem:[%s6941_s9 + $0x78] sm:$0xff]  ;;  %v5405_v18 = vld [vmem:[#allocation2] ss:$8 sps:$4 sm:$0xff]  }
  0x97   : > { %1614 = vmatprep.mubr.bf16.mxu1 %v5319_v19  ;;  %2358 = vmatpush1.bf16.msra.mxu1 %v5383_v2  ;;  %v3223_v19 = vld [vmem:[%s6941_s9 + $0x70] sm:$0xff]  ;;  %v5454_v2 = vld [vmem:[#allocation2 + $0x24] ss:$8 sps:$4 sm:$0xff]  }
  0x98   : > { %2132 = vperm.xlu1 %5260, %v2120_v20   ;;  %2359 = vmatprep.subr.bf16.mxu1 %v5388_v3  ;;  %v5357_v20 = vld [vmem:[%s6935_s3 + $0x120] ss:$16 sps:$4 sm:$0xff]   ;;  %v3240_v3 = vld [vmem:[%s6941_s9 + $0xf8] sm:$0xff] }
  0x99   : > { %2127 = vperm.xlu0 %5259, %v2119_v21   ;;  %v5358_v21 = vld [vmem:[%s6935_s3 + $0x128] ss:$16 sps:$4 sm:$0xff]   ;;  %1888 = vmatprep.subr.bf16.mxu0 %v5407_v15  ;;  %v3659_v15 = vld [vmem:[%s6943_s11 + $0x10] sm:$0xff] }
  0x9a   : > { %1889 = vmatpush1.bf16.msra.mxu0 %v5405_v18  ;;  %v3662_v18 = vld [vmem:[%s6943_s11 + $0x28] sm:$0xff] }
  0x9b   : > { %2360 = vmatpush1.bf16.msra.mxu1 %v5386_v9  ;;  %1890 = vmatprep.subr.bf16.mxu0 %v5445_v53  ;;  %v3658_v9 = vld [vmem:[%s6943_s11 + $0x8] sm:$0xff] }
  0x9c   : > { %2142 = vperm.xlu1 %5260, %v2122_v24   ;;  %2361 = vmatprep.subr.bf16.mxu1 %v5397_v13  ;;  %v5365_v24 = vld [vmem:[%s6935_s3 + $0x144] ss:$16 sps:$4 sm:$0xff]   ;;  %v5455_v13 = vld [vmem:[#allocation2 + $0x30] ss:$8 sps:$4 sm:$0xff]   ;;  %v3686_v53 = vld [vmem:[%s6943_s11 + $0xe8] sm:$0xff] }
  0x9d   : > { %1454 = vmatmul.mubr.bf16.gmra.mrb[16].mxu0 %v5321_v22  ;;  %2137 = vperm.xlu0 %5259, %v2121_v25   ;;  %v5398_v22 = vld [vmem:[%s6121_s14 + $0x90] ss:$8 sps:$4 sm:$0xff]   ;;  %v3225_v25 = vld [vmem:[%s6941_s9 + $0x80] sm:$0xff] }
  0x9e   : > { %1615 = vmatmul.mubr.bf16.gmra.mrb[16].mxu1 %v5322_v23  ;;  %1461 = vmatprep.mubr.bf16.mxu0 %v5323_v26  ;;  %v3226_v23 = vld [vmem:[%s6941_s9 + $0x88] sm:$0xff] }
  0x9f   : > { %1622 = vmatprep.mubr.bf16.mxu1 %v5325_v27  ;;  %2362 = vmatpush1.bf16.msra.mxu1 %v5395_v14  ;;  %v5367_v26 = vld [vmem:[%s6935_s3 + $0x14c] ss:$16 sps:$4 sm:$0xff]  }
  0xa0   : > { %2152 = vperm.xlu1 %5260, %v2124_v31   ;;  %2363 = vmatprep.subr.bf16.mxu1 %v5400_v16  ;;  %v5412_v27 = vld [vmem:[%s6121_s14 + $0xa4] ss:$8 sps:$4 sm:$0xff]   ;;  %v3227_v31 = vld [vmem:[%s6941_s9 + $0x90] sm:$0xff]  ;;  %v3660_v14 = vld [vmem:[%s6943_s11 + $0x18] sm:$0xff] }
  0xa1   : > { %2147 = vperm.xlu0 %5259, %v2123_v32   ;;  %v5369_v32 = vld [vmem:[%s6935_s3 + $0x140] ss:$16 sps:$4 sm:$0xff]  }
  0xa2   : > { %v5420_v16 = vld [vmem:[%s6935_s3 + $0x1c0] ss:$16 sps:$4 sm:$0xff]  }
  0xa3   : > { %2364 = vmatpush1.bf16.msra.mxu1 %v5398_v22  ;;  %v3664_v22 = vld [vmem:[%s6943_s11 + $0x38] sm:$0xff] }
  0xa4   : > { %3248 = vperm.xlu1 %5260, %v3210_v36   ;;  %2365 = vmatprep.subr.bf16.mxu1 %v5412_v27  ;;  %v3229_v36 = vld [vmem:[%s6941_s9 + $0xa0] sm:$0xff] }
  0xa5   : > { %1462 = vmatmul.mubr.bf16.gmra.mrb[20].mxu0 %v5327_v33  ;;  %3243 = vperm.xlu0 %5259, %v3209_v37   ;;  %v5370_v33 = vld [vmem:[%s6935_s3 + $0x148] ss:$16 sps:$4 sm:$0xff]   ;;  %v5377_v37 = vld [vmem:[%s6935_s3 + $0x164] ss:$16 sps:$4 sm:$0xff]  }
  0xa6   : > { %1623 = vmatmul.mubr.bf16.gmra.mrb[20].mxu1 %v5328_v34  ;;  %1469 = vmatprep.mubr.bf16.mxu0 %v5329_v38  ;;  %v5413_v34 = vld [vmem:[%s6121_s14 + $0xb0] ss:$8 sps:$4 sm:$0xff]   ;;  %v5379_v38 = vld [vmem:[%s6935_s3 + $0x16c] ss:$16 sps:$4 sm:$0xff]  }
  0xa7   : > { %1630 = vmatprep.mubr.bf16.mxu1 %v5331_v39  ;;  %2366 = vmatpush1.bf16.msra.mxu1 %v5410_v28  ;;  %v5424_v39 = vld [vmem:[%s6121_s14 + $0xc4] ss:$8 sps:$4 sm:$0xff]  }
  0xa8   : > { %3258 = vperm.xlu1 %5260, %v3212_v43   ;;  %2367 = vmatprep.subr.bf16.mxu1 %v5415_v29  ;;  %v3231_v43 = vld [vmem:[%s6941_s9 + $0xb0] sm:$0xff]  ;;  %v5442_v27 = vld [vmem:[#allocation5 + $0x4] ss:$8 sps:$4 sm:$0xff]   ;;  %v3668_v29 = vld [vmem:[%s6943_s11 + $0x58] sm:$0xff] }
  0xa9   : > { %3253 = vperm.xlu0 %5259, %v3211_v44   ;;  %v5381_v44 = vld [vmem:[%s6935_s3 + $0x160] ss:$16 sps:$4 sm:$0xff]  }
  0xaa   : > { %v3665_v28 = vld [vmem:[%s6943_s11 + $0x40] sm:$0xff] }
  0xab   : > { %2368 = vmatpush1.bf16.msra.mxu1 %v5413_v34  ;;  %v3669_v34 = vld [vmem:[%s6943_s11 + $0x60] sm:$0xff] }
  0xac   : > { %3268 = vperm.xlu1 %5260, %v3214_v48   ;;  %2369 = vmatprep.subr.bf16.mxu1 %v5424_v39  ;;  %v3233_v48 = vld [vmem:[%s6941_s9 + $0xc0] sm:$0xff] }
  0xad   : > { %1470 = vmatmul.mubr.bf16.gmra.mrb[24].mxu0 %v5333_v45  ;;  %3263 = vperm.xlu0 %5259, %v3213_v50   ;;  %v5382_v45 = vld [vmem:[%s6935_s3 + $0x168] ss:$16 sps:$4 sm:$0xff]   ;;  %v5391_v50 = vld [vmem:[%s6935_s3 + $0x18c] ss:$16 sps:$4 sm:$0xff]  }
  0xae   : > { %1631 = vmatmul.mubr.bf16.gmra.mrb[24].mxu1 %v5334_v47  ;;  %1477 = vmatprep.mubr.bf16.mxu0 %v5335_v49  ;;  %v3234_v47 = vld [vmem:[%s6941_s9 + $0xc8] sm:$0xff]  ;;  %v5389_v49 = vld [vmem:[%s6935_s3 + $0x184] ss:$16 sps:$4 sm:$0xff]  }
  0xaf   : > { %1638 = vmatprep.mubr.bf16.mxu1 %v5337_v51  ;;  %2370 = vmatpush1.bf16.msra.mxu1 %v5422_v40  ;;  %v5436_v51 = vld [vmem:[%s6121_s14 + $0xe4] ss:$8 sps:$4 sm:$0xff]   ;;  %s538_s14 = sand.u32 1, %s5690_s19  }
  0xb0   : > { %3278 = vperm.xlu1 %5260, %v3216_v55   ;;  %2371 = vmatprep.subr.bf16.mxu1 %v5427_v41  ;;  %v3236_v55 = vld [vmem:[%s6941_s9 + $0xd8] sm:$0xff]  ;;  %v5449_v39 = vld [vmem:[#allocation5 + $0x24] ss:$8 sps:$4 sm:$0xff]   ;;  %s4634_s18 = sshll.u32 %s538_s14, 9  ;;  %s6887_s26 = scalar_lea.sflag [#allocation4], %s538_s14 }
  0xb1   : > { %3273 = vperm.xlu0 %5259, %v3215_v56   ;;  %v5443_v56 = vld [vmem:[#allocation2 + $0x10] ss:$8 sps:$4 sm:$0xff]   ;;  %v3673_v40 = vld [vmem:[%s6943_s11 + $0x80] sm:$0xff]  ;;  %s6808_s30 = scalar_lea.vmem [#allocation7], %s4634_s18  ;;  %s5632_s18 = sshll.u32 %s5705_s22, 4  ;;  %s5633_s18 = int_to_ptr.vmem [resolvable:$false] %s5632_s18 }
  0xb2   : > { %1891 = vmatpush1.bf16.msra.mxu0 %v5443_v56  ;;  %v3676_v41 = vld [vmem:[%s6943_s11 + $0x98] sm:$0xff]  ;;  %s4505_s16 = sshll.u32 %s6808_s30, 4  ;;  %s5634_s21 = scalar_lea.vmem %s5633_s18, 16384  ;;  %s6883_s16 = int_to_ptr.vmem [resolvable:$true] %s4505_s16 }
  0xb3   : > { %2372 = vmatpush1.bf16.msra.mxu1 %v5425_v46  ;;  %1892 = vmatprep.subr.bf16.mxu0 %v5454_v2  ;;  %v3680_v46 = vld [vmem:[%s6943_s11 + $0xb8] sm:$0xff]  ;;  %s5628_s27 = scalar_lea.vmem %s6883_s16, 8192  ;;  %p5635_p4 = scmp.lt.s32.totalorder %s6883_s16, %s5633_s18 }
  0xb4   : > { %3288 = vperm.xlu1 %5260, %v3218_v60   ;;  %2373 = vmatprep.subr.bf16.mxu1 %v5436_v51  ;;  %v5394_v60 = vld [vmem:[%s6935_s3 + $0x188] ss:$16 sps:$4 sm:$0xff]   ;;  %v3683_v51 = vld [vmem:[%s6943_s11 + $0xd0] sm:$0xff]  ;;  %p5629_p12 = scmp.ne.s32.totalorder %s6883_s16, %s5628_s27  ;;  %p5636_p7 = scmp.lt.s32.totalorder %s5634_s21, %s5628_s27 }
  0xb5   : > { %1478 = vmatmul.mubr.bf16.gmra.mrb[28].mxu0 %v5339_v57  ;;  %3283 = vperm.xlu0 %5259, %v3217_v61   ;;  %v3235_v57 = vld [vmem:[%s6941_s9 + $0xd0] sm:$0xff]  ;;  %v3238_v61 = vld [vmem:[%s6941_s9 + $0xe8] sm:$0xff]  ;;  %v3688_v56 = vld [vmem:[%s6943_s11 + $0xf8] sm:$0xff] }
  0xb6   : > { %1639 = vmatmul.mubr.bf16.gmra.mrb[28].mxu1 %v5340_v58  ;;  %1485 = vmatprep.mubr.bf16.mxu0 %v5341_v62  ;;  %v5393_v58 = vld [vmem:[%s6935_s3 + $0x180] ss:$16 sps:$4 sm:$0xff]   ;;  %p5630_p2 = pnand %p5629_p12, %p6980_p1  ;;  %p5637_p8 = por %p5636_p7, %p5635_p4 }
  0xb7   : > { %1646 = vmatprep.mubr.bf16.mxu1 %v5343_v63  ;;  %2374 = vmatpush1.bf16.msra.mxu1 %v5434_v52  ;;  %v3237_v62 = vld [vmem:[%s6941_s9 + $0xe0] sm:$0xff] }
  0xb8   : > { %3298 = vperm.xlu1 %5260, %v3220_v4   ;;  %2375 = vmatprep.subr.bf16.mxu1 %v5439_v54  ;;  %v5401_v63 = vld [vmem:[%s6935_s3 + $0x1a4] ss:$16 sps:$4 sm:$0xff]   ;;  %v5452_v4 = vld [vmem:[#allocation2 + $0x20] ss:$8 sps:$4 sm:$0xff]   ;;  %p5631_p3 = pneg %p5630_p2 }
  0xb9   : > { %3293 = vperm.xlu0 %5259, %v3219_v5   ;;  %v3239_v5 = vld [vmem:[%s6941_s9 + $0xf0] sm:$0xff]  ;;  %1893 = vmatpush1.bf16.msra.mxu0 %v5452_v4 }
  0xba   : > { %p5638_p11 = pnand %p5637_p8, %p5631_p3 }
  0xbb   : > { %2376 = vmatpush1.bf16.msra.mxu1 %v5437_v59 }
  0xbc   : > { %3308 = vperm.xlu1 %5260, %v3222_v8   ;;  %v5409_v8 = vld [vmem:[%s6935_s3 + $0x1a8] ss:$16 sps:$4 sm:$0xff]  }
  0xbd   : > { %1486 = vmatmul.mubr.bf16.gmra.mrb[32].mxu0 %v5345_v6  ;;  %3303 = vperm.xlu0 %5259, %v3221_v10   ;;  %v5457_v6 = vld [vmem:[#allocation2 + $0x34] ss:$8 sps:$4 sm:$0xff]  }
  0xbe   : > { %1647 = vmatmul.mubr.bf16.gmra.mrb[32].mxu1 %v5346_v7  ;;  %1493 = vmatprep.mubr.bf16.mxu0 %v5353_v11  ;;  %v5408_v7 = vld [vmem:[%s6935_s3 + $0x1a0] ss:$16 sps:$4 sm:$0xff]   ;;  %v5416_v10 = vld [vmem:[%s6935_s3 + $0x1c4] ss:$16 sps:$4 sm:$0xff]  }
  0xbf   : > { %1654 = vmatprep.mubr.bf16.mxu1 %v5355_v12  ;;  %v3657_v11 = vld [vmem:[%s6943_s11] sm:$0xff]  ;;  %v5418_v12 = vld [vmem:[%s6935_s3 + $0x1cc] ss:$16 sps:$4 sm:$0xff]   ;;  %1894 = vmatprep.subr.bf16.mxu0 %v5457_v6 }
  0xc0   : > { %3318 = vperm.xlu1 %5260, %v3224_v17   ;;  %v5421_v17 = vld [vmem:[%s6935_s3 + $0x1c8] ss:$16 sps:$4 sm:$0xff]   ;;  %1895 = vmatpush1.bf16.msra.mxu0 %v5455_v13 }
  0xc1   : > { %3313 = vperm.xlu0 %5259, %v3223_v19   ;;  %v5428_v19 = vld [vmem:[%s6935_s3 + $0x1e4] ss:$16 sps:$4 sm:$0xff]  }
  0xc4   : > { %3328 = vperm.xlu1 %5260, %v3226_v23   ;;  %v3663_v23 = vld [vmem:[%s6943_s11 + $0x30] sm:$0xff] }
  0xc5   : > { %1494 = vmatmul.mubr.bf16.gmra.mrb[36].mxu0 %v5357_v20  ;;  %3323 = vperm.xlu0 %5259, %v3225_v25   ;;  %v3661_v20 = vld [vmem:[%s6943_s11 + $0x20] sm:$0xff]  ;;  %v5433_v25 = vld [vmem:[%s6935_s3 + $0x1e8] ss:$16 sps:$4 sm:$0xff]  }
  0xc6   : > { %1655 = vmatmul.mubr.bf16.gmra.mrb[36].mxu1 %v5358_v21  ;;  %1501 = vmatprep.mubr.bf16.mxu0 %v5365_v24  ;;  %v5430_v21 = vld [vmem:[%s6935_s3 + $0x1ec] ss:$16 sps:$4 sm:$0xff]   ;;  %v5432_v24 = vld [vmem:[%s6935_s3 + $0x1e0] ss:$16 sps:$4 sm:$0xff]  }
  0xc7   : > { %1662 = vmatprep.mubr.bf16.mxu1 %v5367_v26  ;;  %v3666_v26 = vld [vmem:[%s6943_s11 + $0x48] sm:$0xff] }
  0xc8   : > { %3338 = vperm.xlu1 %5260, %v3228_v30   ;;  %v3667_v30 = vld [vmem:[%s6943_s11 + $0x50] sm:$0xff] }
  0xc9   : > { %3333 = vperm.xlu0 %5259, %v3227_v31   ;;  %v5440_v31 = vld [vmem:[#allocation5] ss:$8 sps:$4 sm:$0xff]  }
  0xcc   : > { %3348 = vperm.xlu1 %5260, %v3230_v35   ;;  %v3672_v35 = vld [vmem:[%s6943_s11 + $0x78] sm:$0xff] }
  0xcd   : > { %1502 = vmatmul.mubr.bf16.gmra.mrb[40].mxu0 %v5369_v32  ;;  %3343 = vperm.xlu0 %5259, %v3229_v36   ;;  %v3670_v32 = vld [vmem:[%s6943_s11 + $0x68] sm:$0xff]  ;;  %v3671_v36 = vld [vmem:[%s6943_s11 + $0x70] sm:$0xff] }
  0xce   : > { %1663 = vmatmul.mubr.bf16.gmra.mrb[40].mxu1 %v5370_v33  ;;  %1509 = vmatprep.mubr.bf16.mxu0 %v5377_v37  ;;  %v5446_v33 = vld [vmem:[#allocation5 + $0x14] ss:$8 sps:$4 sm:$0xff]   ;;  %v5448_v37 = vld [vmem:[#allocation5 + $0x10] ss:$8 sps:$4 sm:$0xff]  }
  0xcf   : > { %1670 = vmatprep.mubr.bf16.mxu1 %v5379_v38  ;;  %v3674_v38 = vld [vmem:[%s6943_s11 + $0x88] sm:$0xff] }
  0xd0   : > { %3358 = vperm.xlu1 %5260, %v3232_v42   ;;  %v3675_v42 = vld [vmem:[%s6943_s11 + $0x90] sm:$0xff] }
  0xd1   : > { %3353 = vperm.xlu0 %5259, %v3231_v43   ;;  %v5451_v43 = vld [vmem:[#allocation5 + $0x20] ss:$8 sps:$4 sm:$0xff]  }
  0xd4   : > { %3368 = vperm.xlu1 %5260, %v3234_v47   ;;  %v3679_v47 = vld [vmem:[%s6943_s11 + $0xb0] sm:$0xff] }
  0xd5   : > { %1510 = vmatmul.mubr.bf16.gmra.mrb[44].mxu0 %v5381_v44  ;;  %3363 = vperm.xlu0 %5259, %v3233_v48   ;;  %v3678_v44 = vld [vmem:[%s6943_s11 + $0xa8] sm:$0xff] }
  0xd6   : > { %1671 = vmatmul.mubr.bf16.gmra.mrb[44].mxu1 %v5382_v45  ;;  %1517 = vmatprep.mubr.bf16.mxu0 %v5389_v49  ;;  %v3677_v45 = vld [vmem:[%s6943_s11 + $0xa0] sm:$0xff]  ;;  %v3682_v48 = vld [vmem:[%s6943_s11 + $0xc8] sm:$0xff]  ;;  %v720_v52 = vpop.permute.xlu0 %719  ;;  %v730_v54 = vpop.permute.xlu1 %729 }
  0xd7   : > { %1678 = vmatprep.mubr.bf16.mxu1 %v5391_v50  ;;  %v3681_v49 = vld [vmem:[%s6943_s11 + $0xc0] sm:$0xff]  ;;  %v3684_v50 = vld [vmem:[%s6943_s11 + $0xd8] sm:$0xff] }
  0xd8   : > { %3378 = vperm.xlu1 %5260, %v3236_v55   ;;  %v3685_v55 = vld [vmem:[%s6943_s11 + $0xe0] sm:$0xff] }
  0xd9   : > { %3373 = vperm.xlu0 %5259, %v3235_v57   ;;  %v3687_v57 = vld [vmem:[%s6943_s11 + $0xf0] sm:$0xff] }
  0xda   : > { %v735_v59 = vpop.permute.xlu1 %734 }
  0xdc   : > { %3388 = vperm.xlu1 %5260, %v3238_v61  }
  0xdd   : > { %1518 = vmatmul.mubr.bf16.gmra.mrb[48].mxu0 %v5393_v58  ;;  %3383 = vperm.xlu0 %5259, %v3237_v62   ;;  %v725_v58 = vpop.permute.xlu0 %724 }
  0xde   : > { %1679 = vmatmul.mubr.bf16.gmra.mrb[48].mxu1 %v5394_v60  ;;  %1525 = vmatprep.mubr.bf16.mxu0 %v5401_v63  ;;  %v4427_v60 = vld [vmem:[%s6945_s13] sm:$0x7f] }
  0xdf   : > { %1686 = vmatprep.mubr.bf16.mxu1 %v5403_v1 }
  0xe0   : > { %3398 = vperm.xlu1 %5260, %v3240_v3  }
  0xe1   : > { %3393 = vperm.xlu0 %5259, %v3239_v5   ;;  %v740_v61 = vpop.permute.xlu0 %739 }
  0xe4   : > { %3696 = vperm.xlu1 %5260, %v3658_v9  }
  0xe5   : > { %1526 = vmatmul.mubr.bf16.gmra.mrb[52].mxu0 %v5408_v7  ;;  %3691 = vperm.xlu0 %5259, %v3657_v11  }
  0xe6   : > { %1687 = vmatmul.mubr.bf16.gmra.mrb[52].mxu1 %v5409_v8  ;;  %1533 = vmatprep.mubr.bf16.mxu0 %v5416_v10 }
  0xe7   : > { %1694 = vmatprep.mubr.bf16.mxu1 %v5418_v12 }
  0xe8   : > { %3706 = vperm.xlu1 %5260, %v3660_v14  }
  0xe9   : > { %3701 = vperm.xlu0 %5259, %v3659_v15  }
  0xec   : > { %3716 = vperm.xlu1 %5260, %v3662_v18  }
  0xed   : > { %1534 = vmatmul.mubr.bf16.gmra.mrb[56].mxu0 %v5420_v16  ;;  %3711 = vperm.xlu0 %5259, %v3661_v20  }
  0xee   : > { %1695 = vmatmul.mubr.bf16.gmra.mrb[56].mxu1 %v5421_v17  ;;  %1541 = vmatprep.mubr.bf16.mxu0 %v5428_v19 }
  0xef   : > { %1702 = vmatprep.mubr.bf16.mxu1 %v5430_v21 }
  0xf0   : > { %3726 = vperm.xlu1 %5260, %v3664_v22  }
  0xf1   : > { %3721 = vperm.xlu0 %5259, %v3663_v23  }
  0xf4   : > { %3736 = vperm.xlu1 %5260, %v3666_v26  }
  0xf5   : > { %1542 = vmatmul.mubr.bf16.gmra.mrb[60].mxu0 %v5432_v24  ;;  %3731 = vperm.xlu0 %5259, %v3665_v28  }
  0xf6   : > { %1703 = vmatmul.mubr.bf16.gmra.mrb[60].mxu1 %v5433_v25  ;;  %1920 = vmatprep.mubr.bf16.mxu0 %v5704_v0 }
  0xf7   : > { %2377 = vmatprep.mubr.bf16.mxu1 %v5442_v27 }
  0xf8   : > { %3746 = vperm.xlu1 %5260, %v3668_v29  }
  0xf9   : > { %3741 = vperm.xlu0 %5259, %v3667_v30  }
  0xfc   : > { %3756 = vperm.xlu1 %5260, %v3670_v32  }
  0xfd   : > { %3751 = vperm.xlu0 %5259, %v3669_v34  }
  0xfe   : > { %2378 = vmatmul.mubr.bf16.vlgmr.msra.gmra.mrb[64].mxu1 %v5440_v31 }
  0xff   : > { %2387 = vmatprep.mubr.bf16.mxu1 %v5446_v33 }
 0x100   : > { %3766 = vperm.xlu1 %5260, %v3672_v35  }
 0x101   : > { %3761 = vperm.xlu0 %5259, %v3671_v36  }
 0x104   : > { %3776 = vperm.xlu1 %5260, %v3674_v38  }
 0x105   : > { %3771 = vperm.xlu0 %5259, %v3673_v40  }
 0x106   : > { %2388 = vmatmul.mubr.bf16.gmra.mrb[68].mxu1 %v5448_v37 }
 0x107   : > { %2397 = vmatprep.mubr.bf16.mxu1 %v5449_v39 }
 0x108   : > { %3786 = vperm.xlu1 %5260, %v3676_v41  }
 0x109   : > { %3781 = vperm.xlu0 %5259, %v3675_v42  }
 0x10c   : > { %3796 = vperm.xlu1 %5260, %v3678_v44  }
 0x10d   : > { %3791 = vperm.xlu0 %5259, %v3677_v45  }
 0x10e   : > { %2398 = vmatmul.mubr.bf16.gmra.mrb[72].mxu1 %v5451_v43 }
 0x10f   : > { %2695 = vmatprep.mubr.bf16.mxu1 %v5704_v0 }
 0x110   : > { %3806 = vperm.xlu1 %5260, %v3680_v46  }
 0x111   : > { %3801 = vperm.xlu0 %5259, %v3679_v47  }
 0x114   : > { %3816 = vperm.xlu1 %5260, %v3682_v48  }
 0x115   : > { %3811 = vperm.xlu0 %5259, %v3681_v49  }
 0x118   : > { %3826 = vperm.xlu1 %5260, %v3684_v50  }
 0x119   : > { %3821 = vperm.xlu0 %5259, %v3683_v51  }
 0x11c   : > { %3836 = vperm.xlu1 %5260, %v3686_v53  }
 0x11d   : > { %3831 = vperm.xlu0 %5259, %v3685_v55  }
 0x120   : > { %3846 = vperm.xlu1 %5260, %v3688_v56  }
 0x121   : > { %3841 = vperm.xlu0 %5259, %v3687_v57  }
 0x125   : > { %4430 = vperm.xlu0 %5259, %v4427_v60  }
 0x150   : > { %v4922_v62 = vpop.f32.mrb[0].mxu0 }
 0x151   : > { %v5034_v63 = vpop.f32.mrb[0].mxu1  ;;  %v4923_v1 = vpop.f32.mrb[1].mxu0 }
 0x152   : > { %v4924_v2 = vadd.f32 %v4923_v1, %v4922_v62  ;;  %v5035_v3 = vpop.f32.mrb[1].mxu1  ;;  %v4925_v5 = vpop.f32.mrb[2].mxu0 }
 0x153   : > { %v5036_v4 = vadd.f32 %v5035_v3, %v5034_v63  ;;  %v5037_v7 = vpop.f32.mrb[2].mxu1  ;;  %v4926_v8 = vpop.f32.mrb[3].mxu0 }
 0x154   : > { %v1424_v6 = vadd.f32 %v4924_v2, %v720_v52  ;;  %v4927_v9 = vadd.f32 %v4926_v8, %v4925_v5  ;;  %v5038_v10 = vpop.f32.mrb[3].mxu1  ;;  %v745_v52 = vpop.permute.xlu1 %744 }
 0x155   : > { %v5039_v12 = vadd.f32 %v5038_v10, %v5037_v7  ;;  %v750_v1 = vpop.permute.xlu0 %749 }
 0x156   : > { %v1585_v11 = vadd.f32 %v5036_v4, %v1424_v6  ;;  %v1427_v13 = vadd.f32 %v4927_v9, %v725_v58 }
 0x158   : > { %v4928_v14 = vpop.f32.mrb[4].mxu0  ;;  %v1711_v15 = vmul.f32 0.01, %v1585_v11  ;;  %v1588_v16 = vadd.f32 %v5039_v12, %v1427_v13  ;;  %v755_v12 = vpop.permute.xlu1 %754 }
 0x159   : > { %v5040_v17 = vpop.f32.mrb[4].mxu1  ;;  %v4929_v18 = vpop.f32.mrb[5].mxu0 }
 0x15a   : > { %v4930_v19 = vadd.f32 %v4929_v18, %v4928_v14  ;;  %v5041_v20 = vpop.f32.mrb[5].mxu1  ;;  %v1712_v21 = vmul.f32 0.01, %v1588_v16  ;;  %v4931_v23 = vpop.f32.mrb[6].mxu0  ;;  %v1743_v27 = vmax.f32 %v1585_v11, %v1711_v15 }
 0x15b   : > { %v5042_v22 = vadd.f32 %v5041_v20, %v5040_v17  ;;  %v5043_v25 = vpop.f32.mrb[6].mxu1  ;;  %v4932_v26 = vpop.f32.mrb[7].mxu0 }
 0x15c   : > { %v1432_v24 = vadd.f32 %v4930_v19, %v730_v54  ;;  %v1744_v28 = vmax.f32 %v1588_v16, %v1712_v21  ;;  %v4933_v29 = vadd.f32 %v4932_v26, %v4931_v23  ;;  %v5044_v30 = vpop.f32.mrb[7].mxu1 }
 0x15d   : > { %v5045_v32 = vadd.f32 %v5044_v30, %v5043_v25 }
 0x15e   : > { %v1593_v31 = vadd.f32 %v5042_v22, %v1432_v24  ;;  %v1775_v33 = vpack.c.bf16 %v1744_v28, %v1743_v27  ;;  %v1435_v34 = vadd.f32 %v4933_v29, %v735_v59  ;;  %v760_v24 = vpop.permute.xlu0 %759 }
 0x160   : > { %v4934_v35 = vpop.f32.mrb[8].mxu0  ;;  %v1713_v36 = vmul.f32 0.01, %v1593_v31  ;;  %v1596_v37 = vadd.f32 %v5045_v32, %v1435_v34  ;;  %4745 = vmatmul.mubr.msk.bf16.vlgmr.msra.gmra.mrb[64].mxu0 %vm1839_vm0, %v1775_v33 }
 0x161   : > { %v5046_v38 = vpop.f32.mrb[8].mxu1  ;;  %v4935_v39 = vpop.f32.mrb[9].mxu0  ;;  %1930 = vmatprep.mubr.bf16.mxu0 %v5704_v0 }
 0x162   : > { %v4936_v40 = vadd.f32 %v4935_v39, %v4934_v35  ;;  %v5047_v41 = vpop.f32.mrb[9].mxu1  ;;  %v1714_v42 = vmul.f32 0.01, %v1596_v37  ;;  %v4937_v44 = vpop.f32.mrb[10].mxu0  ;;  %v1745_v48 = vmax.f32 %v1593_v31, %v1713_v36 }
 0x163   : > { %v5048_v43 = vadd.f32 %v5047_v41, %v5046_v38  ;;  %v5049_v46 = vpop.f32.mrb[10].mxu1  ;;  %v4938_v47 = vpop.f32.mrb[11].mxu0 }
 0x164   : > { %v1440_v45 = vadd.f32 %v4936_v40, %v740_v61  ;;  %v1746_v49 = vmax.f32 %v1596_v37, %v1714_v42  ;;  %v4939_v50 = vadd.f32 %v4938_v47, %v4937_v44  ;;  %v5050_v51 = vpop.f32.mrb[11].mxu1  ;;  %v765_v35 = vpop.permute.xlu1 %764 }
 0x165   : > { %v5051_v54 = vadd.f32 %v5050_v51, %v5049_v46  ;;  %v770_v47 = vpop.permute.xlu0 %769 }
 0x166   : > { %v1601_v53 = vadd.f32 %v5048_v43, %v1440_v45  ;;  %v1776_v55 = vpack.c.bf16 %v1746_v49, %v1745_v48  ;;  %v1443_v56 = vadd.f32 %v4939_v50, %v745_v52 }
 0x168   : > { %v4940_v57 = vpop.f32.mrb[12].mxu0  ;;  %v1715_v58 = vmul.f32 0.01, %v1601_v53  ;;  %v1604_v59 = vadd.f32 %v5051_v54, %v1443_v56  ;;  %4746 = vmatmul.mubr.msk.bf16.gmra.mrb[68].mxu0 %vm1839_vm0, %v1776_v55 }
 0x169   : > { %v5052_v60 = vpop.f32.mrb[12].mxu1  ;;  %v4941_v62 = vpop.f32.mrb[13].mxu0  ;;  %1940 = vmatprep.mubr.bf16.mxu0 %v5704_v0 }
 0x16a   : > { %v4942_v63 = vadd.f32 %v4941_v62, %v4940_v57  ;;  %v5053_v61 = vpop.f32.mrb[13].mxu1  ;;  %v1716_v2 = vmul.f32 0.01, %v1604_v59  ;;  %v4943_v4 = vpop.f32.mrb[14].mxu0  ;;  %v1747_v8 = vmax.f32 %v1601_v53, %v1715_v58 }
 0x16b   : > { %v5054_v3 = vadd.f32 %v5053_v61, %v5052_v60  ;;  %v5055_v6 = vpop.f32.mrb[14].mxu1  ;;  %v4944_v7 = vpop.f32.mrb[15].mxu0 }
 0x16c   : > { %v1448_v5 = vadd.f32 %v4942_v63, %v750_v1  ;;  %v1748_v9 = vmax.f32 %v1604_v59, %v1716_v2  ;;  %v4945_v10 = vadd.f32 %v4944_v7, %v4943_v4  ;;  %v5056_v11 = vpop.f32.mrb[15].mxu1  ;;  %v775_v58 = vpop.permute.xlu1 %774 }
 0x16d   : > { %v5057_v14 = vadd.f32 %v5056_v11, %v5055_v6  ;;  %v780_v7 = vpop.permute.xlu0 %779 }
 0x16e   : > { %v1609_v13 = vadd.f32 %v5054_v3, %v1448_v5  ;;  %v1777_v15 = vpack.c.bf16 %v1748_v9, %v1747_v8  ;;  %v1451_v16 = vadd.f32 %v4945_v10, %v755_v12 }
 0x170   : > { %v4946_v17 = vpop.f32.mrb[16].mxu0  ;;  %v1717_v18 = vmul.f32 0.01, %v1609_v13  ;;  %v1612_v19 = vadd.f32 %v5057_v14, %v1451_v16  ;;  %4747 = vmatmul.mubr.msk.bf16.gmra.mrb[72].mxu0 %vm1839_vm0, %v1777_v15 }
 0x171   : > { %v5058_v20 = vpop.f32.mrb[16].mxu1  ;;  %v4947_v21 = vpop.f32.mrb[17].mxu0  ;;  %1950 = vmatprep.mubr.bf16.mxu0 %v5704_v0 }
 0x172   : > { %v4948_v22 = vadd.f32 %v4947_v21, %v4946_v17  ;;  %v5059_v23 = vpop.f32.mrb[17].mxu1  ;;  %v1718_v25 = vmul.f32 0.01, %v1612_v19  ;;  %v4949_v27 = vpop.f32.mrb[18].mxu0  ;;  %v1749_v31 = vmax.f32 %v1609_v13, %v1717_v18 }
 0x173   : > { %v5060_v26 = vadd.f32 %v5059_v23, %v5058_v20  ;;  %v5061_v29 = vpop.f32.mrb[18].mxu1  ;;  %v4950_v30 = vpop.f32.mrb[19].mxu0 }
 0x174   : > { %v1456_v28 = vadd.f32 %v4948_v22, %v760_v24  ;;  %v1750_v32 = vmax.f32 %v1612_v19, %v1718_v25  ;;  %v4951_v33 = vadd.f32 %v4950_v30, %v4949_v27  ;;  %v5062_v34 = vpop.f32.mrb[19].mxu1  ;;  %v785_v18 = vpop.permute.xlu1 %784 }
 0x175   : > { %v5063_v37 = vadd.f32 %v5062_v34, %v5061_v29  ;;  %v790_v30 = vpop.permute.xlu0 %789 }
 0x176   : > { %v1617_v36 = vadd.f32 %v5060_v26, %v1456_v28  ;;  %v1778_v38 = vpack.c.bf16 %v1750_v32, %v1749_v31  ;;  %v1459_v39 = vadd.f32 %v4951_v33, %v765_v35 }
 0x178   : > { %v4952_v40 = vpop.f32.mrb[20].mxu0  ;;  %v1719_v41 = vmul.f32 0.01, %v1617_v36  ;;  %v1620_v42 = vadd.f32 %v5063_v37, %v1459_v39  ;;  %4748 = vmatmul.mubr.msk.bf16.gmra.mrb[76].mxu0 %vm1839_vm0, %v1778_v38 }
 0x179   : > { %v5064_v43 = vpop.f32.mrb[20].mxu1  ;;  %v4953_v44 = vpop.f32.mrb[21].mxu0  ;;  %1960 = vmatprep.mubr.bf16.mxu0 %v5704_v0 }
 0x17a   : > { %v4954_v45 = vadd.f32 %v4953_v44, %v4952_v40  ;;  %v5065_v46 = vpop.f32.mrb[21].mxu1  ;;  %v1720_v48 = vmul.f32 0.01, %v1620_v42  ;;  %v4955_v50 = vpop.f32.mrb[22].mxu0  ;;  %v1751_v54 = vmax.f32 %v1617_v36, %v1719_v41 }
 0x17b   : > { %v5066_v49 = vadd.f32 %v5065_v46, %v5064_v43  ;;  %v5067_v52 = vpop.f32.mrb[22].mxu1  ;;  %v4956_v53 = vpop.f32.mrb[23].mxu0 }
 0x17c   : > { %v1464_v51 = vadd.f32 %v4954_v45, %v770_v47  ;;  %v1752_v55 = vmax.f32 %v1620_v42, %v1720_v48  ;;  %v4957_v56 = vadd.f32 %v4956_v53, %v4955_v50  ;;  %v5068_v57 = vpop.f32.mrb[23].mxu1  ;;  %v795_v41 = vpop.permute.xlu1 %794 }
 0x17d   : > { %v5069_v60 = vadd.f32 %v5068_v57, %v5067_v52  ;;  %v800_v53 = vpop.permute.xlu0 %799 }
 0x17e   : > { %v1625_v59 = vadd.f32 %v5066_v49, %v1464_v51  ;;  %v1779_v62 = vpack.c.bf16 %v1752_v55, %v1751_v54  ;;  %v1467_v63 = vadd.f32 %v4957_v56, %v775_v58 }
 0x180   : > { %v4958_v61 = vpop.f32.mrb[24].mxu0  ;;  %v1721_v1 = vmul.f32 0.01, %v1625_v59  ;;  %v1628_v2 = vadd.f32 %v5069_v60, %v1467_v63  ;;  %4749 = vmatmul.mubr.msk.bf16.gmra.mrb[80].mxu0 %vm1839_vm0, %v1779_v62 }
 0x181   : > { %v5070_v3 = vpop.f32.mrb[24].mxu1  ;;  %v4959_v4 = vpop.f32.mrb[25].mxu0  ;;  %1970 = vmatprep.mubr.bf16.mxu0 %v5704_v0 }
 0x182   : > { %v4960_v5 = vadd.f32 %v4959_v4, %v4958_v61  ;;  %v5071_v6 = vpop.f32.mrb[25].mxu1  ;;  %v1722_v8 = vmul.f32 0.01, %v1628_v2  ;;  %v4961_v10 = vpop.f32.mrb[26].mxu0  ;;  %v1753_v14 = vmax.f32 %v1625_v59, %v1721_v1 }
 0x183   : > { %v5072_v9 = vadd.f32 %v5071_v6, %v5070_v3  ;;  %v5073_v12 = vpop.f32.mrb[26].mxu1  ;;  %v4962_v13 = vpop.f32.mrb[27].mxu0 }
 0x184   : > { %v1472_v11 = vadd.f32 %v4960_v5, %v780_v7  ;;  %v1754_v15 = vmax.f32 %v1628_v2, %v1722_v8  ;;  %v4963_v16 = vadd.f32 %v4962_v13, %v4961_v10  ;;  %v5074_v17 = vpop.f32.mrb[27].mxu1  ;;  %v805_v1 = vpop.permute.xlu1 %804 }
 0x185   : > { %v5075_v20 = vadd.f32 %v5074_v17, %v5073_v12  ;;  %v810_v13 = vpop.permute.xlu0 %809 }
 0x186   : > { %v1633_v19 = vadd.f32 %v5072_v9, %v1472_v11  ;;  %v1780_v21 = vpack.c.bf16 %v1754_v15, %v1753_v14  ;;  %v1475_v22 = vadd.f32 %v4963_v16, %v785_v18 }
 0x188   : > { %v4964_v23 = vpop.f32.mrb[28].mxu0  ;;  %v1723_v24 = vmul.f32 0.01, %v1633_v19  ;;  %v1636_v25 = vadd.f32 %v5075_v20, %v1475_v22  ;;  %4750 = vmatmul.mubr.msk.bf16.gmra.mrb[84].mxu0 %vm1839_vm0, %v1780_v21 }
 0x189   : > { %v5076_v26 = vpop.f32.mrb[28].mxu1  ;;  %v4965_v27 = vpop.f32.mrb[29].mxu0  ;;  %1980 = vmatprep.mubr.bf16.mxu0 %v5704_v0 }
 0x18a   : > { %v4966_v28 = vadd.f32 %v4965_v27, %v4964_v23  ;;  %v5077_v29 = vpop.f32.mrb[29].mxu1  ;;  %v1724_v31 = vmul.f32 0.01, %v1636_v25  ;;  %v4967_v33 = vpop.f32.mrb[30].mxu0  ;;  %v1755_v37 = vmax.f32 %v1633_v19, %v1723_v24 }
 0x18b   : > { %v5078_v32 = vadd.f32 %v5077_v29, %v5076_v26  ;;  %v5079_v35 = vpop.f32.mrb[30].mxu1  ;;  %v4968_v36 = vpop.f32.mrb[31].mxu0 }
 0x18c   : > { %v1480_v34 = vadd.f32 %v4966_v28, %v790_v30  ;;  %v1756_v38 = vmax.f32 %v1636_v25, %v1724_v31  ;;  %v4969_v39 = vadd.f32 %v4968_v36, %v4967_v33  ;;  %v5080_v40 = vpop.f32.mrb[31].mxu1  ;;  %v815_v24 = vpop.permute.xlu1 %814 }
 0x18d   : > { %v5081_v43 = vadd.f32 %v5080_v40, %v5079_v35 }
 0x18e   : > { %v1641_v42 = vadd.f32 %v5078_v32, %v1480_v34  ;;  %v1781_v44 = vpack.c.bf16 %v1756_v38, %v1755_v37  ;;  %v1483_v45 = vadd.f32 %v4969_v39, %v795_v41  ;;  %v820_v34 = vpop.permute.xlu0 %819 }
 0x190   : > { %v4970_v46 = vpop.f32.mrb[32].mxu0  ;;  %v1725_v47 = vmul.f32 0.01, %v1641_v42  ;;  %v1644_v48 = vadd.f32 %v5081_v43, %v1483_v45  ;;  %4751 = vmatmul.mubr.msk.bf16.gmra.mrb[88].mxu0 %vm1839_vm0, %v1781_v44 }
 0x191   : > { %v5082_v49 = vpop.f32.mrb[32].mxu1  ;;  %v4971_v50 = vpop.f32.mrb[33].mxu0  ;;  %1990 = vmatprep.mubr.bf16.mxu0 %v5704_v0 }
 0x192   : > { %v4972_v51 = vadd.f32 %v4971_v50, %v4970_v46  ;;  %v5083_v52 = vpop.f32.mrb[33].mxu1  ;;  %v1726_v54 = vmul.f32 0.01, %v1644_v48  ;;  %v4973_v56 = vpop.f32.mrb[34].mxu0  ;;  %v1757_v60 = vmax.f32 %v1641_v42, %v1725_v47 }
 0x193   : > { %v5084_v55 = vadd.f32 %v5083_v52, %v5082_v49  ;;  %v5085_v58 = vpop.f32.mrb[34].mxu1  ;;  %v4974_v59 = vpop.f32.mrb[35].mxu0 }
 0x194   : > { %v1488_v57 = vadd.f32 %v4972_v51, %v800_v53  ;;  %v1758_v62 = vmax.f32 %v1644_v48, %v1726_v54  ;;  %v4975_v63 = vadd.f32 %v4974_v59, %v4973_v56  ;;  %v5086_v61 = vpop.f32.mrb[35].mxu1  ;;  %v825_v47 = vpop.permute.xlu1 %824 }
 0x195   : > { %v5087_v3 = vadd.f32 %v5086_v61, %v5085_v58  ;;  %v830_v52 = vpop.permute.xlu0 %829 }
 0x196   : > { %v1649_v2 = vadd.f32 %v5084_v55, %v1488_v57  ;;  %v1782_v4 = vpack.c.bf16 %v1758_v62, %v1757_v60  ;;  %v1491_v5 = vadd.f32 %v4975_v63, %v805_v1 }
 0x198   : > { %v4976_v6 = vpop.f32.mrb[36].mxu0  ;;  %v1727_v7 = vmul.f32 0.01, %v1649_v2  ;;  %v1652_v8 = vadd.f32 %v5087_v3, %v1491_v5  ;;  %4752 = vmatmul.mubr.msk.bf16.gmra.mrb[92].mxu0 %vm1839_vm0, %v1782_v4  ;;  %v835_v5 = vpop.permute.xlu1 %834 }
 0x199   : > { %v5088_v9 = vpop.f32.mrb[36].mxu1  ;;  %v4977_v10 = vpop.f32.mrb[37].mxu0  ;;  %2000 = vmatprep.mubr.bf16.mxu0 %v5704_v0 }
 0x19a   : > { %v4978_v11 = vadd.f32 %v4977_v10, %v4976_v6  ;;  %v5089_v12 = vpop.f32.mrb[37].mxu1  ;;  %v1728_v14 = vmul.f32 0.01, %v1652_v8  ;;  %v4979_v16 = vpop.f32.mrb[38].mxu0  ;;  %v1759_v20 = vmax.f32 %v1649_v2, %v1727_v7 }
 0x19b   : > { %v5090_v15 = vadd.f32 %v5089_v12, %v5088_v9  ;;  %v5091_v18 = vpop.f32.mrb[38].mxu1  ;;  %v4980_v19 = vpop.f32.mrb[39].mxu0 }
 0x19c   : > { %v1496_v17 = vadd.f32 %v4978_v11, %v810_v13  ;;  %v1760_v21 = vmax.f32 %v1652_v8, %v1728_v14  ;;  %v4981_v22 = vadd.f32 %v4980_v19, %v4979_v16  ;;  %v5092_v23 = vpop.f32.mrb[39].mxu1  ;;  %v840_v12 = vpop.permute.xlu0 %839 }
 0x19d   : > { %v5093_v26 = vadd.f32 %v5092_v23, %v5091_v18 }
 0x19e   : > { %v1657_v25 = vadd.f32 %v5090_v15, %v1496_v17  ;;  %v1783_v27 = vpack.c.bf16 %v1760_v21, %v1759_v20  ;;  %v1499_v28 = vadd.f32 %v4981_v22, %v815_v24 }
 0x1a0   : > { %v4982_v29 = vpop.f32.mrb[40].mxu0  ;;  %v1729_v30 = vmul.f32 0.01, %v1657_v25  ;;  %v1660_v31 = vadd.f32 %v5093_v26, %v1499_v28  ;;  %4753 = vmatmul.mubr.msk.bf16.gmra.mrb[96].mxu0 %vm1839_vm0, %v1783_v27 }
 0x1a1   : > { %v5094_v32 = vpop.f32.mrb[40].mxu1  ;;  %v4983_v33 = vpop.f32.mrb[41].mxu0  ;;  %2010 = vmatprep.mubr.bf16.mxu0 %v5704_v0 }
 0x1a2   : > { %v4984_v35 = vadd.f32 %v4983_v33, %v4982_v29  ;;  %v5095_v36 = vpop.f32.mrb[41].mxu1  ;;  %v1730_v37 = vmul.f32 0.01, %v1660_v31  ;;  %v4985_v39 = vpop.f32.mrb[42].mxu0  ;;  %v1761_v43 = vmax.f32 %v1657_v25, %v1729_v30 }
 0x1a3   : > { %v5096_v38 = vadd.f32 %v5095_v36, %v5094_v32  ;;  %v5097_v41 = vpop.f32.mrb[42].mxu1  ;;  %v4986_v42 = vpop.f32.mrb[43].mxu0 }
 0x1a4   : > { %v1504_v40 = vadd.f32 %v4984_v35, %v820_v34  ;;  %v1762_v44 = vmax.f32 %v1660_v31, %v1730_v37  ;;  %v4987_v45 = vadd.f32 %v4986_v42, %v4985_v39  ;;  %v5098_v46 = vpop.f32.mrb[43].mxu1  ;;  %v845_v30 = vpop.permute.xlu1 %844 }
 0x1a5   : > { %v5099_v49 = vadd.f32 %v5098_v46, %v5097_v41  ;;  %v850_v35 = vpop.permute.xlu0 %849 }
 0x1a6   : > { %v1665_v48 = vadd.f32 %v5096_v38, %v1504_v40  ;;  %v1784_v50 = vpack.c.bf16 %v1762_v44, %v1761_v43  ;;  %v1507_v51 = vadd.f32 %v4987_v45, %v825_v47 }
 0x1a8   : > { %v4988_v53 = vpop.f32.mrb[44].mxu0  ;;  %v1731_v54 = vmul.f32 0.01, %v1665_v48  ;;  %v1668_v55 = vadd.f32 %v5099_v49, %v1507_v51  ;;  %4754 = vmatmul.mubr.msk.bf16.gmra.mrb[100].mxu0 %vm1839_vm0, %v1784_v50 }
 0x1a9   : > { %v5100_v56 = vpop.f32.mrb[44].mxu1  ;;  %v4989_v57 = vpop.f32.mrb[45].mxu0  ;;  %2020 = vmatprep.mubr.bf16.mxu0 %v5704_v0 }
 0x1aa   : > { %v4990_v58 = vadd.f32 %v4989_v57, %v4988_v53  ;;  %v5101_v59 = vpop.f32.mrb[45].mxu1  ;;  %v4991_v60 = vpop.f32.mrb[46].mxu0  ;;  %v1732_v62 = vmul.f32 0.01, %v1668_v55  ;;  %v1763_v6 = vmax.f32 %v1665_v48, %v1731_v54 }
 0x1ab   : > { %v5102_v63 = vadd.f32 %v5101_v59, %v5100_v56  ;;  %v5103_v61 = vpop.f32.mrb[46].mxu1  ;;  %v4992_v1 = vpop.f32.mrb[47].mxu0 }
 0x1ac   : > { %v1512_v2 = vadd.f32 %v4990_v58, %v830_v52  ;;  %v4993_v3 = vadd.f32 %v4992_v1, %v4991_v60  ;;  %v5104_v4 = vpop.f32.mrb[47].mxu1  ;;  %v1764_v7 = vmax.f32 %v1668_v55, %v1732_v62  ;;  %v855_v53 = vpop.permute.xlu1 %854 }
 0x1ad   : > { %v5105_v8 = vadd.f32 %v5104_v4, %v5103_v61  ;;  %v860_v58 = vpop.permute.xlu0 %859 }
 0x1ae   : > { %v1673_v9 = vadd.f32 %v5102_v63, %v1512_v2  ;;  %v1515_v10 = vadd.f32 %v4993_v3, %v835_v5  ;;  %v1785_v11 = vpack.c.bf16 %v1764_v7, %v1763_v6 }
 0x1b0   : > { %v1733_v13 = vmul.f32 0.01, %v1673_v9  ;;  %v1676_v14 = vadd.f32 %v5105_v8, %v1515_v10  ;;  %v4994_v15 = vpop.f32.mrb[48].mxu0  ;;  %4755 = vmatmul.mubr.msk.bf16.gmra.mrb[104].mxu0 %vm1839_vm0, %v1785_v11 }
 0x1b1   : > { %v5106_v16 = vpop.f32.mrb[48].mxu1  ;;  %v4995_v17 = vpop.f32.mrb[49].mxu0  ;;  %2030 = vmatprep.mubr.bf16.mxu0 %v5704_v0 }
 0x1b2   : > { %v1734_v18 = vmul.f32 0.01, %v1676_v14  ;;  %v4996_v19 = vadd.f32 %v4995_v17, %v4994_v15  ;;  %v5107_v20 = vpop.f32.mrb[49].mxu1  ;;  %v4997_v21 = vpop.f32.mrb[50].mxu0  ;;  %v1765_v25 = vmax.f32 %v1673_v9, %v1733_v13 }
 0x1b3   : > { %v5108_v22 = vadd.f32 %v5107_v20, %v5106_v16  ;;  %v5109_v23 = vpop.f32.mrb[50].mxu1  ;;  %v4998_v24 = vpop.f32.mrb[51].mxu0 }
 0x1b4   : > { %v1766_v26 = vmax.f32 %v1676_v14, %v1734_v18  ;;  %v1520_v27 = vadd.f32 %v4996_v19, %v840_v12  ;;  %v4999_v28 = vadd.f32 %v4998_v24, %v4997_v21  ;;  %v5110_v29 = vpop.f32.mrb[51].mxu1  ;;  %v865_v13 = vpop.permute.xlu1 %864 }
 0x1b5   : > { %v5111_v31 = vadd.f32 %v5110_v29, %v5109_v23  ;;  %v870_v18 = vpop.permute.xlu0 %869 }
 0x1b6   : > { %v1786_v32 = vpack.c.bf16 %v1766_v26, %v1765_v25  ;;  %v1681_v33 = vadd.f32 %v5108_v22, %v1520_v27  ;;  %v1523_v34 = vadd.f32 %v4999_v28, %v845_v30 }
 0x1b8   : > { %v1735_v36 = vmul.f32 0.01, %v1681_v33  ;;  %v1684_v37 = vadd.f32 %v5111_v31, %v1523_v34  ;;  %v5000_v38 = vpop.f32.mrb[52].mxu0  ;;  %4756 = vmatmul.mubr.msk.bf16.gmra.mrb[108].mxu0 %vm1839_vm0, %v1786_v32 }
 0x1b9   : > { %v5112_v39 = vpop.f32.mrb[52].mxu1  ;;  %v5001_v40 = vpop.f32.mrb[53].mxu0  ;;  %2040 = vmatprep.mubr.bf16.mxu0 %v5704_v0 }
 0x1ba   : > { %v1736_v41 = vmul.f32 0.01, %v1684_v37  ;;  %v5002_v42 = vadd.f32 %v5001_v40, %v5000_v38  ;;  %v5113_v43 = vpop.f32.mrb[53].mxu1  ;;  %v5003_v44 = vpop.f32.mrb[54].mxu0  ;;  %v1767_v48 = vmax.f32 %v1681_v33, %v1735_v36 }
 0x1bb   : > { %v5114_v45 = vadd.f32 %v5113_v43, %v5112_v39  ;;  %v5115_v46 = vpop.f32.mrb[54].mxu1  ;;  %v5004_v47 = vpop.f32.mrb[55].mxu0 }
 0x1bc   : > { %v1768_v49 = vmax.f32 %v1684_v37, %v1736_v41  ;;  %v1528_v50 = vadd.f32 %v5002_v42, %v850_v35  ;;  %v5005_v51 = vadd.f32 %v5004_v47, %v5003_v44  ;;  %v5116_v52 = vpop.f32.mrb[55].mxu1  ;;  %v875_v36 = vpop.permute.xlu1 %874 }
 0x1bd   : > { %v5117_v54 = vadd.f32 %v5116_v52, %v5115_v46  ;;  %v2128_v43 = vpop.permute.xlu0 %2127 }
 0x1be   : > { %v1787_v55 = vpack.c.bf16 %v1768_v49, %v1767_v48  ;;  %v1689_v56 = vadd.f32 %v5114_v45, %v1528_v50  ;;  %v1531_v57 = vadd.f32 %v5005_v51, %v855_v53 }
 0x1c0   : > { %v1737_v59 = vmul.f32 0.01, %v1689_v56  ;;  %v1692_v60 = vadd.f32 %v5117_v54, %v1531_v57  ;;  %v5006_v62 = vpop.f32.mrb[56].mxu0  ;;  %4757 = vmatmul.mubr.msk.bf16.gmra.mrb[112].mxu0 %vm1839_vm0, %v1787_v55  ;;  %v2133_v48 = vpop.permute.xlu1 %2132 }
 0x1c1   : > { %v5118_v63 = vpop.f32.mrb[56].mxu1  ;;  %v5007_v61 = vpop.f32.mrb[57].mxu0  ;;  %2050 = vmatprep.mubr.bf16.mxu0 %v5704_v0 }
 0x1c2   : > { %v1738_v1 = vmul.f32 0.01, %v1692_v60  ;;  %v5008_v2 = vadd.f32 %v5007_v61, %v5006_v62  ;;  %v5119_v3 = vpop.f32.mrb[57].mxu1  ;;  %v5009_v4 = vpop.f32.mrb[58].mxu0  ;;  %v1769_v8 = vmax.f32 %v1689_v56, %v1737_v59 }
 0x1c3   : > { %v5120_v5 = vadd.f32 %v5119_v3, %v5118_v63  ;;  %v5121_v6 = vpop.f32.mrb[58].mxu1  ;;  %v5010_v7 = vpop.f32.mrb[59].mxu0 }
 0x1c4   : > { %v1770_v9 = vmax.f32 %v1692_v60, %v1738_v1  ;;  %v1536_v10 = vadd.f32 %v5008_v2, %v860_v58  ;;  %v5011_v11 = vadd.f32 %v5010_v7, %v5009_v4  ;;  %v5122_v12 = vpop.f32.mrb[59].mxu1  ;;  %v2138_v61 = vpop.permute.xlu0 %2137 }
 0x1c5   : > { %v5123_v14 = vadd.f32 %v5122_v12, %v5121_v6  ;;  %v2143_v7 = vpop.permute.xlu1 %2142 }
 0x1c6   : > { %v1788_v15 = vpack.c.bf16 %v1770_v9, %v1769_v8  ;;  %v1697_v16 = vadd.f32 %v5120_v5, %v1536_v10  ;;  %v1539_v17 = vadd.f32 %v5011_v11, %v865_v13 }
 0x1c8   : > { %v1739_v19 = vmul.f32 0.01, %v1697_v16  ;;  %v1700_v20 = vadd.f32 %v5123_v14, %v1539_v17  ;;  %v5012_v21 = vpop.f32.mrb[60].mxu0  ;;  %4758 = vmatmul.mubr.msk.bf16.gmra.mrb[116].mxu0 %vm1839_vm0, %v1788_v15 }
 0x1c9   : > { %v5124_v22 = vpop.f32.mrb[60].mxu1  ;;  %v5013_v23 = vpop.f32.mrb[61].mxu0  ;;  %2060 = vmatprep.mubr.bf16.mxu0 %v5704_v0 }
 0x1ca   : > { %v1740_v24 = vmul.f32 0.01, %v1700_v20  ;;  %v5014_v25 = vadd.f32 %v5013_v23, %v5012_v21  ;;  %v5125_v26 = vpop.f32.mrb[61].mxu1  ;;  %v5015_v27 = vpop.f32.mrb[62].mxu0  ;;  %v1771_v31 = vmax.f32 %v1697_v16, %v1739_v19 }
 0x1cb   : > { %v5126_v28 = vadd.f32 %v5125_v26, %v5124_v22  ;;  %v5127_v29 = vpop.f32.mrb[62].mxu1  ;;  %v5016_v30 = vpop.f32.mrb[63].mxu0 }
 0x1cc   : > { %v1772_v32 = vmax.f32 %v1700_v20, %v1740_v24  ;;  %v1544_v33 = vadd.f32 %v5014_v25, %v870_v18  ;;  %v5017_v34 = vadd.f32 %v5016_v30, %v5015_v27  ;;  %v5128_v35 = vpop.f32.mrb[63].mxu1  ;;  %v2148_v20 = vpop.permute.xlu0 %2147 }
 0x1cd   : > { %v5129_v37 = vadd.f32 %v5128_v35, %v5127_v29  ;;  %v2153_v27 = vpop.permute.xlu1 %2152 }
 0x1ce   : > { %v1789_v38 = vpack.c.bf16 %v1772_v32, %v1771_v31  ;;  %v1705_v39 = vadd.f32 %v5126_v28, %v1544_v33  ;;  %v1547_v40 = vadd.f32 %v5017_v34, %v875_v36 }
 0x1d0   : > { %v1741_v41 = vmul.f32 0.01, %v1705_v39  ;;  %v1708_v42 = vadd.f32 %v5129_v37, %v1547_v40  ;;  %4759 = vmatmul.mubr.msk.bf16.gmra.mrb[120].mxu0 %vm1839_vm0, %v1789_v38 }
 0x1d1   : > { %v2379_v44 = vpop.f32.mrb[64].mxu1  ;;  %2070 = vmatprep.mubr.bf16.mxu0 %v5704_v0 }
 0x1d2   : > { %v1742_v45 = vmul.f32 0.01, %v1708_v42  ;;  %v2380_v46 = vadd.f32 %v2379_v44, %v2128_v43  ;;  %v2381_v47 = vpop.f32.mrb[65].mxu1  ;;  %v1773_v51 = vmax.f32 %v1705_v39, %v1741_v41  ;;  %v5458_v44 = vld [vmem:[%s6940_s8] sm:$0xff]  }
 0x1d3   : > { %v2382_v49 = vadd.f32 %v2381_v47, %v2128_v43  ;;  %v2383_v50 = vpop.f32.mrb[66].mxu1  ;;  %v5461_v47 = vld [vmem:[%s6940_s8 + $0x18] sm:$0xff]  }
 0x1d4   : > { %v1774_v52 = vmax.f32 %v1708_v42, %v1742_v45  ;;  %v2408_v53 = vmul.f32 0.01, %v2380_v46  ;;  %v2384_v54 = vadd.f32 %v2383_v50, %v2133_v48  ;;  %v2385_v55 = vpop.f32.mrb[67].mxu1  ;;  %v5459_v45 = vld [vmem:[%s6940_s8 + $0x8] sm:$0xff]   ;;  %v5464_v50 = vld [vmem:[%s6940_s8 + $0x30] sm:$0xff]  }
 0x1d5   : > { %v2409_v56 = vmul.f32 0.01, %v2382_v49  ;;  %v2386_v57 = vadd.f32 %v2385_v55, %v2133_v48  ;;  %v5462_v48 = vld [vmem:[%s6940_s8 + $0x20] sm:$0xff]   ;;  %v5467_v55 = vld [vmem:[%s6940_s8 + $0x48] sm:$0xff]  }
 0x1d6   : > { %v1790_v58 = vpack.c.bf16 %v1774_v52, %v1773_v51  ;;  %v2410_v59 = vmul.f32 0.01, %v2384_v54  ;;  %v2420_v62 = vmax.f32 %v2380_v46, %v2408_v53  ;;  %v5460_v46 = vld [vmem:[%s6940_s8 + $0x10] sm:$0xff]   ;;  %v5465_v51 = vld [vmem:[%s6940_s8 + $0x38] sm:$0xff]   ;;  %v5466_v52 = vld [vmem:[%s6940_s8 + $0x40] sm:$0xff]  }
 0x1d7   : > { %v2411_v60 = vmul.f32 0.01, %v2386_v57  ;;  %v2421_v1 = vmax.f32 %v2382_v49, %v2409_v56  ;;  %v5463_v49 = vld [vmem:[%s6940_s8 + $0x28] sm:$0xff]  }
 0x1d8   : > { %v2422_v63 = vmax.f32 %v2384_v54, %v2410_v59  ;;  %4760 = vmatmul.mubr.msk.bf16.gmra.mrb[124].mxu0 %vm1839_vm0, %v1790_v58 }
 0x1d9   : > { %v2423_v2 = vmax.f32 %v2386_v57, %v2411_v60  ;;  %v2389_v3 = vpop.f32.mrb[68].mxu1 }
 0x1da   : > { %v2528_v4 = vpack.c.bf16 %v2422_v63, %v2420_v62  ;;  %v2390_v5 = vadd.f32 %v2389_v3, %v2138_v61  ;;  %v2391_v6 = vpop.f32.mrb[69].mxu1  ;;  %v5468_v63 = vld [vmem:[%s6940_s8 + $0x50] sm:$0xff]  }
 0x1db   : > { %v2392_v8 = vadd.f32 %v2391_v6, %v2138_v61  ;;  %v2393_v9 = vpop.f32.mrb[70].mxu1  ;;  %v2529_v10 = vpack.c.bf16 %v2423_v2, %v2421_v1  ;;  %v5469_v6 = vld [vmem:[%s6940_s8 + $0x58] sm:$0xff]  }
 0x1dc   : > { %v2412_v11 = vmul.f32 0.01, %v2390_v5  ;;  %v2394_v12 = vadd.f32 %v2393_v9, %v2143_v7  ;;  %v2395_v13 = vpop.f32.mrb[71].mxu1 }
 0x1dd   : > { %v2413_v14 = vmul.f32 0.01, %v2392_v8  ;;  %v2396_v15 = vadd.f32 %v2395_v13, %v2143_v7  ;;  %2663 = vmatprep.subr.bf16.mxu1 %v2529_v10  ;;  %v5470_v13 = vld [vmem:[%s6940_s8 + $0x60] sm:$0xff]  }
 0x1de   : > { %v2414_v16 = vmul.f32 0.01, %v2394_v12  ;;  %2664 = vmatpush1.bf16.msra.mxu1 %v2528_v4  ;;  %v2424_v18 = vmax.f32 %v2390_v5, %v2412_v11 }
 0x1df   : > { %v2415_v17 = vmul.f32 0.01, %v2396_v15  ;;  %v2425_v21 = vmax.f32 %v2392_v8, %v2413_v14 }
 0x1e0   : > { %v2426_v19 = vmax.f32 %v2394_v12, %v2414_v16 }
 0x1e1   : > { %v2427_v22 = vmax.f32 %v2396_v15, %v2415_v17  ;;  %v2399_v23 = vpop.f32.mrb[72].mxu1 }
 0x1e2   : > { %v2530_v24 = vpack.c.bf16 %v2426_v19, %v2424_v18  ;;  %v2400_v25 = vadd.f32 %v2399_v23, %v2148_v20  ;;  %v2401_v26 = vpop.f32.mrb[73].mxu1 }
 0x1e3   : > { %v2402_v28 = vadd.f32 %v2401_v26, %v2148_v20  ;;  %v2403_v29 = vpop.f32.mrb[74].mxu1  ;;  %v2531_v30 = vpack.c.bf16 %v2427_v22, %v2425_v21  ;;  %v5471_v20 = vld [vmem:[%s6940_s8 + $0x68] sm:$0xff]  }
 0x1e4   : > { %v2416_v31 = vmul.f32 0.01, %v2400_v25  ;;  %v2404_v32 = vadd.f32 %v2403_v29, %v2153_v27  ;;  %v2405_v33 = vpop.f32.mrb[75].mxu1 }
 0x1e5   : > { %v2417_v34 = vmul.f32 0.01, %v2402_v28  ;;  %v2406_v35 = vadd.f32 %v2405_v33, %v2153_v27  ;;  %2665 = vmatprep.subr.bf16.mxu1 %v2531_v30  ;;  %v5472_v27 = vld [vmem:[%s6940_s8 + $0x70] sm:$0xff]  }
 0x1e6   : > { %v2418_v36 = vmul.f32 0.01, %v2404_v32  ;;  %2666 = vmatpush1.bf16.msra.mxu1 %v2530_v24  ;;  %v2428_v38 = vmax.f32 %v2400_v25, %v2416_v31 }
 0x1e7   : > { %v2419_v37 = vmul.f32 0.01, %v2406_v35  ;;  %v2429_v40 = vmax.f32 %v2402_v28, %v2417_v34  ;;  %v5473_v34 = vld [vmem:[%s6940_s8 + $0x78] sm:$0xff]  }
 0x1e8   : > { %v2430_v39 = vmax.f32 %v2404_v32, %v2418_v36  ;;  %v5476_v36 = vld [vmem:[%s6939_s7 + $0x4] ss:$8 sps:$4 sm:$0xff]  }
 0x1e9   : > { %v2431_v41 = vmax.f32 %v2406_v35, %v2419_v37 }
 0x1ea   : > { %v2532_v42 = vpack.c.bf16 %v2430_v39, %v2428_v38 }
 0x1eb   : > { %v2533_v43 = vpack.c.bf16 %v2431_v41, %v2429_v40 }
 0x1ed   : > { %2667 = vmatprep.subr.bf16.mxu1 %v2533_v43 }
 0x1ee   : > { %2668 = vmatpush1.bf16.msra.mxu1 %v2532_v42 }
 0x1f1   : > { %4815 = vmatmul.mubr.msk.bf16.vlgmr.msra.gmra.mrb[76].mxu1 %vm2614_vm1, %v5458_v44 }
 0x1f2   : > { %2705 = vmatprep.mubr.bf16.mxu1 %v5704_v0 }
 0x1f9   : > { %4816 = vmatmul.mubr.msk.bf16.gmra.mrb[80].mxu1 %vm2614_vm1, %v5459_v45 }
 0x1fa   : > { %2715 = vmatprep.mubr.bf16.mxu1 %v5704_v0 }
 0x201   : > { %4817 = vmatmul.mubr.msk.bf16.gmra.mrb[84].mxu1 %vm2614_vm1, %v5460_v46 }
 0x202   : > { %2725 = vmatprep.mubr.bf16.mxu1 %v5704_v0 }
 0x209   : > { %4818 = vmatmul.mubr.msk.bf16.gmra.mrb[88].mxu1 %vm2614_vm1, %v5461_v47 }
 0x20a   : > { %2735 = vmatprep.mubr.bf16.mxu1 %v5704_v0 }
 0x211   : > { %4819 = vmatmul.mubr.msk.bf16.gmra.mrb[92].mxu1 %vm2614_vm1, %v5462_v48 }
 0x212   : > { %2745 = vmatprep.mubr.bf16.mxu1 %v5704_v0 }
 0x219   : > { %4820 = vmatmul.mubr.msk.bf16.gmra.mrb[96].mxu1 %vm2614_vm1, %v5463_v49 }
 0x21a   : > { %2755 = vmatprep.mubr.bf16.mxu1 %v5704_v0 }
 0x221   : > { %4821 = vmatmul.mubr.msk.bf16.gmra.mrb[100].mxu1 %vm2614_vm1, %v5464_v50 }
 0x222   : > { %2765 = vmatprep.mubr.bf16.mxu1 %v5704_v0 }
 0x229   : > { %4822 = vmatmul.mubr.msk.bf16.gmra.mrb[104].mxu1 %vm2614_vm1, %v5465_v51 }
 0x22a   : > { %2775 = vmatprep.mubr.bf16.mxu1 %v5704_v0 }
 0x231   : > { %4823 = vmatmul.mubr.msk.bf16.gmra.mrb[108].mxu1 %vm2614_vm1, %v5466_v52 }
 0x232   : > { %2785 = vmatprep.mubr.bf16.mxu1 %v5704_v0 }
 0x233   : > { %v1922_v53 = vpop.f32.mrb[64].mxu0 }
 0x234   : > { %v1924_v54 = vpop.f32.mrb[65].mxu0 }
 0x235   : > { %v1926_v56 = vpop.f32.mrb[66].mxu0 }
 0x236   : > { %v2464_v57 = vpack.c.bf16 %v1926_v56, %v1922_v53  ;;  %v1928_v58 = vpop.f32.mrb[67].mxu0 }
 0x237   : > { %v2465_v59 = vpack.c.bf16 %v1928_v58, %v1924_v54 }
 0x239   : > { %4824 = vmatmul.mubr.msk.bf16.gmra.mrb[112].mxu1 %vm2614_vm1, %v5467_v55  ;;  %3016 = vmatprep.subr.bf16.mxu1 %v2465_v59 }
 0x23a   : > { %2795 = vmatprep.mubr.bf16.mxu1 %v5704_v0  ;;  %3017 = vmatpush1.bf16.msra.mxu1 %v2464_v57 }
 0x23b   : > { %v1932_v60 = vpop.f32.mrb[68].mxu0 }
 0x23c   : > { %v1934_v62 = vpop.f32.mrb[69].mxu0 }
 0x23d   : > { %v1936_v61 = vpop.f32.mrb[70].mxu0 }
 0x23e   : > { %v2466_v1 = vpack.c.bf16 %v1936_v61, %v1932_v60  ;;  %v1938_v2 = vpop.f32.mrb[71].mxu0 }
 0x23f   : > { %v2467_v3 = vpack.c.bf16 %v1938_v2, %v1934_v62 }
 0x241   : > { %4825 = vmatmul.mubr.msk.bf16.gmra.mrb[116].mxu1 %vm2614_vm1, %v5468_v63  ;;  %3018 = vmatprep.subr.bf16.mxu1 %v2467_v3 }
 0x242   : > { %2805 = vmatprep.mubr.bf16.mxu1 %v5704_v0  ;;  %3019 = vmatpush1.bf16.msra.mxu1 %v2466_v1 }
 0x243   : > { %v1942_v4 = vpop.f32.mrb[72].mxu0 }
 0x244   : > { %v1944_v5 = vpop.f32.mrb[73].mxu0 }
 0x245   : > { %v1946_v7 = vpop.f32.mrb[74].mxu0 }
 0x246   : > { %v2468_v8 = vpack.c.bf16 %v1946_v7, %v1942_v4  ;;  %v1948_v9 = vpop.f32.mrb[75].mxu0 }
 0x247   : > { %v2469_v10 = vpack.c.bf16 %v1948_v9, %v1944_v5 }
 0x249   : > { %4826 = vmatmul.mubr.msk.bf16.gmra.mrb[120].mxu1 %vm2614_vm1, %v5469_v6  ;;  %3020 = vmatprep.subr.bf16.mxu1 %v2469_v10 }
 0x24a   : > { %2815 = vmatprep.mubr.bf16.mxu1 %v5704_v0  ;;  %3021 = vmatpush1.bf16.msra.mxu1 %v2468_v8 }
 0x24b   : > { %v1952_v11 = vpop.f32.mrb[76].mxu0 }
 0x24c   : > { %v1954_v12 = vpop.f32.mrb[77].mxu0 }
 0x24d   : > { %v1956_v14 = vpop.f32.mrb[78].mxu0 }
 0x24e   : > { %v2470_v15 = vpack.c.bf16 %v1956_v14, %v1952_v11  ;;  %v1958_v16 = vpop.f32.mrb[79].mxu0 }
 0x24f   : > { %v2471_v17 = vpack.c.bf16 %v1958_v16, %v1954_v12 }
 0x251   : > { %4827 = vmatmul.mubr.msk.bf16.gmra.mrb[124].mxu1 %vm2614_vm1, %v5470_v13  ;;  %3022 = vmatprep.subr.bf16.mxu1 %v2471_v17 }
 0x252   : > { %2825 = vmatprep.mubr.bf16.mxu1 %v5704_v0  ;;  %3023 = vmatpush1.bf16.msra.mxu1 %v2470_v15 }
 0x253   : > { %v1962_v18 = vpop.f32.mrb[80].mxu0 }
 0x254   : > { %v1964_v19 = vpop.f32.mrb[81].mxu0 }
 0x255   : > { %v1966_v21 = vpop.f32.mrb[82].mxu0 }
 0x256   : > { %v2472_v22 = vpack.c.bf16 %v1966_v21, %v1962_v18  ;;  %v1968_v23 = vpop.f32.mrb[83].mxu0 }
 0x257   : > { %v2473_v24 = vpack.c.bf16 %v1968_v23, %v1964_v19 }
 0x259   : > { %4828 = vmatmul.mubr.msk.bf16.gmra.mrb[128].mxu1 %vm2614_vm1, %v5471_v20  ;;  %3024 = vmatprep.subr.bf16.mxu1 %v2473_v24 }
 0x25a   : > { %2835 = vmatprep.mubr.bf16.mxu1 %v5704_v0  ;;  %3025 = vmatpush1.bf16.msra.mxu1 %v2472_v22 }
 0x25b   : > { %v1972_v25 = vpop.f32.mrb[84].mxu0 }
 0x25c   : > { %v1974_v26 = vpop.f32.mrb[85].mxu0 }
 0x25d   : > { %v1976_v28 = vpop.f32.mrb[86].mxu0 }
 0x25e   : > { %v2474_v29 = vpack.c.bf16 %v1976_v28, %v1972_v25  ;;  %v1978_v30 = vpop.f32.mrb[87].mxu0 }
 0x25f   : > { %v2475_v31 = vpack.c.bf16 %v1978_v30, %v1974_v26  ;;  %v5474_v30 = vld [vmem:[%s6939_s7] ss:$8 sps:$4 sm:$0xff]  }
 0x261   : > { %4829 = vmatmul.mubr.msk.bf16.gmra.mrb[132].mxu1 %vm2614_vm1, %v5472_v27  ;;  %3026 = vmatprep.subr.bf16.mxu1 %v2475_v31  ;;  %v5477_v31 = vld [vmem:[%s6939_s7 + $0x14] ss:$8 sps:$4 sm:$0xff]  }
 0x262   : > { %2845 = vmatprep.mubr.bf16.mxu1 %v5704_v0  ;;  %3027 = vmatpush1.bf16.msra.mxu1 %v2474_v29 }
 0x263   : > { %v1982_v32 = vpop.f32.mrb[88].mxu0 }
 0x264   : > { %v1984_v33 = vpop.f32.mrb[89].mxu0 }
 0x265   : > { %v1986_v35 = vpop.f32.mrb[90].mxu0 }
 0x266   : > { %v2476_v37 = vpack.c.bf16 %v1986_v35, %v1982_v32  ;;  %v1988_v38 = vpop.f32.mrb[91].mxu0  ;;  %v5479_v32 = vld [vmem:[%s6939_s7 + $0x10] ss:$8 sps:$4 sm:$0xff]   ;;  %v5483_v35 = vld [vmem:[%s6939_s7 + $0x34] ss:$8 sps:$4 sm:$0xff]  }
 0x267   : > { %v2477_v39 = vpack.c.bf16 %v1988_v38, %v1984_v33  ;;  %v5480_v33 = vld [vmem:[%s6939_s7 + $0x24] ss:$8 sps:$4 sm:$0xff]   ;;  %v5488_v38 = vld [vmem:[%s6939_s7 + $0x40] ss:$8 sps:$4 sm:$0xff]  }
 0x269   : > { %4830 = vmatmul.mubr.msk.bf16.gmra.mrb[136].mxu1 %vm2614_vm1, %v5473_v34  ;;  %3028 = vmatprep.subr.bf16.mxu1 %v2477_v39  ;;  %v5482_v34 = vld [vmem:[%s6939_s7 + $0x20] ss:$8 sps:$4 sm:$0xff]   ;;  %v5489_v39 = vld [vmem:[%s6939_s7 + $0x54] ss:$8 sps:$4 sm:$0xff]  }
 0x26a   : > { %3048 = vmatprep.mubr.bf16.mxu1 %v5476_v36  ;;  %3029 = vmatpush1.bf16.msra.mxu1 %v2476_v37  ;;  %v5485_v36 = vld [vmem:[%s6939_s7 + $0x30] ss:$8 sps:$4 sm:$0xff]   ;;  %v5486_v37 = vld [vmem:[%s6939_s7 + $0x44] ss:$8 sps:$4 sm:$0xff]  }
 0x26b   : > { %v1992_v0 = vpop.f32.mrb[92].mxu0 }
 0x26c   : > { %v1994_v40 = vpop.f32.mrb[93].mxu0 }
 0x26d   : > { %v1996_v41 = vpop.f32.mrb[94].mxu0 }
 0x26e   : > { %v2478_v42 = vpack.c.bf16 %v1996_v41, %v1992_v0  ;;  %v1998_v43 = vpop.f32.mrb[95].mxu0  ;;  %v5491_v0 = vld [vmem:[%s6939_s7 + $0x50] ss:$8 sps:$4 sm:$0xff]   ;;  %v5494_v41 = vld [vmem:[%s6939_s7 + $0x60] ss:$8 sps:$4 sm:$0xff]  }
 0x26f   : > { %v2479_v44 = vpack.c.bf16 %v1998_v43, %v1994_v40  ;;  %v5492_v40 = vld [vmem:[%s6939_s7 + $0x64] ss:$8 sps:$4 sm:$0xff]   ;;  %v5497_v43 = vld [vmem:[%s6939_s7 + $0x70] ss:$8 sps:$4 sm:$0xff]  }
 0x271   : > { %3030 = vmatprep.subr.bf16.mxu1 %v2479_v44  ;;  %v5498_v44 = vld [vmem:[%s6939_s7 + $0x84] ss:$8 sps:$4 sm:$0xff]  }
 0x272   : > { %3031 = vmatpush1.bf16.msra.mxu1 %v2478_v42  ;;  %v5495_v42 = vld [vmem:[%s6939_s7 + $0x74] ss:$8 sps:$4 sm:$0xff]  }
 0x273   : > { %v2002_v45 = vpop.f32.mrb[96].mxu0 }
 0x274   : > { %v2004_v46 = vpop.f32.mrb[97].mxu0 }
 0x275   : > { %v2006_v47 = vpop.f32.mrb[98].mxu0 }
 0x276   : > { %v2480_v48 = vpack.c.bf16 %v2006_v47, %v2002_v45  ;;  %v2008_v49 = vpop.f32.mrb[99].mxu0  ;;  %v5500_v45 = vld [vmem:[%s6939_s7 + $0x80] ss:$8 sps:$4 sm:$0xff]   ;;  %v5503_v47 = vld [vmem:[%s6939_s7 + $0x90] ss:$8 sps:$4 sm:$0xff]  }
 0x277   : > { %v2481_v50 = vpack.c.bf16 %v2008_v49, %v2004_v46  ;;  %v5501_v46 = vld [vmem:[%s6939_s7 + $0x94] ss:$8 sps:$4 sm:$0xff]   ;;  %v5506_v49 = vld [vmem:[%s6939_s7 + $0xa0] ss:$8 sps:$4 sm:$0xff]  }
 0x279   : > { %3032 = vmatprep.subr.bf16.mxu1 %v2481_v50  ;;  %v5507_v50 = vld [vmem:[%s6939_s7 + $0xb4] ss:$8 sps:$4 sm:$0xff]  }
 0x27a   : > { %3033 = vmatpush1.bf16.msra.mxu1 %v2480_v48  ;;  %v5504_v48 = vld [vmem:[%s6939_s7 + $0xa4] ss:$8 sps:$4 sm:$0xff]  }
 0x27b   : > { %v2012_v51 = vpop.f32.mrb[100].mxu0 }
 0x27c   : > { %v2014_v52 = vpop.f32.mrb[101].mxu0 }
 0x27d   : > { %v2016_v53 = vpop.f32.mrb[102].mxu0 }
 0x27e   : > { %v2482_v54 = vpack.c.bf16 %v2016_v53, %v2012_v51  ;;  %v2018_v55 = vpop.f32.mrb[103].mxu0  ;;  %v5509_v51 = vld [vmem:[%s6939_s7 + $0xb0] ss:$8 sps:$4 sm:$0xff]   ;;  %v5512_v53 = vld [vmem:[%s6939_s7 + $0xc0] ss:$8 sps:$4 sm:$0xff]  }
 0x27f   : > { %v2483_v56 = vpack.c.bf16 %v2018_v55, %v2014_v52  ;;  %v5510_v52 = vld [vmem:[%s6939_s7 + $0xc4] ss:$8 sps:$4 sm:$0xff]   ;;  %v5515_v55 = vld [vmem:[%s6939_s7 + $0xd0] ss:$8 sps:$4 sm:$0xff]  }
 0x281   : > { %3034 = vmatprep.subr.bf16.mxu1 %v2483_v56  ;;  %v5516_v56 = vld [vmem:[%s6939_s7 + $0xe4] ss:$8 sps:$4 sm:$0xff]  }
 0x282   : > { %3035 = vmatpush1.bf16.msra.mxu1 %v2482_v54  ;;  %v5513_v54 = vld [vmem:[%s6939_s7 + $0xd4] ss:$8 sps:$4 sm:$0xff]  }
 0x283   : > { %v2022_v57 = vpop.f32.mrb[104].mxu0 }
 0x284   : > { %v2024_v58 = vpop.f32.mrb[105].mxu0 }
 0x285   : > { %v2026_v59 = vpop.f32.mrb[106].mxu0 }
 0x286   : > { %v2484_v60 = vpack.c.bf16 %v2026_v59, %v2022_v57  ;;  %v2028_v62 = vpop.f32.mrb[107].mxu0  ;;  %v5518_v57 = vld [vmem:[%s6939_s7 + $0xe0] ss:$8 sps:$4 sm:$0xff]   ;;  %v5521_v59 = vld [vmem:[%s6939_s7 + $0xf0] ss:$8 sps:$4 sm:$0xff]  }
 0x287   : > { %v2485_v63 = vpack.c.bf16 %v2028_v62, %v2024_v58  ;;  %v5519_v58 = vld [vmem:[%s6939_s7 + $0xf4] ss:$8 sps:$4 sm:$0xff]  }
 0x289   : > { %3036 = vmatprep.subr.bf16.mxu1 %v2485_v63 }
 0x28a   : > { %3037 = vmatpush1.bf16.msra.mxu1 %v2484_v60  ;;  %v3244_v60 = vpop.permute.xlu0 %3243 }
 0x28b   : > { %v2032_v61 = vpop.f32.mrb[108].mxu0 }
 0x28c   : > { %v2034_v1 = vpop.f32.mrb[109].mxu0 }
 0x28d   : > { %v2036_v2 = vpop.f32.mrb[110].mxu0 }
 0x28e   : > { %v2486_v3 = vpack.c.bf16 %v2036_v2, %v2032_v61  ;;  %v2038_v4 = vpop.f32.mrb[111].mxu0 }
 0x28f   : > { %v2487_v5 = vpack.c.bf16 %v2038_v4, %v2034_v1  ;;  %v3249_v1 = vpop.permute.xlu1 %3248 }
 0x291   : > { %3038 = vmatprep.subr.bf16.mxu1 %v2487_v5 }
 0x292   : > { %3039 = vmatpush1.bf16.msra.mxu1 %v2486_v3 }
 0x293   : > { %v2042_v6 = vpop.f32.mrb[112].mxu0 }
 0x294   : > { %v2044_v7 = vpop.f32.mrb[113].mxu0 }
 0x295   : > { %v2046_v8 = vpop.f32.mrb[114].mxu0 }
 0x296   : > { %v2488_v9 = vpack.c.bf16 %v2046_v8, %v2042_v6  ;;  %v2048_v10 = vpop.f32.mrb[115].mxu0 }
 0x297   : > { %v2489_v11 = vpack.c.bf16 %v2048_v10, %v2044_v7  ;;  %v5524_v10 = vld [vmem:[%s6942_s10 + $0x4] ss:$8 sps:$4 sm:$0xff]  }
 0x298   : > { %4041 = vmatprep.mubr.bf16.mxu0 %v5524_v10 }
 0x299   : > { %3040 = vmatprep.subr.bf16.mxu1 %v2489_v11 }
 0x29a   : > { %3041 = vmatpush1.bf16.msra.mxu1 %v2488_v9 }
 0x29b   : > { %v2052_v12 = vpop.f32.mrb[116].mxu0 }
 0x29c   : > { %v2054_v13 = vpop.f32.mrb[117].mxu0 }
 0x29d   : > { %v2056_v14 = vpop.f32.mrb[118].mxu0 }
 0x29e   : > { %v2490_v15 = vpack.c.bf16 %v2056_v14, %v2052_v12  ;;  %v2058_v16 = vpop.f32.mrb[119].mxu0  ;;  %v3254_v14 = vpop.permute.xlu0 %3253 }
 0x29f   : > { %v2491_v17 = vpack.c.bf16 %v2058_v16, %v2054_v13 }
 0x2a1   : > { %3042 = vmatprep.subr.bf16.mxu1 %v2491_v17 }
 0x2a2   : > { %3043 = vmatpush1.bf16.msra.mxu1 %v2490_v15 }
 0x2a3   : > { %v2062_v18 = vpop.f32.mrb[120].mxu0 }
 0x2a4   : > { %v2064_v19 = vpop.f32.mrb[121].mxu0 }
 0x2a5   : > { %v2066_v20 = vpop.f32.mrb[122].mxu0 }
 0x2a6   : > { %v2492_v21 = vpack.c.bf16 %v2066_v20, %v2062_v18  ;;  %v2068_v22 = vpop.f32.mrb[123].mxu0 }
 0x2a7   : > { %v2493_v23 = vpack.c.bf16 %v2068_v22, %v2064_v19 }
 0x2a9   : > { %3044 = vmatprep.subr.bf16.mxu1 %v2493_v23 }
 0x2aa   : > { %3045 = vmatpush1.bf16.msra.mxu1 %v2492_v21  ;;  %v3259_v21 = vpop.permute.xlu1 %3258 }
 0x2ab   : > { %v2072_v24 = vpop.f32.mrb[124].mxu0 }
 0x2ac   : > { %v2074_v25 = vpop.f32.mrb[125].mxu0 }
 0x2ad   : > { %v2076_v26 = vpop.f32.mrb[126].mxu0 }
 0x2ae   : > { %v2494_v27 = vpack.c.bf16 %v2076_v26, %v2072_v24  ;;  %v2078_v28 = vpop.f32.mrb[127].mxu0 }
 0x2af   : > { %v2495_v29 = vpack.c.bf16 %v2078_v28, %v2074_v25 }
 0x2b1   : > { %3046 = vmatprep.subr.bf16.mxu1 %v2495_v29 }
 0x2b2   : > { %3047 = vmatpush1.bf16.msra.mxu1 %v2494_v27 }
 0x2b5   : > { %3049 = vmatmul.mubr.bf16.vlgmr.msra.gmra.mrb[76].mxu1 %v5474_v30 }
 0x2b6   : > { %3058 = vmatprep.mubr.bf16.mxu1 %v5477_v31 }
 0x2bd   : > { %3059 = vmatmul.mubr.bf16.gmra.mrb[80].mxu1 %v5479_v32 }
 0x2be   : > { %3068 = vmatprep.mubr.bf16.mxu1 %v5480_v33 }
 0x2c5   : > { %3069 = vmatmul.mubr.bf16.gmra.mrb[84].mxu1 %v5482_v34  ;;  %v3264_v34 = vpop.permute.xlu0 %3263 }
 0x2c6   : > { %3078 = vmatprep.mubr.bf16.mxu1 %v5483_v35 }
 0x2cd   : > { %3079 = vmatmul.mubr.bf16.gmra.mrb[88].mxu1 %v5485_v36 }
 0x2ce   : > { %3088 = vmatprep.mubr.bf16.mxu1 %v5486_v37 }
 0x2d5   : > { %3089 = vmatmul.mubr.bf16.gmra.mrb[92].mxu1 %v5488_v38 }
 0x2d6   : > { %3098 = vmatprep.mubr.bf16.mxu1 %v5489_v39 }
 0x2dd   : > { %3099 = vmatmul.mubr.bf16.gmra.mrb[96].mxu1 %v5491_v0 }
 0x2de   : > { %3108 = vmatprep.mubr.bf16.mxu1 %v5492_v40  ;;  %v3269_v40 = vpop.permute.xlu1 %3268 }
 0x2e5   : > { %3109 = vmatmul.mubr.bf16.gmra.mrb[100].mxu1 %v5494_v41 }
 0x2e6   : > { %3118 = vmatprep.mubr.bf16.mxu1 %v5495_v42 }
 0x2ed   : > { %3119 = vmatmul.mubr.bf16.gmra.mrb[104].mxu1 %v5497_v43 }
 0x2ee   : > { %3128 = vmatprep.mubr.bf16.mxu1 %v5498_v44 }
 0x2f5   : > { %3129 = vmatmul.mubr.bf16.gmra.mrb[108].mxu1 %v5500_v45 }
 0x2f6   : > { %3138 = vmatprep.mubr.bf16.mxu1 %v5501_v46 }
 0x2fd   : > { %3139 = vmatmul.mubr.bf16.gmra.mrb[112].mxu1 %v5503_v47 }
 0x2fe   : > { %3148 = vmatprep.mubr.bf16.mxu1 %v5504_v48 }
 0x305   : > { %3149 = vmatmul.mubr.bf16.gmra.mrb[116].mxu1 %v5506_v49 }
 0x306   : > { %3158 = vmatprep.mubr.bf16.mxu1 %v5507_v50 }
 0x30d   : > { %3159 = vmatmul.mubr.bf16.gmra.mrb[120].mxu1 %v5509_v51 }
 0x30e   : > { %3168 = vmatprep.mubr.bf16.mxu1 %v5510_v52 }
 0x315   : > { %3169 = vmatmul.mubr.bf16.gmra.mrb[124].mxu1 %v5512_v53  ;;  %v3274_v53 = vpop.permute.xlu0 %3273 }
 0x316   : > { %3178 = vmatprep.mubr.bf16.mxu1 %v5513_v54 }
 0x319   : > { %v3284_v10 = vpop.permute.xlu0 %3283 }
 0x31d   : > { %3179 = vmatmul.mubr.bf16.gmra.mrb[128].mxu1 %v5515_v55 }
 0x31e   : > { %3188 = vmatprep.mubr.bf16.mxu1 %v5516_v56 }
 0x325   : > { %3189 = vmatmul.mubr.bf16.gmra.mrb[132].mxu1 %v5518_v57 }
 0x326   : > { %3198 = vmatprep.mubr.bf16.mxu1 %v5519_v58 }
 0x32d   : > { %3199 = vmatmul.mubr.bf16.gmra.mrb[136].mxu1 %v5521_v59 }
 0x388   : > { %v3050_v62 = vpop.f32.mrb[76].mxu1 }
 0x389   : > { %v3401_v63 = vadd.f32 %v3244_v60, %v3050_v62  ;;  %v3052_v61 = vpop.f32.mrb[77].mxu1 }
 0x38a   : > { %v3402_v2 = vadd.f32 %v3244_v60, %v3052_v61  ;;  %v3054_v3 = vpop.f32.mrb[78].mxu1  ;;  %v3279_v60 = vpop.permute.xlu1 %3278 }
 0x38b   : > { %v3465_v4 = vmul.f32 0.01, %v3401_v63  ;;  %v3403_v5 = vadd.f32 %v3249_v1, %v3054_v3  ;;  %v3056_v6 = vpop.f32.mrb[79].mxu1 }
 0x38c   : > { %v3466_v7 = vmul.f32 0.01, %v3402_v2  ;;  %v3404_v8 = vadd.f32 %v3249_v1, %v3056_v6 }
 0x38d   : > { %v3467_v9 = vmul.f32 0.01, %v3403_v5  ;;  %v3529_v12 = vmax.f32 %v3401_v63, %v3465_v4 }
 0x38e   : > { %v3468_v11 = vmul.f32 0.01, %v3404_v8  ;;  %v3530_v15 = vmax.f32 %v3402_v2, %v3466_v7 }
 0x38f   : > { %v3531_v13 = vmax.f32 %v3403_v5, %v3467_v9 }
 0x390   : > { %v3532_v16 = vmax.f32 %v3404_v8, %v3468_v11  ;;  %v3060_v17 = vpop.f32.mrb[80].mxu1 }
 0x391   : > { %v3625_v18 = vpack.c.bf16 %v3531_v13, %v3529_v12  ;;  %v3405_v19 = vadd.f32 %v3254_v14, %v3060_v17  ;;  %v3062_v20 = vpop.f32.mrb[81].mxu1  ;;  %v3289_v17 = vpop.permute.xlu1 %3288 }
 0x392   : > { %v3406_v22 = vadd.f32 %v3254_v14, %v3062_v20  ;;  %v3064_v23 = vpop.f32.mrb[82].mxu1  ;;  %v3626_v24 = vpack.c.bf16 %v3532_v16, %v3530_v15 }
 0x393   : > { %v3469_v25 = vmul.f32 0.01, %v3405_v19  ;;  %v3407_v26 = vadd.f32 %v3259_v21, %v3064_v23  ;;  %v3066_v27 = vpop.f32.mrb[83].mxu1 }
 0x394   : > { %v3470_v28 = vmul.f32 0.01, %v3406_v22  ;;  %v3408_v29 = vadd.f32 %v3259_v21, %v3066_v27  ;;  %4009 = vmatprep.subr.bf16.mxu0 %v3626_v24 }
 0x395   : > { %v3471_v30 = vmul.f32 0.01, %v3407_v26  ;;  %4010 = vmatpush1.bf16.msra.mxu0 %v3625_v18  ;;  %v3533_v32 = vmax.f32 %v3405_v19, %v3469_v25 }
 0x396   : > { %v3472_v31 = vmul.f32 0.01, %v3408_v29  ;;  %v3534_v35 = vmax.f32 %v3406_v22, %v3470_v28 }
 0x397   : > { %v3535_v33 = vmax.f32 %v3407_v26, %v3471_v30  ;;  %v3294_v30 = vpop.permute.xlu0 %3293 }
 0x398   : > { %v3536_v36 = vmax.f32 %v3408_v29, %v3472_v31  ;;  %v3070_v37 = vpop.f32.mrb[84].mxu1 }
 0x399   : > { %v3627_v38 = vpack.c.bf16 %v3535_v33, %v3533_v32  ;;  %v3409_v39 = vadd.f32 %v3264_v34, %v3070_v37  ;;  %v3072_v0 = vpop.f32.mrb[85].mxu1  ;;  %v3299_v37 = vpop.permute.xlu1 %3298 }
 0x39a   : > { %v3410_v41 = vadd.f32 %v3264_v34, %v3072_v0  ;;  %v3074_v42 = vpop.f32.mrb[86].mxu1  ;;  %v3628_v43 = vpack.c.bf16 %v3536_v36, %v3534_v35 }
 0x39b   : > { %v3473_v44 = vmul.f32 0.01, %v3409_v39  ;;  %v3411_v45 = vadd.f32 %v3269_v40, %v3074_v42  ;;  %v3076_v46 = vpop.f32.mrb[87].mxu1 }
 0x39c   : > { %v3474_v47 = vmul.f32 0.01, %v3410_v41  ;;  %v3412_v48 = vadd.f32 %v3269_v40, %v3076_v46  ;;  %4011 = vmatprep.subr.bf16.mxu0 %v3628_v43 }
 0x39d   : > { %v3475_v49 = vmul.f32 0.01, %v3411_v45  ;;  %4012 = vmatpush1.bf16.msra.mxu0 %v3627_v38  ;;  %v3537_v51 = vmax.f32 %v3409_v39, %v3473_v44 }
 0x39e   : > { %v3476_v50 = vmul.f32 0.01, %v3412_v48  ;;  %v3538_v54 = vmax.f32 %v3410_v41, %v3474_v47 }
 0x39f   : > { %v3539_v52 = vmax.f32 %v3411_v45, %v3475_v49  ;;  %v3304_v49 = vpop.permute.xlu0 %3303 }
 0x3a0   : > { %v3540_v55 = vmax.f32 %v3412_v48, %v3476_v50  ;;  %v3080_v56 = vpop.f32.mrb[88].mxu1 }
 0x3a1   : > { %v3629_v57 = vpack.c.bf16 %v3539_v52, %v3537_v51  ;;  %v3413_v58 = vadd.f32 %v3274_v53, %v3080_v56  ;;  %v3082_v59 = vpop.f32.mrb[89].mxu1  ;;  %v3309_v56 = vpop.permute.xlu1 %3308 }
 0x3a2   : > { %v3414_v62 = vadd.f32 %v3274_v53, %v3082_v59  ;;  %v3084_v63 = vpop.f32.mrb[90].mxu1  ;;  %v3630_v61 = vpack.c.bf16 %v3540_v55, %v3538_v54 }
 0x3a3   : > { %v3477_v1 = vmul.f32 0.01, %v3413_v58  ;;  %v3415_v2 = vadd.f32 %v3279_v60, %v3084_v63  ;;  %v3086_v3 = vpop.f32.mrb[91].mxu1 }
 0x3a4   : > { %v3478_v4 = vmul.f32 0.01, %v3414_v62  ;;  %v3416_v5 = vadd.f32 %v3279_v60, %v3086_v3  ;;  %4013 = vmatprep.subr.bf16.mxu0 %v3630_v61 }
 0x3a5   : > { %v3479_v6 = vmul.f32 0.01, %v3415_v2  ;;  %4014 = vmatpush1.bf16.msra.mxu0 %v3629_v57  ;;  %v3541_v8 = vmax.f32 %v3413_v58, %v3477_v1 }
 0x3a6   : > { %v3480_v7 = vmul.f32 0.01, %v3416_v5  ;;  %v3542_v11 = vmax.f32 %v3414_v62, %v3478_v4 }
 0x3a7   : > { %v3543_v9 = vmax.f32 %v3415_v2, %v3479_v6  ;;  %v3314_v6 = vpop.permute.xlu0 %3313 }
 0x3a8   : > { %v3544_v12 = vmax.f32 %v3416_v5, %v3480_v7  ;;  %v3090_v13 = vpop.f32.mrb[92].mxu1 }
 0x3a9   : > { %v3631_v14 = vpack.c.bf16 %v3543_v9, %v3541_v8  ;;  %v3417_v15 = vadd.f32 %v3284_v10, %v3090_v13  ;;  %v3092_v16 = vpop.f32.mrb[93].mxu1  ;;  %v3319_v13 = vpop.permute.xlu1 %3318 }
 0x3aa   : > { %v3418_v18 = vadd.f32 %v3284_v10, %v3092_v16  ;;  %v3094_v19 = vpop.f32.mrb[94].mxu1  ;;  %v3632_v20 = vpack.c.bf16 %v3544_v12, %v3542_v11 }
 0x3ab   : > { %v3481_v21 = vmul.f32 0.01, %v3417_v15  ;;  %v3419_v22 = vadd.f32 %v3289_v17, %v3094_v19  ;;  %v3096_v23 = vpop.f32.mrb[95].mxu1 }
 0x3ac   : > { %v3482_v24 = vmul.f32 0.01, %v3418_v18  ;;  %v3420_v25 = vadd.f32 %v3289_v17, %v3096_v23  ;;  %4015 = vmatprep.subr.bf16.mxu0 %v3632_v20 }
 0x3ad   : > { %v3483_v26 = vmul.f32 0.01, %v3419_v22  ;;  %4016 = vmatpush1.bf16.msra.mxu0 %v3631_v14  ;;  %v3545_v28 = vmax.f32 %v3417_v15, %v3481_v21 }
 0x3ae   : > { %v3484_v27 = vmul.f32 0.01, %v3420_v25  ;;  %v3546_v31 = vmax.f32 %v3418_v18, %v3482_v24 }
 0x3af   : > { %v3547_v29 = vmax.f32 %v3419_v22, %v3483_v26  ;;  %v3324_v26 = vpop.permute.xlu0 %3323 }
 0x3b0   : > { %v3548_v32 = vmax.f32 %v3420_v25, %v3484_v27  ;;  %v3100_v33 = vpop.f32.mrb[96].mxu1 }
 0x3b1   : > { %v3633_v34 = vpack.c.bf16 %v3547_v29, %v3545_v28  ;;  %v3421_v35 = vadd.f32 %v3294_v30, %v3100_v33  ;;  %v3102_v36 = vpop.f32.mrb[97].mxu1  ;;  %v3329_v33 = vpop.permute.xlu1 %3328 }
 0x3b2   : > { %v3422_v38 = vadd.f32 %v3294_v30, %v3102_v36  ;;  %v3104_v39 = vpop.f32.mrb[98].mxu1  ;;  %v3634_v0 = vpack.c.bf16 %v3548_v32, %v3546_v31 }
 0x3b3   : > { %v3485_v40 = vmul.f32 0.01, %v3421_v35  ;;  %v3423_v41 = vadd.f32 %v3299_v37, %v3104_v39  ;;  %v3106_v42 = vpop.f32.mrb[99].mxu1 }
 0x3b4   : > { %v3486_v43 = vmul.f32 0.01, %v3422_v38  ;;  %v3424_v44 = vadd.f32 %v3299_v37, %v3106_v42  ;;  %4017 = vmatprep.subr.bf16.mxu0 %v3634_v0 }
 0x3b5   : > { %v3487_v45 = vmul.f32 0.01, %v3423_v41  ;;  %4018 = vmatpush1.bf16.msra.mxu0 %v3633_v34  ;;  %v3549_v47 = vmax.f32 %v3421_v35, %v3485_v40 }
 0x3b6   : > { %v3488_v46 = vmul.f32 0.01, %v3424_v44  ;;  %v3550_v50 = vmax.f32 %v3422_v38, %v3486_v43 }
 0x3b7   : > { %v3551_v48 = vmax.f32 %v3423_v41, %v3487_v45  ;;  %v3334_v45 = vpop.permute.xlu0 %3333 }
 0x3b8   : > { %v3552_v51 = vmax.f32 %v3424_v44, %v3488_v46  ;;  %v3110_v52 = vpop.f32.mrb[100].mxu1 }
 0x3b9   : > { %v3635_v53 = vpack.c.bf16 %v3551_v48, %v3549_v47  ;;  %v3425_v54 = vadd.f32 %v3304_v49, %v3110_v52  ;;  %v3112_v55 = vpop.f32.mrb[101].mxu1  ;;  %v3339_v52 = vpop.permute.xlu1 %3338 }
 0x3ba   : > { %v3426_v57 = vadd.f32 %v3304_v49, %v3112_v55  ;;  %v3114_v58 = vpop.f32.mrb[102].mxu1  ;;  %v3636_v59 = vpack.c.bf16 %v3552_v51, %v3550_v50 }
 0x3bb   : > { %v3489_v60 = vmul.f32 0.01, %v3425_v54  ;;  %v3427_v62 = vadd.f32 %v3309_v56, %v3114_v58  ;;  %v3116_v63 = vpop.f32.mrb[103].mxu1 }
 0x3bc   : > { %v3490_v61 = vmul.f32 0.01, %v3426_v57  ;;  %v3428_v1 = vadd.f32 %v3309_v56, %v3116_v63  ;;  %4019 = vmatprep.subr.bf16.mxu0 %v3636_v59 }
 0x3bd   : > { %v3491_v2 = vmul.f32 0.01, %v3427_v62  ;;  %4020 = vmatpush1.bf16.msra.mxu0 %v3635_v53  ;;  %v3553_v4 = vmax.f32 %v3425_v54, %v3489_v60 }
 0x3be   : > { %v3492_v3 = vmul.f32 0.01, %v3428_v1  ;;  %v3554_v7 = vmax.f32 %v3426_v57, %v3490_v61 }
 0x3bf   : > { %v3555_v5 = vmax.f32 %v3427_v62, %v3491_v2  ;;  %v3344_v2 = vpop.permute.xlu0 %3343 }
 0x3c0   : > { %v3556_v8 = vmax.f32 %v3428_v1, %v3492_v3  ;;  %v3120_v9 = vpop.f32.mrb[104].mxu1 }
 0x3c1   : > { %v3637_v10 = vpack.c.bf16 %v3555_v5, %v3553_v4  ;;  %v3429_v11 = vadd.f32 %v3314_v6, %v3120_v9  ;;  %v3122_v12 = vpop.f32.mrb[105].mxu1  ;;  %v3349_v9 = vpop.permute.xlu1 %3348 }
 0x3c2   : > { %v3430_v14 = vadd.f32 %v3314_v6, %v3122_v12  ;;  %v3124_v15 = vpop.f32.mrb[106].mxu1  ;;  %v3638_v16 = vpack.c.bf16 %v3556_v8, %v3554_v7 }
 0x3c3   : > { %v3493_v17 = vmul.f32 0.01, %v3429_v11  ;;  %v3431_v18 = vadd.f32 %v3319_v13, %v3124_v15  ;;  %v3126_v19 = vpop.f32.mrb[107].mxu1 }
 0x3c4   : > { %v3494_v20 = vmul.f32 0.01, %v3430_v14  ;;  %v3432_v21 = vadd.f32 %v3319_v13, %v3126_v19  ;;  %4021 = vmatprep.subr.bf16.mxu0 %v3638_v16 }
 0x3c5   : > { %v3495_v22 = vmul.f32 0.01, %v3431_v18  ;;  %4022 = vmatpush1.bf16.msra.mxu0 %v3637_v10  ;;  %v3557_v24 = vmax.f32 %v3429_v11, %v3493_v17 }
 0x3c6   : > { %v3496_v23 = vmul.f32 0.01, %v3432_v21  ;;  %v3558_v27 = vmax.f32 %v3430_v14, %v3494_v20 }
 0x3c7   : > { %v3559_v25 = vmax.f32 %v3431_v18, %v3495_v22  ;;  %v3354_v22 = vpop.permute.xlu0 %3353 }
 0x3c8   : > { %v3560_v28 = vmax.f32 %v3432_v21, %v3496_v23  ;;  %v3130_v29 = vpop.f32.mrb[108].mxu1 }
 0x3c9   : > { %v3639_v30 = vpack.c.bf16 %v3559_v25, %v3557_v24  ;;  %v3433_v31 = vadd.f32 %v3324_v26, %v3130_v29  ;;  %v3132_v32 = vpop.f32.mrb[109].mxu1  ;;  %v3359_v29 = vpop.permute.xlu1 %3358 }
 0x3ca   : > { %v3434_v34 = vadd.f32 %v3324_v26, %v3132_v32  ;;  %v3134_v35 = vpop.f32.mrb[110].mxu1  ;;  %v3640_v36 = vpack.c.bf16 %v3560_v28, %v3558_v27 }
 0x3cb   : > { %v3497_v37 = vmul.f32 0.01, %v3433_v31  ;;  %v3435_v38 = vadd.f32 %v3329_v33, %v3134_v35  ;;  %v3136_v39 = vpop.f32.mrb[111].mxu1 }
 0x3cc   : > { %v3498_v0 = vmul.f32 0.01, %v3434_v34  ;;  %v3436_v40 = vadd.f32 %v3329_v33, %v3136_v39  ;;  %4023 = vmatprep.subr.bf16.mxu0 %v3640_v36 }
 0x3cd   : > { %v3499_v41 = vmul.f32 0.01, %v3435_v38  ;;  %4024 = vmatpush1.bf16.msra.mxu0 %v3639_v30  ;;  %v3561_v43 = vmax.f32 %v3433_v31, %v3497_v37 }
 0x3ce   : > { %v3500_v42 = vmul.f32 0.01, %v3436_v40  ;;  %v3562_v46 = vmax.f32 %v3434_v34, %v3498_v0 }
 0x3cf   : > { %v3563_v44 = vmax.f32 %v3435_v38, %v3499_v41  ;;  %v3364_v41 = vpop.permute.xlu0 %3363 }
 0x3d0   : > { %v3564_v47 = vmax.f32 %v3436_v40, %v3500_v42  ;;  %v3140_v48 = vpop.f32.mrb[112].mxu1 }
 0x3d1   : > { %v3641_v49 = vpack.c.bf16 %v3563_v44, %v3561_v43  ;;  %v3437_v50 = vadd.f32 %v3334_v45, %v3140_v48  ;;  %v3142_v51 = vpop.f32.mrb[113].mxu1  ;;  %v3369_v48 = vpop.permute.xlu1 %3368 }
 0x3d2   : > { %v3438_v53 = vadd.f32 %v3334_v45, %v3142_v51  ;;  %v3144_v54 = vpop.f32.mrb[114].mxu1  ;;  %v3642_v55 = vpack.c.bf16 %v3564_v47, %v3562_v46 }
 0x3d3   : > { %v3501_v56 = vmul.f32 0.01, %v3437_v50  ;;  %v3439_v57 = vadd.f32 %v3339_v52, %v3144_v54  ;;  %v3146_v58 = vpop.f32.mrb[115].mxu1 }
 0x3d4   : > { %v3502_v59 = vmul.f32 0.01, %v3438_v53  ;;  %v3440_v60 = vadd.f32 %v3339_v52, %v3146_v58  ;;  %4025 = vmatprep.subr.bf16.mxu0 %v3642_v55 }
 0x3d5   : > { %v3503_v62 = vmul.f32 0.01, %v3439_v57  ;;  %4026 = vmatpush1.bf16.msra.mxu0 %v3641_v49  ;;  %v3565_v61 = vmax.f32 %v3437_v50, %v3501_v56 }
 0x3d6   : > { %v3504_v63 = vmul.f32 0.01, %v3440_v60  ;;  %v3566_v3 = vmax.f32 %v3438_v53, %v3502_v59 }
 0x3d7   : > { %v3567_v1 = vmax.f32 %v3439_v57, %v3503_v62  ;;  %v3374_v62 = vpop.permute.xlu0 %3373 }
 0x3d8   : > { %v3568_v4 = vmax.f32 %v3440_v60, %v3504_v63  ;;  %v3150_v5 = vpop.f32.mrb[116].mxu1 }
 0x3d9   : > { %v3643_v6 = vpack.c.bf16 %v3567_v1, %v3565_v61  ;;  %v3441_v7 = vadd.f32 %v3344_v2, %v3150_v5  ;;  %v3152_v8 = vpop.f32.mrb[117].mxu1  ;;  %v3379_v5 = vpop.permute.xlu1 %3378 }
 0x3da   : > { %v3442_v10 = vadd.f32 %v3344_v2, %v3152_v8  ;;  %v3154_v11 = vpop.f32.mrb[118].mxu1  ;;  %v3644_v12 = vpack.c.bf16 %v3568_v4, %v3566_v3 }
 0x3db   : > { %v3505_v13 = vmul.f32 0.01, %v3441_v7  ;;  %v3443_v14 = vadd.f32 %v3349_v9, %v3154_v11  ;;  %v3156_v15 = vpop.f32.mrb[119].mxu1 }
 0x3dc   : > { %v3506_v16 = vmul.f32 0.01, %v3442_v10  ;;  %v3444_v17 = vadd.f32 %v3349_v9, %v3156_v15  ;;  %4027 = vmatprep.subr.bf16.mxu0 %v3644_v12 }
 0x3dd   : > { %v3507_v18 = vmul.f32 0.01, %v3443_v14  ;;  %4028 = vmatpush1.bf16.msra.mxu0 %v3643_v6  ;;  %v3569_v20 = vmax.f32 %v3441_v7, %v3505_v13 }
 0x3de   : > { %v3508_v19 = vmul.f32 0.01, %v3444_v17  ;;  %v3570_v23 = vmax.f32 %v3442_v10, %v3506_v16 }
 0x3df   : > { %v3571_v21 = vmax.f32 %v3443_v14, %v3507_v18  ;;  %v3384_v18 = vpop.permute.xlu0 %3383 }
 0x3e0   : > { %v3572_v24 = vmax.f32 %v3444_v17, %v3508_v19  ;;  %v3160_v25 = vpop.f32.mrb[120].mxu1 }
 0x3e1   : > { %v3645_v26 = vpack.c.bf16 %v3571_v21, %v3569_v20  ;;  %v3445_v27 = vadd.f32 %v3354_v22, %v3160_v25  ;;  %v3162_v28 = vpop.f32.mrb[121].mxu1  ;;  %v3389_v25 = vpop.permute.xlu1 %3388 }
 0x3e2   : > { %v3446_v30 = vadd.f32 %v3354_v22, %v3162_v28  ;;  %v3164_v31 = vpop.f32.mrb[122].mxu1  ;;  %v3646_v32 = vpack.c.bf16 %v3572_v24, %v3570_v23 }
 0x3e3   : > { %v3509_v33 = vmul.f32 0.01, %v3445_v27  ;;  %v3447_v34 = vadd.f32 %v3359_v29, %v3164_v31  ;;  %v3166_v35 = vpop.f32.mrb[123].mxu1 }
 0x3e4   : > { %v3510_v36 = vmul.f32 0.01, %v3446_v30  ;;  %v3448_v37 = vadd.f32 %v3359_v29, %v3166_v35  ;;  %4029 = vmatprep.subr.bf16.mxu0 %v3646_v32 }
 0x3e5   : > { %v3511_v38 = vmul.f32 0.01, %v3447_v34  ;;  %4030 = vmatpush1.bf16.msra.mxu0 %v3645_v26  ;;  %v3573_v0 = vmax.f32 %v3445_v27, %v3509_v33 }
 0x3e6   : > { %v3512_v39 = vmul.f32 0.01, %v3448_v37  ;;  %v3574_v42 = vmax.f32 %v3446_v30, %v3510_v36 }
 0x3e7   : > { %v3575_v40 = vmax.f32 %v3447_v34, %v3511_v38  ;;  %v3394_v38 = vpop.permute.xlu0 %3393 }
 0x3e8   : > { %v3576_v43 = vmax.f32 %v3448_v37, %v3512_v39  ;;  %v3170_v44 = vpop.f32.mrb[124].mxu1 }
 0x3e9   : > { %v3647_v45 = vpack.c.bf16 %v3575_v40, %v3573_v0  ;;  %v3449_v46 = vadd.f32 %v3364_v41, %v3170_v44  ;;  %v3172_v47 = vpop.f32.mrb[125].mxu1  ;;  %v3399_v44 = vpop.permute.xlu1 %3398 }
 0x3ea   : > { %v3450_v49 = vadd.f32 %v3364_v41, %v3172_v47  ;;  %v3174_v50 = vpop.f32.mrb[126].mxu1  ;;  %v3648_v51 = vpack.c.bf16 %v3576_v43, %v3574_v42 }
 0x3eb   : > { %v3513_v52 = vmul.f32 0.01, %v3449_v46  ;;  %v3451_v53 = vadd.f32 %v3369_v48, %v3174_v50  ;;  %v3176_v54 = vpop.f32.mrb[127].mxu1 }
 0x3ec   : > { %v3514_v55 = vmul.f32 0.01, %v3450_v49  ;;  %v3452_v56 = vadd.f32 %v3369_v48, %v3176_v54  ;;  %4031 = vmatprep.subr.bf16.mxu0 %v3648_v51 }
 0x3ed   : > { %v3515_v57 = vmul.f32 0.01, %v3451_v53  ;;  %4032 = vmatpush1.bf16.msra.mxu0 %v3647_v45  ;;  %v3577_v59 = vmax.f32 %v3449_v46, %v3513_v52 }
 0x3ee   : > { %v3516_v58 = vmul.f32 0.01, %v3452_v56  ;;  %v3578_v63 = vmax.f32 %v3450_v49, %v3514_v55 }
 0x3ef   : > { %v3579_v60 = vmax.f32 %v3451_v53, %v3515_v57 }
 0x3f0   : > { %v3580_v61 = vmax.f32 %v3452_v56, %v3516_v58  ;;  %v3180_v1 = vpop.f32.mrb[128].mxu1 }
 0x3f1   : > { %v3649_v2 = vpack.c.bf16 %v3579_v60, %v3577_v59  ;;  %v3453_v3 = vadd.f32 %v3374_v62, %v3180_v1  ;;  %v3182_v4 = vpop.f32.mrb[129].mxu1  ;;  %v5528_v1 = vld [vmem:[%s6942_s10 + $0x24] ss:$8 sps:$4 sm:$0xff]  }
 0x3f2   : > { %v3454_v6 = vadd.f32 %v3374_v62, %v3182_v4  ;;  %v3184_v7 = vpop.f32.mrb[130].mxu1  ;;  %v3650_v8 = vpack.c.bf16 %v3580_v61, %v3578_v63  ;;  %v5522_v62 = vld [vmem:[%s6942_s10] ss:$8 sps:$4 sm:$0xff]   ;;  %v5525_v63 = vld [vmem:[%s6942_s10 + $0x14] ss:$8 sps:$4 sm:$0xff]  }
 0x3f3   : > { %v3517_v9 = vmul.f32 0.01, %v3453_v3  ;;  %v3455_v10 = vadd.f32 %v3379_v5, %v3184_v7  ;;  %v3186_v11 = vpop.f32.mrb[131].mxu1  ;;  %v5527_v61 = vld [vmem:[%s6942_s10 + $0x10] ss:$8 sps:$4 sm:$0xff]  }
 0x3f4   : > { %v3518_v12 = vmul.f32 0.01, %v3454_v6  ;;  %v3456_v13 = vadd.f32 %v3379_v5, %v3186_v11  ;;  %4033 = vmatprep.subr.bf16.mxu0 %v3650_v8  ;;  %v5533_v4 = vld [vmem:[%s6942_s10 + $0x30] ss:$8 sps:$4 sm:$0xff]   ;;  %v5534_v5 = vld [vmem:[%s6942_s10 + $0x44] ss:$8 sps:$4 sm:$0xff]  }
 0x3f5   : > { %v3519_v14 = vmul.f32 0.01, %v3455_v10  ;;  %4034 = vmatpush1.bf16.msra.mxu0 %v3649_v2  ;;  %v3581_v16 = vmax.f32 %v3453_v3, %v3517_v9  ;;  %v5530_v2 = vld [vmem:[%s6942_s10 + $0x20] ss:$8 sps:$4 sm:$0xff]   ;;  %v5531_v3 = vld [vmem:[%s6942_s10 + $0x34] ss:$8 sps:$4 sm:$0xff]  }
 0x3f6   : > { %v3520_v15 = vmul.f32 0.01, %v3456_v13  ;;  %v3582_v19 = vmax.f32 %v3454_v6, %v3518_v12  ;;  %v5536_v6 = vld [vmem:[%s6942_s10 + $0x40] ss:$8 sps:$4 sm:$0xff]   ;;  %v5537_v7 = vld [vmem:[%s6942_s10 + $0x54] ss:$8 sps:$4 sm:$0xff]  }
 0x3f7   : > { %v3583_v17 = vmax.f32 %v3455_v10, %v3519_v14  ;;  %v5539_v8 = vld [vmem:[%s6942_s10 + $0x50] ss:$8 sps:$4 sm:$0xff]   ;;  %v5540_v9 = vld [vmem:[%s6942_s10 + $0x64] ss:$8 sps:$4 sm:$0xff]   ;;  %v5542_v10 = vld [vmem:[%s6942_s10 + $0x60] ss:$8 sps:$4 sm:$0xff]  }
 0x3f8   : > { %v3584_v20 = vmax.f32 %v3456_v13, %v3520_v15  ;;  %v3190_v21 = vpop.f32.mrb[132].mxu1  ;;  %v5543_v11 = vld [vmem:[%s6942_s10 + $0x74] ss:$8 sps:$4 sm:$0xff]   ;;  %v5545_v12 = vld [vmem:[%s6942_s10 + $0x70] ss:$8 sps:$4 sm:$0xff]  }
 0x3f9   : > { %v3651_v22 = vpack.c.bf16 %v3583_v17, %v3581_v16  ;;  %v3457_v23 = vadd.f32 %v3384_v18, %v3190_v21  ;;  %v3192_v24 = vpop.f32.mrb[133].mxu1  ;;  %v5546_v13 = vld [vmem:[%s6942_s10 + $0x84] ss:$8 sps:$4 sm:$0xff]   ;;  %v5548_v14 = vld [vmem:[%s6942_s10 + $0x80] ss:$8 sps:$4 sm:$0xff]  }
 0x3fa   : > { %v3458_v26 = vadd.f32 %v3384_v18, %v3192_v24  ;;  %v3194_v27 = vpop.f32.mrb[134].mxu1  ;;  %v3652_v28 = vpack.c.bf16 %v3584_v20, %v3582_v19  ;;  %v5549_v15 = vld [vmem:[%s6942_s10 + $0x94] ss:$8 sps:$4 sm:$0xff]   ;;  %v5551_v16 = vld [vmem:[%s6942_s10 + $0x90] ss:$8 sps:$4 sm:$0xff]  }
 0x3fb   : > { %v3521_v29 = vmul.f32 0.01, %v3457_v23  ;;  %v3459_v30 = vadd.f32 %v3389_v25, %v3194_v27  ;;  %v3196_v31 = vpop.f32.mrb[135].mxu1  ;;  %v5552_v17 = vld [vmem:[%s6942_s10 + $0xa4] ss:$8 sps:$4 sm:$0xff]  }
 0x3fc   : > { %v3522_v32 = vmul.f32 0.01, %v3458_v26  ;;  %v3460_v33 = vadd.f32 %v3389_v25, %v3196_v31  ;;  %4035 = vmatprep.subr.bf16.mxu0 %v3652_v28  ;;  %v5554_v18 = vld [vmem:[%s6942_s10 + $0xa0] ss:$8 sps:$4 sm:$0xff]   ;;  %v5555_v19 = vld [vmem:[%s6942_s10 + $0xb4] ss:$8 sps:$4 sm:$0xff]  }
 0x3fd   : > { %v3523_v34 = vmul.f32 0.01, %v3459_v30  ;;  %4036 = vmatpush1.bf16.msra.mxu0 %v3651_v22  ;;  %v3585_v36 = vmax.f32 %v3457_v23, %v3521_v29  ;;  %v5557_v20 = vld [vmem:[%s6942_s10 + $0xb0] ss:$8 sps:$4 sm:$0xff]   ;;  %v5558_v21 = vld [vmem:[%s6942_s10 + $0xc4] ss:$8 sps:$4 sm:$0xff]   ;;  %v3692_v29 = vpop.permute.xlu0 %3691 }
 0x3fe   : > { %v3524_v35 = vmul.f32 0.01, %v3460_v33  ;;  %v3586_v39 = vmax.f32 %v3458_v26, %v3522_v32  ;;  %v5560_v22 = vld [vmem:[%s6942_s10 + $0xc0] ss:$8 sps:$4 sm:$0xff]   ;;  %v5561_v23 = vld [vmem:[%s6942_s10 + $0xd4] ss:$8 sps:$4 sm:$0xff]  }
 0x3ff   : > { %v3587_v37 = vmax.f32 %v3459_v30, %v3523_v34  ;;  %v5563_v24 = vld [vmem:[%s6942_s10 + $0xd0] ss:$8 sps:$4 sm:$0xff]   ;;  %v5564_v25 = vld [vmem:[%s6942_s10 + $0xe4] ss:$8 sps:$4 sm:$0xff]   ;;  %v5566_v26 = vld [vmem:[%s6942_s10 + $0xe0] ss:$8 sps:$4 sm:$0xff]  }
 0x400   : > { %v3588_v0 = vmax.f32 %v3460_v33, %v3524_v35  ;;  %v3200_v40 = vpop.f32.mrb[136].mxu1  ;;  %v5567_v27 = vld [vmem:[%s6942_s10 + $0xf4] ss:$8 sps:$4 sm:$0xff]   ;;  %v5569_v28 = vld [vmem:[%s6942_s10 + $0xf0] ss:$8 sps:$4 sm:$0xff]   ;;  %v3697_v33 = vpop.permute.xlu1 %3696 }
 0x401   : > { %v3653_v41 = vpack.c.bf16 %v3587_v37, %v3585_v36  ;;  %v3461_v42 = vadd.f32 %v3394_v38, %v3200_v40  ;;  %v3202_v43 = vpop.f32.mrb[137].mxu1 }
 0x402   : > { %v3462_v45 = vadd.f32 %v3394_v38, %v3202_v43  ;;  %v3204_v46 = vpop.f32.mrb[138].mxu1  ;;  %v3654_v47 = vpack.c.bf16 %v3588_v0, %v3586_v39 }
 0x403   : > { %v3525_v48 = vmul.f32 0.01, %v3461_v42  ;;  %v3463_v49 = vadd.f32 %v3399_v44, %v3204_v46  ;;  %v3206_v50 = vpop.f32.mrb[139].mxu1 }
 0x404   : > { %v3526_v51 = vmul.f32 0.01, %v3462_v45  ;;  %v3464_v52 = vadd.f32 %v3399_v44, %v3206_v50  ;;  %4037 = vmatprep.subr.bf16.mxu0 %v3654_v47  ;;  %v3702_v47 = vpop.permute.xlu0 %3701 }
 0x405   : > { %v3527_v53 = vmul.f32 0.01, %v3463_v49  ;;  %4038 = vmatpush1.bf16.msra.mxu0 %v3653_v41  ;;  %v3589_v55 = vmax.f32 %v3461_v42, %v3525_v48  ;;  %v6804_v42 = vld [vmem:[%s6944_s12] sm:$0xff] }
 0x406   : > { %v3528_v54 = vmul.f32 0.01, %v3464_v52  ;;  %v3590_v57 = vmax.f32 %v3462_v45, %v3526_v51  ;;  %v4896_v45 = vcombine.high %v6804_v42, %v6804_v42 }
 0x407   : > { %v3591_v56 = vmax.f32 %v3463_v49, %v3527_v53  ;;  %v3707_v53 = vpop.permute.xlu1 %3706 }
 0x408   : > { %v3592_v58 = vmax.f32 %v3464_v52, %v3528_v54 }
 0x409   : > { %v3655_v59 = vpack.c.bf16 %v3591_v56, %v3589_v55 }
 0x40a   : > { %v3656_v60 = vpack.c.bf16 %v3592_v58, %v3590_v57 }
 0x40c   : > { %4039 = vmatprep.subr.bf16.mxu0 %v3656_v60 }
 0x40d   : > { %4040 = vmatpush1.bf16.msra.mxu0 %v3655_v59 }
 0x410   : > { %4042 = vmatmul.mubr.bf16.vlgmr.msra.gmra.mrb[128].mxu0 %v5522_v62 }
 0x411   : > { %4051 = vmatprep.mubr.bf16.mxu0 %v5525_v63 }
 0x418   : > { %4052 = vmatmul.mubr.bf16.gmra.mrb[132].mxu0 %v5527_v61 }
 0x419   : > { %4061 = vmatprep.mubr.bf16.mxu0 %v5528_v1 }
 0x420   : > { %4062 = vmatmul.mubr.bf16.gmra.mrb[136].mxu0 %v5530_v2 }
 0x421   : > { %4071 = vmatprep.mubr.bf16.mxu0 %v5531_v3 }
 0x428   : > { %4072 = vmatmul.mubr.bf16.gmra.mrb[140].mxu0 %v5533_v4  ;;  %v3712_v4 = vpop.permute.xlu0 %3711 }
 0x429   : > { %4081 = vmatprep.mubr.bf16.mxu0 %v5534_v5 }
 0x430   : > { %4082 = vmatmul.mubr.bf16.gmra.mrb[144].mxu0 %v5536_v6 }
 0x431   : > { %4091 = vmatprep.mubr.bf16.mxu0 %v5537_v7 }
 0x438   : > { %4092 = vmatmul.mubr.bf16.gmra.mrb[148].mxu0 %v5539_v8 }
 0x439   : > { %4101 = vmatprep.mubr.bf16.mxu0 %v5540_v9 }
 0x440   : > { %4102 = vmatmul.mubr.bf16.gmra.mrb[152].mxu0 %v5542_v10  ;;  %v3717_v10 = vpop.permute.xlu1 %3716 }
 0x441   : > { %4111 = vmatprep.mubr.bf16.mxu0 %v5543_v11 }
 0x448   : > { %4112 = vmatmul.mubr.bf16.gmra.mrb[156].mxu0 %v5545_v12 }
 0x449   : > { %4121 = vmatprep.mubr.bf16.mxu0 %v5546_v13 }
 0x450   : > { %4122 = vmatmul.mubr.bf16.gmra.mrb[160].mxu0 %v5548_v14 }
 0x451   : > { %4131 = vmatprep.mubr.bf16.mxu0 %v5549_v15 }
 0x458   : > { %4132 = vmatmul.mubr.bf16.gmra.mrb[164].mxu0 %v5551_v16 }
 0x459   : > { %4141 = vmatprep.mubr.bf16.mxu0 %v5552_v17 }
 0x460   : > { %4142 = vmatmul.mubr.bf16.gmra.mrb[168].mxu0 %v5554_v18 }
 0x461   : > { %4151 = vmatprep.mubr.bf16.mxu0 %v5555_v19 }
 0x468   : > { %4152 = vmatmul.mubr.bf16.gmra.mrb[172].mxu0 %v5557_v20 }
 0x469   : > { %4161 = vmatprep.mubr.bf16.mxu0 %v5558_v21 }
 0x470   : > { %4162 = vmatmul.mubr.bf16.gmra.mrb[176].mxu0 %v5560_v22 }
 0x471   : > { %4171 = vmatprep.mubr.bf16.mxu0 %v5561_v23 }
 0x478   : > { %4172 = vmatmul.mubr.bf16.gmra.mrb[180].mxu0 %v5563_v24  ;;  %v3722_v24 = vpop.permute.xlu0 %3721 }
 0x479   : > { %4181 = vmatprep.mubr.bf16.mxu0 %v5564_v25 }
 0x480   : > { %4182 = vmatmul.mubr.bf16.gmra.mrb[184].mxu0 %v5566_v26 }
 0x481   : > { %4191 = vmatprep.mubr.bf16.mxu0 %v5567_v27 }
 0x488   : > { %4192 = vmatmul.mubr.bf16.gmra.mrb[188].mxu0 %v5569_v28 }
 0x489   : > { %4472 = vmatprep.mubr.bf16.mxu0 %v4896_v45 }
 0x4e3   : > { %v4043_v30 = vpop.f32.mrb[128].mxu0 }
 0x4e4   : > { %v4044_v31 = vadd.f32 %v4043_v30, %v3692_v29  ;;  %v4045_v32 = vpop.f32.mrb[129].mxu0  ;;  %v3727_v30 = vpop.permute.xlu1 %3726 }
 0x4e5   : > { %v4046_v34 = vadd.f32 %v4045_v32, %v3692_v29  ;;  %v4047_v35 = vpop.f32.mrb[130].mxu0 }
 0x4e6   : > { %v4202_v36 = vmul.f32 0.01, %v4044_v31  ;;  %v4048_v37 = vadd.f32 %v4047_v35, %v3697_v33  ;;  %v4049_v38 = vpop.f32.mrb[131].mxu0 }
 0x4e7   : > { %v4203_v39 = vmul.f32 0.01, %v4046_v34  ;;  %v4050_v0 = vadd.f32 %v4049_v38, %v3697_v33 }
 0x4e8   : > { %v4266_v40 = vmax.f32 %v4044_v31, %v4202_v36  ;;  %v4204_v41 = vmul.f32 0.01, %v4048_v37 }
 0x4e9   : > { %v4267_v43 = vmax.f32 %v4046_v34, %v4203_v39  ;;  %v4205_v44 = vmul.f32 0.01, %v4050_v0 }
 0x4ea   : > { %4330 = vst [vmem:[%s6808_s30] sm:$0xff] %v4266_v40  ;;  %v4268_v46 = vmax.f32 %v4048_v37, %v4204_v41 }
 0x4eb   : > { %4331 = vst [vmem:[%s6808_s30 + $0x8] sm:$0xff] %v4267_v43  ;;  %v4269_v48 = vmax.f32 %v4050_v0, %v4205_v44  ;;  %v4053_v49 = vpop.f32.mrb[132].mxu0  ;;  %v3732_v44 = vpop.permute.xlu0 %3731 }
 0x4ec   : > { %4332 = vst [vmem:[%s6808_s30 + $0x10] sm:$0xff] %v4268_v46  ;;  %v4395_v50 = vpack.c.bf16 %v4268_v46, %v4266_v40  ;;  %v4054_v51 = vadd.f32 %v4053_v49, %v3702_v47  ;;  %v4055_v52 = vpop.f32.mrb[133].mxu0 }
 0x4ed   : > { %4333 = vst [vmem:[%s6808_s30 + $0x18] sm:$0xff] %v4269_v48  ;;  %v4056_v54 = vadd.f32 %v4055_v52, %v3702_v47  ;;  %v4057_v55 = vpop.f32.mrb[134].mxu0  ;;  %v4396_v56 = vpack.c.bf16 %v4269_v48, %v4267_v43 }
 0x4ee   : > { %v4206_v57 = vmul.f32 0.01, %v4054_v51  ;;  %v4058_v58 = vadd.f32 %v4057_v55, %v3707_v53  ;;  %v4059_v59 = vpop.f32.mrb[135].mxu0 }
 0x4ef   : > { %v4207_v60 = vmul.f32 0.01, %v4056_v54  ;;  %v4060_v62 = vadd.f32 %v4059_v59, %v3707_v53  ;;  %4440 = vmatprep.subr.bf16.mxu0 %v4396_v56 }
 0x4f0   : > { %v4270_v63 = vmax.f32 %v4054_v51, %v4206_v57  ;;  %v4208_v61 = vmul.f32 0.01, %v4058_v58  ;;  %4441 = vmatpush1.bf16.msra.mxu0 %v4395_v50  ;;  %v3737_v50 = vpop.permute.xlu1 %3736 }
 0x4f1   : > { %v4271_v1 = vmax.f32 %v4056_v54, %v4207_v60  ;;  %v4209_v2 = vmul.f32 0.01, %v4060_v62 }
 0x4f2   : > { %4334 = vst [vmem:[%s6808_s30 + $0x20] sm:$0xff] %v4270_v63  ;;  %v4272_v3 = vmax.f32 %v4058_v58, %v4208_v61 }
 0x4f3   : > { %4335 = vst [vmem:[%s6808_s30 + $0x28] sm:$0xff] %v4271_v1  ;;  %v4273_v5 = vmax.f32 %v4060_v62, %v4209_v2  ;;  %v4063_v6 = vpop.f32.mrb[136].mxu0 }
 0x4f4   : > { %4336 = vst [vmem:[%s6808_s30 + $0x30] sm:$0xff] %v4272_v3  ;;  %v4397_v7 = vpack.c.bf16 %v4272_v3, %v4270_v63  ;;  %v4064_v8 = vadd.f32 %v4063_v6, %v3712_v4  ;;  %v4065_v9 = vpop.f32.mrb[137].mxu0 }
 0x4f5   : > { %4337 = vst [vmem:[%s6808_s30 + $0x38] sm:$0xff] %v4273_v5  ;;  %v4066_v11 = vadd.f32 %v4065_v9, %v3712_v4  ;;  %v4067_v12 = vpop.f32.mrb[138].mxu0  ;;  %v4398_v13 = vpack.c.bf16 %v4273_v5, %v4271_v1  ;;  %v3742_v1 = vpop.permute.xlu0 %3741 }
 0x4f6   : > { %v4210_v14 = vmul.f32 0.01, %v4064_v8  ;;  %v4068_v15 = vadd.f32 %v4067_v12, %v3717_v10  ;;  %v4069_v16 = vpop.f32.mrb[139].mxu0 }
 0x4f7   : > { %v4211_v17 = vmul.f32 0.01, %v4066_v11  ;;  %v4070_v18 = vadd.f32 %v4069_v16, %v3717_v10  ;;  %4442 = vmatprep.subr.bf16.mxu0 %v4398_v13 }
 0x4f8   : > { %v4274_v19 = vmax.f32 %v4064_v8, %v4210_v14  ;;  %v4212_v20 = vmul.f32 0.01, %v4068_v15  ;;  %4443 = vmatpush1.bf16.msra.mxu0 %v4397_v7  ;;  %v3747_v7 = vpop.permute.xlu1 %3746 }
 0x4f9   : > { %v4275_v21 = vmax.f32 %v4066_v11, %v4211_v17  ;;  %v4213_v22 = vmul.f32 0.01, %v4070_v18 }
 0x4fa   : > { %4338 = vst [vmem:[%s6808_s30 + $0x40] sm:$0xff] %v4274_v19  ;;  %v4276_v23 = vmax.f32 %v4068_v15, %v4212_v20 }
 0x4fb   : > { %4339 = vst [vmem:[%s6808_s30 + $0x48] sm:$0xff] %v4275_v21  ;;  %v4277_v25 = vmax.f32 %v4070_v18, %v4213_v22  ;;  %v4073_v26 = vpop.f32.mrb[140].mxu0 }
 0x4fc   : > { %4340 = vst [vmem:[%s6808_s30 + $0x50] sm:$0xff] %v4276_v23  ;;  %v4399_v27 = vpack.c.bf16 %v4276_v23, %v4274_v19  ;;  %v4074_v28 = vadd.f32 %v4073_v26, %v3722_v24  ;;  %v4075_v29 = vpop.f32.mrb[141].mxu0 }
 0x4fd   : > { %4341 = vst [vmem:[%s6808_s30 + $0x58] sm:$0xff] %v4277_v25  ;;  %v4076_v31 = vadd.f32 %v4075_v29, %v3722_v24  ;;  %v4077_v32 = vpop.f32.mrb[142].mxu0  ;;  %v4400_v33 = vpack.c.bf16 %v4277_v25, %v4275_v21  ;;  %v3752_v21 = vpop.permute.xlu0 %3751 }
 0x4fe   : > { %v4214_v34 = vmul.f32 0.01, %v4074_v28  ;;  %v4078_v35 = vadd.f32 %v4077_v32, %v3727_v30  ;;  %v4079_v36 = vpop.f32.mrb[143].mxu0 }
 0x4ff   : > { %v4215_v37 = vmul.f32 0.01, %v4076_v31  ;;  %v4080_v38 = vadd.f32 %v4079_v36, %v3727_v30  ;;  %4444 = vmatprep.subr.bf16.mxu0 %v4400_v33 }
 0x500   : > { %v4278_v39 = vmax.f32 %v4074_v28, %v4214_v34  ;;  %v4216_v0 = vmul.f32 0.01, %v4078_v35  ;;  %4445 = vmatpush1.bf16.msra.mxu0 %v4399_v27  ;;  %v3757_v27 = vpop.permute.xlu1 %3756 }
 0x501   : > { %v4279_v40 = vmax.f32 %v4076_v31, %v4215_v37  ;;  %v4217_v41 = vmul.f32 0.01, %v4080_v38 }
 0x502   : > { %4342 = vst [vmem:[%s6808_s30 + $0x60] sm:$0xff] %v4278_v39  ;;  %v4280_v43 = vmax.f32 %v4078_v35, %v4216_v0 }
 0x503   : > { %4343 = vst [vmem:[%s6808_s30 + $0x68] sm:$0xff] %v4279_v40  ;;  %v4281_v45 = vmax.f32 %v4080_v38, %v4217_v41  ;;  %v4083_v46 = vpop.f32.mrb[144].mxu0 }
 0x504   : > { %4344 = vst [vmem:[%s6808_s30 + $0x70] sm:$0xff] %v4280_v43  ;;  %v4401_v47 = vpack.c.bf16 %v4280_v43, %v4278_v39  ;;  %v4084_v48 = vadd.f32 %v4083_v46, %v3732_v44  ;;  %v4085_v49 = vpop.f32.mrb[145].mxu0 }
 0x505   : > { %4345 = vst [vmem:[%s6808_s30 + $0x78] sm:$0xff] %v4281_v45  ;;  %v4086_v51 = vadd.f32 %v4085_v49, %v3732_v44  ;;  %v4087_v52 = vpop.f32.mrb[146].mxu0  ;;  %v4402_v53 = vpack.c.bf16 %v4281_v45, %v4279_v40  ;;  %v3762_v40 = vpop.permute.xlu0 %3761 }
 0x506   : > { %v4218_v54 = vmul.f32 0.01, %v4084_v48  ;;  %v4088_v55 = vadd.f32 %v4087_v52, %v3737_v50  ;;  %v4089_v56 = vpop.f32.mrb[147].mxu0 }
 0x507   : > { %v4219_v57 = vmul.f32 0.01, %v4086_v51  ;;  %v4090_v58 = vadd.f32 %v4089_v56, %v3737_v50  ;;  %4446 = vmatprep.subr.bf16.mxu0 %v4402_v53 }
 0x508   : > { %v4282_v59 = vmax.f32 %v4084_v48, %v4218_v54  ;;  %v4220_v60 = vmul.f32 0.01, %v4088_v55  ;;  %4447 = vmatpush1.bf16.msra.mxu0 %v4401_v47  ;;  %v3767_v47 = vpop.permute.xlu1 %3766 }
 0x509   : > { %v4283_v62 = vmax.f32 %v4086_v51, %v4219_v57  ;;  %v4221_v63 = vmul.f32 0.01, %v4090_v58 }
 0x50a   : > { %4346 = vst [vmem:[%s6808_s30 + $0x80] sm:$0xff] %v4282_v59  ;;  %v4284_v61 = vmax.f32 %v4088_v55, %v4220_v60 }
 0x50b   : > { %4347 = vst [vmem:[%s6808_s30 + $0x88] sm:$0xff] %v4283_v62  ;;  %v4285_v2 = vmax.f32 %v4090_v58, %v4221_v63  ;;  %v4093_v3 = vpop.f32.mrb[148].mxu0 }
 0x50c   : > { %4348 = vst [vmem:[%s6808_s30 + $0x90] sm:$0xff] %v4284_v61  ;;  %v4403_v4 = vpack.c.bf16 %v4284_v61, %v4282_v59  ;;  %v4094_v5 = vadd.f32 %v4093_v3, %v3742_v1  ;;  %v4095_v6 = vpop.f32.mrb[149].mxu0 }
 0x50d   : > { %4349 = vst [vmem:[%s6808_s30 + $0x98] sm:$0xff] %v4285_v2  ;;  %v4096_v8 = vadd.f32 %v4095_v6, %v3742_v1  ;;  %v4097_v9 = vpop.f32.mrb[150].mxu0  ;;  %v4404_v10 = vpack.c.bf16 %v4285_v2, %v4283_v62  ;;  %v3772_v62 = vpop.permute.xlu0 %3771 }
 0x50e   : > { %v4222_v11 = vmul.f32 0.01, %v4094_v5  ;;  %v4098_v12 = vadd.f32 %v4097_v9, %v3747_v7  ;;  %v4099_v13 = vpop.f32.mrb[151].mxu0 }
 0x50f   : > { %v4223_v14 = vmul.f32 0.01, %v4096_v8  ;;  %v4100_v15 = vadd.f32 %v4099_v13, %v3747_v7  ;;  %4448 = vmatprep.subr.bf16.mxu0 %v4404_v10 }
 0x510   : > { %v4286_v16 = vmax.f32 %v4094_v5, %v4222_v11  ;;  %v4224_v17 = vmul.f32 0.01, %v4098_v12  ;;  %4449 = vmatpush1.bf16.msra.mxu0 %v4403_v4  ;;  %v3777_v4 = vpop.permute.xlu1 %3776 }
 0x511   : > { %v4287_v18 = vmax.f32 %v4096_v8, %v4223_v14  ;;  %v4225_v19 = vmul.f32 0.01, %v4100_v15 }
 0x512   : > { %4350 = vst [vmem:[%s6808_s30 + $0xa0] sm:$0xff] %v4286_v16  ;;  %v4288_v20 = vmax.f32 %v4098_v12, %v4224_v17 }
 0x513   : > { %4351 = vst [vmem:[%s6808_s30 + $0xa8] sm:$0xff] %v4287_v18  ;;  %v4289_v22 = vmax.f32 %v4100_v15, %v4225_v19  ;;  %v4103_v23 = vpop.f32.mrb[152].mxu0 }
 0x514   : > { %4352 = vst [vmem:[%s6808_s30 + $0xb0] sm:$0xff] %v4288_v20  ;;  %v4405_v24 = vpack.c.bf16 %v4288_v20, %v4286_v16  ;;  %v4104_v25 = vadd.f32 %v4103_v23, %v3752_v21  ;;  %v4105_v26 = vpop.f32.mrb[153].mxu0 }
 0x515   : > { %4353 = vst [vmem:[%s6808_s30 + $0xb8] sm:$0xff] %v4289_v22  ;;  %v4106_v28 = vadd.f32 %v4105_v26, %v3752_v21  ;;  %v4107_v29 = vpop.f32.mrb[154].mxu0  ;;  %v4406_v30 = vpack.c.bf16 %v4289_v22, %v4287_v18  ;;  %v3782_v18 = vpop.permute.xlu0 %3781 }
 0x516   : > { %v4226_v31 = vmul.f32 0.01, %v4104_v25  ;;  %v4108_v32 = vadd.f32 %v4107_v29, %v3757_v27  ;;  %v4109_v33 = vpop.f32.mrb[155].mxu0 }
 0x517   : > { %v4227_v34 = vmul.f32 0.01, %v4106_v28  ;;  %v4110_v35 = vadd.f32 %v4109_v33, %v3757_v27  ;;  %4450 = vmatprep.subr.bf16.mxu0 %v4406_v30 }
 0x518   : > { %v4290_v36 = vmax.f32 %v4104_v25, %v4226_v31  ;;  %v4228_v37 = vmul.f32 0.01, %v4108_v32  ;;  %4451 = vmatpush1.bf16.msra.mxu0 %v4405_v24  ;;  %v3787_v24 = vpop.permute.xlu1 %3786 }
 0x519   : > { %v4291_v38 = vmax.f32 %v4106_v28, %v4227_v34  ;;  %v4229_v39 = vmul.f32 0.01, %v4110_v35 }
 0x51a   : > { %4354 = vst [vmem:[%s6808_s30 + $0xc0] sm:$0xff] %v4290_v36  ;;  %v4292_v0 = vmax.f32 %v4108_v32, %v4228_v37 }
 0x51b   : > { %4355 = vst [vmem:[%s6808_s30 + $0xc8] sm:$0xff] %v4291_v38  ;;  %v4293_v41 = vmax.f32 %v4110_v35, %v4229_v39  ;;  %v4113_v43 = vpop.f32.mrb[156].mxu0 }
 0x51c   : > { %4356 = vst [vmem:[%s6808_s30 + $0xd0] sm:$0xff] %v4292_v0  ;;  %v4407_v44 = vpack.c.bf16 %v4292_v0, %v4290_v36  ;;  %v4114_v45 = vadd.f32 %v4113_v43, %v3762_v40  ;;  %v4115_v46 = vpop.f32.mrb[157].mxu0 }
 0x51d   : > { %4357 = vst [vmem:[%s6808_s30 + $0xd8] sm:$0xff] %v4293_v41  ;;  %v4116_v48 = vadd.f32 %v4115_v46, %v3762_v40  ;;  %v4117_v49 = vpop.f32.mrb[158].mxu0  ;;  %v4408_v50 = vpack.c.bf16 %v4293_v41, %v4291_v38  ;;  %v3792_v38 = vpop.permute.xlu0 %3791 }
 0x51e   : > { %v4230_v51 = vmul.f32 0.01, %v4114_v45  ;;  %v4118_v52 = vadd.f32 %v4117_v49, %v3767_v47  ;;  %v4119_v53 = vpop.f32.mrb[159].mxu0 }
 0x51f   : > { %v4231_v54 = vmul.f32 0.01, %v4116_v48  ;;  %v4120_v55 = vadd.f32 %v4119_v53, %v3767_v47  ;;  %4452 = vmatprep.subr.bf16.mxu0 %v4408_v50 }
 0x520   : > { %v4294_v56 = vmax.f32 %v4114_v45, %v4230_v51  ;;  %v4232_v57 = vmul.f32 0.01, %v4118_v52  ;;  %4453 = vmatpush1.bf16.msra.mxu0 %v4407_v44  ;;  %v3797_v44 = vpop.permute.xlu1 %3796 }
 0x521   : > { %v4295_v58 = vmax.f32 %v4116_v48, %v4231_v54  ;;  %v4233_v59 = vmul.f32 0.01, %v4120_v55 }
 0x522   : > { %4358 = vst [vmem:[%s6808_s30 + $0xe0] sm:$0xff] %v4294_v56  ;;  %v4296_v60 = vmax.f32 %v4118_v52, %v4232_v57 }
 0x523   : > { %4359 = vst [vmem:[%s6808_s30 + $0xe8] sm:$0xff] %v4295_v58  ;;  %v4297_v63 = vmax.f32 %v4120_v55, %v4233_v59  ;;  %v4123_v61 = vpop.f32.mrb[160].mxu0 }
 0x524   : > { %4360 = vst [vmem:[%s6808_s30 + $0xf0] sm:$0xff] %v4296_v60  ;;  %v4409_v1 = vpack.c.bf16 %v4296_v60, %v4294_v56  ;;  %v4124_v2 = vadd.f32 %v4123_v61, %v3772_v62  ;;  %v4125_v3 = vpop.f32.mrb[161].mxu0 }
 0x525   : > { %4361 = vst [vmem:[%s6808_s30 + $0xf8] sm:$0xff] %v4297_v63  ;;  %v4126_v5 = vadd.f32 %v4125_v3, %v3772_v62  ;;  %v4127_v6 = vpop.f32.mrb[162].mxu0  ;;  %v4410_v7 = vpack.c.bf16 %v4297_v63, %v4295_v58  ;;  %v3802_v58 = vpop.permute.xlu0 %3801 }
 0x526   : > { %v4234_v8 = vmul.f32 0.01, %v4124_v2  ;;  %v4128_v9 = vadd.f32 %v4127_v6, %v3777_v4  ;;  %v4129_v10 = vpop.f32.mrb[163].mxu0 }
 0x527   : > { %v4235_v11 = vmul.f32 0.01, %v4126_v5  ;;  %v4130_v12 = vadd.f32 %v4129_v10, %v3777_v4  ;;  %4454 = vmatprep.subr.bf16.mxu0 %v4410_v7 }
 0x528   : > { %v4298_v13 = vmax.f32 %v4124_v2, %v4234_v8  ;;  %v4236_v14 = vmul.f32 0.01, %v4128_v9  ;;  %4455 = vmatpush1.bf16.msra.mxu0 %v4409_v1  ;;  %v3807_v1 = vpop.permute.xlu1 %3806 }
 0x529   : > { %v4299_v15 = vmax.f32 %v4126_v5, %v4235_v11  ;;  %v4237_v16 = vmul.f32 0.01, %v4130_v12 }
 0x52a   : > { %4362 = vst [vmem:[%s6808_s30 + $0x100] sm:$0xff] %v4298_v13  ;;  %v4300_v17 = vmax.f32 %v4128_v9, %v4236_v14 }
 0x52b   : > { %4363 = vst [vmem:[%s6808_s30 + $0x108] sm:$0xff] %v4299_v15  ;;  %v4301_v19 = vmax.f32 %v4130_v12, %v4237_v16  ;;  %v4133_v20 = vpop.f32.mrb[164].mxu0 }
 0x52c   : > { %4364 = vst [vmem:[%s6808_s30 + $0x110] sm:$0xff] %v4300_v17  ;;  %v4411_v21 = vpack.c.bf16 %v4300_v17, %v4298_v13  ;;  %v4134_v22 = vadd.f32 %v4133_v20, %v3782_v18  ;;  %v4135_v23 = vpop.f32.mrb[165].mxu0 }
 0x52d   : > { %4365 = vst [vmem:[%s6808_s30 + $0x118] sm:$0xff] %v4301_v19  ;;  %v4136_v25 = vadd.f32 %v4135_v23, %v3782_v18  ;;  %v4137_v26 = vpop.f32.mrb[166].mxu0  ;;  %v4412_v27 = vpack.c.bf16 %v4301_v19, %v4299_v15  ;;  %v3812_v15 = vpop.permute.xlu0 %3811 }
 0x52e   : > { %v4238_v28 = vmul.f32 0.01, %v4134_v22  ;;  %v4138_v29 = vadd.f32 %v4137_v26, %v3787_v24  ;;  %v4139_v30 = vpop.f32.mrb[167].mxu0 }
 0x52f   : > { %v4239_v31 = vmul.f32 0.01, %v4136_v25  ;;  %v4140_v32 = vadd.f32 %v4139_v30, %v3787_v24  ;;  %4456 = vmatprep.subr.bf16.mxu0 %v4412_v27 }
 0x530   : > { %v4302_v33 = vmax.f32 %v4134_v22, %v4238_v28  ;;  %v4240_v34 = vmul.f32 0.01, %v4138_v29  ;;  %4457 = vmatpush1.bf16.msra.mxu0 %v4411_v21  ;;  %v3817_v21 = vpop.permute.xlu1 %3816 }
 0x531   : > { %v4303_v35 = vmax.f32 %v4136_v25, %v4239_v31  ;;  %v4241_v36 = vmul.f32 0.01, %v4140_v32 }
 0x532   : > { %4366 = vst [vmem:[%s6808_s30 + $0x120] sm:$0xff] %v4302_v33  ;;  %v4304_v37 = vmax.f32 %v4138_v29, %v4240_v34 }
 0x533   : > { %4367 = vst [vmem:[%s6808_s30 + $0x128] sm:$0xff] %v4303_v35  ;;  %v4305_v39 = vmax.f32 %v4140_v32, %v4241_v36  ;;  %v4143_v0 = vpop.f32.mrb[168].mxu0 }
 0x534   : > { %4368 = vst [vmem:[%s6808_s30 + $0x130] sm:$0xff] %v4304_v37  ;;  %v4413_v40 = vpack.c.bf16 %v4304_v37, %v4302_v33  ;;  %v4144_v41 = vadd.f32 %v4143_v0, %v3792_v38  ;;  %v4145_v43 = vpop.f32.mrb[169].mxu0 }
 0x535   : > { %4369 = vst [vmem:[%s6808_s30 + $0x138] sm:$0xff] %v4305_v39  ;;  %v4146_v45 = vadd.f32 %v4145_v43, %v3792_v38  ;;  %v4147_v46 = vpop.f32.mrb[170].mxu0  ;;  %v4414_v47 = vpack.c.bf16 %v4305_v39, %v4303_v35  ;;  %v3822_v35 = vpop.permute.xlu0 %3821 }
 0x536   : > { %v4242_v48 = vmul.f32 0.01, %v4144_v41  ;;  %v4148_v49 = vadd.f32 %v4147_v46, %v3797_v44  ;;  %v4149_v50 = vpop.f32.mrb[171].mxu0 }
 0x537   : > { %v4243_v51 = vmul.f32 0.01, %v4146_v45  ;;  %v4150_v52 = vadd.f32 %v4149_v50, %v3797_v44  ;;  %4458 = vmatprep.subr.bf16.mxu0 %v4414_v47 }
 0x538   : > { %v4306_v53 = vmax.f32 %v4144_v41, %v4242_v48  ;;  %v4244_v54 = vmul.f32 0.01, %v4148_v49  ;;  %4459 = vmatpush1.bf16.msra.mxu0 %v4413_v40  ;;  %v3827_v40 = vpop.permute.xlu1 %3826 }
 0x539   : > { %v4307_v55 = vmax.f32 %v4146_v45, %v4243_v51  ;;  %v4245_v56 = vmul.f32 0.01, %v4150_v52 }
 0x53a   : > { %4370 = vst [vmem:[%s6808_s30 + $0x140] sm:$0xff] %v4306_v53  ;;  %v4308_v57 = vmax.f32 %v4148_v49, %v4244_v54 }
 0x53b   : > { %4371 = vst [vmem:[%s6808_s30 + $0x148] sm:$0xff] %v4307_v55  ;;  %v4309_v59 = vmax.f32 %v4150_v52, %v4245_v56  ;;  %v4153_v60 = vpop.f32.mrb[172].mxu0 }
 0x53c   : > { %4372 = vst [vmem:[%s6808_s30 + $0x150] sm:$0xff] %v4308_v57  ;;  %v4415_v62 = vpack.c.bf16 %v4308_v57, %v4306_v53  ;;  %v4154_v63 = vadd.f32 %v4153_v60, %v3802_v58  ;;  %v4155_v61 = vpop.f32.mrb[173].mxu0 }
 0x53d   : > { %4373 = vst [vmem:[%s6808_s30 + $0x158] sm:$0xff] %v4309_v59  ;;  %v4156_v2 = vadd.f32 %v4155_v61, %v3802_v58  ;;  %v4157_v3 = vpop.f32.mrb[174].mxu0  ;;  %v4416_v4 = vpack.c.bf16 %v4309_v59, %v4307_v55  ;;  %v3832_v55 = vpop.permute.xlu0 %3831 }
 0x53e   : > { %v4246_v5 = vmul.f32 0.01, %v4154_v63  ;;  %v4158_v6 = vadd.f32 %v4157_v3, %v3807_v1  ;;  %v4159_v7 = vpop.f32.mrb[175].mxu0 }
 0x53f   : > { %v4247_v8 = vmul.f32 0.01, %v4156_v2  ;;  %v4160_v9 = vadd.f32 %v4159_v7, %v3807_v1  ;;  %4460 = vmatprep.subr.bf16.mxu0 %v4416_v4 }
 0x540   : > { %v4310_v10 = vmax.f32 %v4154_v63, %v4246_v5  ;;  %v4248_v11 = vmul.f32 0.01, %v4158_v6  ;;  %4461 = vmatpush1.bf16.msra.mxu0 %v4415_v62  ;;  %v3837_v62 = vpop.permute.xlu1 %3836 }
 0x541   : > { %v4311_v12 = vmax.f32 %v4156_v2, %v4247_v8  ;;  %v4249_v13 = vmul.f32 0.01, %v4160_v9 }
 0x542   : > { %4374 = vst [vmem:[%s6808_s30 + $0x160] sm:$0xff] %v4310_v10  ;;  %v4312_v14 = vmax.f32 %v4158_v6, %v4248_v11 }
 0x543   : > { %4375 = vst [vmem:[%s6808_s30 + $0x168] sm:$0xff] %v4311_v12  ;;  %v4313_v16 = vmax.f32 %v4160_v9, %v4249_v13  ;;  %v4163_v17 = vpop.f32.mrb[176].mxu0 }
 0x544   : > { %4376 = vst [vmem:[%s6808_s30 + $0x170] sm:$0xff] %v4312_v14  ;;  %v4417_v18 = vpack.c.bf16 %v4312_v14, %v4310_v10  ;;  %v4164_v19 = vadd.f32 %v4163_v17, %v3812_v15  ;;  %v4165_v20 = vpop.f32.mrb[177].mxu0 }
 0x545   : > { %4377 = vst [vmem:[%s6808_s30 + $0x178] sm:$0xff] %v4313_v16  ;;  %v4166_v22 = vadd.f32 %v4165_v20, %v3812_v15  ;;  %v4167_v23 = vpop.f32.mrb[178].mxu0  ;;  %v4418_v24 = vpack.c.bf16 %v4313_v16, %v4311_v12  ;;  %v3842_v12 = vpop.permute.xlu0 %3841 }
 0x546   : > { %v4250_v25 = vmul.f32 0.01, %v4164_v19  ;;  %v4168_v26 = vadd.f32 %v4167_v23, %v3817_v21  ;;  %v4169_v27 = vpop.f32.mrb[179].mxu0 }
 0x547   : > { %v4251_v28 = vmul.f32 0.01, %v4166_v22  ;;  %v4170_v29 = vadd.f32 %v4169_v27, %v3817_v21  ;;  %4462 = vmatprep.subr.bf16.mxu0 %v4418_v24 }
 0x548   : > { %v4314_v30 = vmax.f32 %v4164_v19, %v4250_v25  ;;  %v4252_v31 = vmul.f32 0.01, %v4168_v26  ;;  %4463 = vmatpush1.bf16.msra.mxu0 %v4417_v18  ;;  %v3847_v18 = vpop.permute.xlu1 %3846 }
 0x549   : > { %v4315_v32 = vmax.f32 %v4166_v22, %v4251_v28  ;;  %v4253_v33 = vmul.f32 0.01, %v4170_v29 }
 0x54a   : > { %4378 = vst [vmem:[%s6808_s30 + $0x180] sm:$0xff] %v4314_v30  ;;  %v4316_v34 = vmax.f32 %v4168_v26, %v4252_v31 }
 0x54b   : > { %4379 = vst [vmem:[%s6808_s30 + $0x188] sm:$0xff] %v4315_v32  ;;  %v4317_v36 = vmax.f32 %v4170_v29, %v4253_v33  ;;  %v4173_v37 = vpop.f32.mrb[180].mxu0 }
 0x54c   : > { %4380 = vst [vmem:[%s6808_s30 + $0x190] sm:$0xff] %v4316_v34  ;;  %v4419_v38 = vpack.c.bf16 %v4316_v34, %v4314_v30  ;;  %v4174_v39 = vadd.f32 %v4173_v37, %v3822_v35  ;;  %v4175_v0 = vpop.f32.mrb[181].mxu0 }
 0x54d   : > { %4381 = vst [vmem:[%s6808_s30 + $0x198] sm:$0xff] %v4317_v36  ;;  %v4176_v41 = vadd.f32 %v4175_v0, %v3822_v35  ;;  %v4177_v43 = vpop.f32.mrb[182].mxu0  ;;  %v4420_v44 = vpack.c.bf16 %v4317_v36, %v4315_v32  ;;  %v4895_v35 = vcombine.low %v6804_v42, %v6804_v42 }
 0x54e   : > { %v4254_v45 = vmul.f32 0.01, %v4174_v39  ;;  %v4178_v46 = vadd.f32 %v4177_v43, %v3827_v40  ;;  %v4179_v47 = vpop.f32.mrb[183].mxu0 }
 0x54f   : > { %v4255_v48 = vmul.f32 0.01, %v4176_v41  ;;  %v4180_v49 = vadd.f32 %v4179_v47, %v3827_v40  ;;  %4464 = vmatprep.subr.bf16.mxu0 %v4420_v44 }
 0x550   : > { %v4318_v50 = vmax.f32 %v4174_v39, %v4254_v45  ;;  %v4256_v51 = vmul.f32 0.01, %v4178_v46  ;;  %4465 = vmatpush1.bf16.msra.mxu0 %v4419_v38 }
 0x551   : > { %v4319_v52 = vmax.f32 %v4176_v41, %v4255_v48  ;;  %v4257_v53 = vmul.f32 0.01, %v4180_v49 }
 0x552   : > { %4382 = vst [vmem:[%s6808_s30 + $0x1a0] sm:$0xff] %v4318_v50  ;;  %v4320_v54 = vmax.f32 %v4178_v46, %v4256_v51 }
 0x553   : > { %4383 = vst [vmem:[%s6808_s30 + $0x1a8] sm:$0xff] %v4319_v52  ;;  %v4321_v56 = vmax.f32 %v4180_v49, %v4257_v53  ;;  %v4183_v57 = vpop.f32.mrb[184].mxu0 }
 0x554   : > { %4384 = vst [vmem:[%s6808_s30 + $0x1b0] sm:$0xff] %v4320_v54  ;;  %v4421_v58 = vpack.c.bf16 %v4320_v54, %v4318_v50  ;;  %v4184_v59 = vadd.f32 %v4183_v57, %v3832_v55  ;;  %v4185_v60 = vpop.f32.mrb[185].mxu0 }
 0x555   : > { %4385 = vst [vmem:[%s6808_s30 + $0x1b8] sm:$0xff] %v4321_v56  ;;  %v4186_v63 = vadd.f32 %v4185_v60, %v3832_v55  ;;  %v4187_v61 = vpop.f32.mrb[186].mxu0  ;;  %v4422_v1 = vpack.c.bf16 %v4321_v56, %v4319_v52 }
 0x556   : > { %v4258_v2 = vmul.f32 0.01, %v4184_v59  ;;  %v4188_v3 = vadd.f32 %v4187_v61, %v3837_v62  ;;  %v4189_v4 = vpop.f32.mrb[187].mxu0 }
 0x557   : > { %v4259_v5 = vmul.f32 0.01, %v4186_v63  ;;  %v4190_v6 = vadd.f32 %v4189_v4, %v3837_v62  ;;  %4466 = vmatprep.subr.bf16.mxu0 %v4422_v1 }
 0x558   : > { %v4322_v7 = vmax.f32 %v4184_v59, %v4258_v2  ;;  %v4260_v8 = vmul.f32 0.01, %v4188_v3  ;;  %4467 = vmatpush1.bf16.msra.mxu0 %v4421_v58 }
 0x559   : > { %v4323_v9 = vmax.f32 %v4186_v63, %v4259_v5  ;;  %v4261_v10 = vmul.f32 0.01, %v4190_v6 }
 0x55a   : > { %4386 = vst [vmem:[%s6808_s30 + $0x1c0] sm:$0xff] %v4322_v7  ;;  %v4324_v11 = vmax.f32 %v4188_v3, %v4260_v8 }
 0x55b   : > { %4387 = vst [vmem:[%s6808_s30 + $0x1c8] sm:$0xff] %v4323_v9  ;;  %v4325_v13 = vmax.f32 %v4190_v6, %v4261_v10  ;;  %v4193_v14 = vpop.f32.mrb[188].mxu0 }
 0x55c   : > { %4388 = vst [vmem:[%s6808_s30 + $0x1d0] sm:$0xff] %v4324_v11  ;;  %v4423_v15 = vpack.c.bf16 %v4324_v11, %v4322_v7  ;;  %v4194_v16 = vadd.f32 %v4193_v14, %v3842_v12  ;;  %v4195_v17 = vpop.f32.mrb[189].mxu0 }
 0x55d   : > { %4389 = vst [vmem:[%s6808_s30 + $0x1d8] sm:$0xff] %v4325_v13  ;;  %v4196_v19 = vadd.f32 %v4195_v17, %v3842_v12  ;;  %v4197_v20 = vpop.f32.mrb[190].mxu0  ;;  %v4424_v21 = vpack.c.bf16 %v4325_v13, %v4323_v9 }
 0x55e   : > { %v4262_v22 = vmul.f32 0.01, %v4194_v16  ;;  %v4198_v23 = vadd.f32 %v4197_v20, %v3847_v18  ;;  %v4199_v24 = vpop.f32.mrb[191].mxu0 }
 0x55f   : > { %v4263_v25 = vmul.f32 0.01, %v4196_v19  ;;  %v4200_v26 = vadd.f32 %v4199_v24, %v3847_v18  ;;  %4468 = vmatprep.subr.bf16.mxu0 %v4424_v21 }
 0x560   : > { %v4326_v27 = vmax.f32 %v4194_v16, %v4262_v22  ;;  %v4264_v28 = vmul.f32 0.01, %v4198_v23  ;;  %4469 = vmatpush1.bf16.msra.mxu0 %v4423_v15 }
 0x561   : > { %v4327_v29 = vmax.f32 %v4196_v19, %v4263_v25  ;;  %v4265_v30 = vmul.f32 0.01, %v4200_v26 }
 0x562   : > { %4390 = vst [vmem:[%s6808_s30 + $0x1e0] sm:$0xff] %v4326_v27  ;;  %v4328_v31 = vmax.f32 %v4198_v23, %v4264_v28 }
 0x563   : > { %4391 = vst [vmem:[%s6808_s30 + $0x1e8] sm:$0xff] %v4327_v29  ;;  %v4329_v32 = vmax.f32 %v4200_v26, %v4265_v30 }
 0x564   : > { %4392 = vst [vmem:[%s6808_s30 + $0x1f0] sm:$0xff] %v4328_v31  ;;  %v4425_v33 = vpack.c.bf16 %v4328_v31, %v4326_v27 }
 0x565   : > { %4393 = vst [vmem:[%s6808_s30 + $0x1f8] sm:$0xff] %v4329_v32  ;;  %v4426_v34 = vpack.c.bf16 %v4329_v32, %v4327_v29 }
 0x567   : > { %4470 = vmatprep.subr.bf16.mxu0 %v4426_v34 }
 0x568   : > { %4471 = vmatpush1.bf16.msra.mxu0 %v4425_v33 }
 0x56b   : > { %4473 = vmatmul.mubr.bf16.vlgmr.msra.gmra.mrb[192].mxu0 %v4895_v35 }
 0x56c   : > { %5641 = shalt.err (!%p5638_p11)
}
 0x56d   : > { %s5642_s14 = scalar_lea.hbm %s6881_s23, 8192  ;;  %s5646_s29 = scalar_lea.hbm %s6979_s15, 16384 }
 0x56e   : > { %p5643_p13 = scmp.ne.s32.totalorder %s6881_s23, %s5642_s14  ;;  %p5647_p6 = scmp.lt.u32.totalorder %s6881_s23, %s6979_s15 }
 0x56f   : > { %p5648_p9 = scmp.lt.u32.totalorder %s5646_s29, %s5642_s14  ;;  %p5650_p12 = scmp.lt.u32.totalorder %s5642_s14, %s6881_s23 }
 0x570   : > { %p5644_p5 = pnand %p5643_p13, %p6980_p1 }
 0x571   : > { %p5649_p10 = por %p5648_p9, %p5647_p6 }
 0x572   : > { %p5645_p0 = pneg %p5644_p5 }
 0x573   : > { %p5651_p2 = por %p5650_p12, %p5649_p10 }
 0x575   : > { %p5652_p3 = pnand %p5651_p2, %p5645_p0 }
 0x577   : > { %5655 = shalt.err (!%p5652_p3)
}
 0x578   : > { %s5706_s27 = smov 256   ;;  %s5707_s22 = smov 16   ;;  %v4431_v42 = vpop.permute.xlu0 %4430 }
 0x579   : > { %5202 = dma.vmem_to_hbm [thread:$0]  (%p6980_p1), %s6883_s16, 8192, %s6881_s23, %s6887_s26, %s5706_s27, %s5706_s27, %s5707_s22  }
 0x57a   : > { %s4904_s18 = sshll.u32 %s5912_s28, 4  ;;  %s6981_s30 = sld [smem:[#allocation18_spill]] }
 0x580   : > { %s555_s29 = scalar_lea.vmem %s6981_s30, %s4904_s18 }
 0x63e   : > { %v4474_v36 = vpop.f32.mrb[192].mxu0 }
 0x63f   : > { %v4475_v37 = vadd.f32 %v4474_v36, %v4431_v42  ;;  %v4476_v38 = vpop.f32.mrb[193].mxu0 }
 0x640   : > { %v4477_v39 = vadd.f32 %v4476_v38, %v4431_v42  ;;  %v4478_v0 = vpop.f32.mrb[194].mxu0 }
 0x641   : > { %4481 = vst [vmem:[%s555_s29] sm:$0x7f] %v4475_v37  ;;  %v4479_v40 = vpop.f32.mrb[195].mxu0 }
 0x642   : > { %4482 = vst [vmem:[%s555_s29 + $0x8] sm:$0x7f] %v4477_v39 }
 0x643 PF: > { %s6982_s14 = sld [smem:[#allocation13_spill]]  ;;  %s6983_s25 = sld [smem:[#allocation11_spill]] }
 0x644   : > { %s6984_s17 = sld [smem:[#allocation17_spill]] }
 0x649   : > { %p5219_p4 = scmp.ge.s32.totalorder %s6982_s14, 2  ;;  %s4528_s20 = sand.u32 1, %s6983_s25  }
 0x64a   : > { %p6985_p1 = scmp.ne.s32.totalorder %s6984_s17, 0  ;;  %s4529_s28 = scalar_lea.sflag [#allocation4], %s4528_s20 }
 0x64c   : > { %p5212_p7 = pnand %p5219_p4, %p6985_p1 }
 0x64e   : > { %5681 = dma.done.wait (!%p5212_p7), %s4529_s28, 8192  }
 0x64f   : > { %5683 = vsyncadd (!%p5212_p7), %s4529_s28, 4294959104  ;;  %s6986_s21 = sld [smem:[#allocation14_spill]]  ;;  %s6987_s16 = sld [smem:[#allocation12_spill]] }
 0x650   : > { %s6988_s20 = sld [smem:[#allocation15_spill]]  ;;  %s6989_s18 = smov %s5690_s19 }
 0x655   : > { %p28_p8 = scmp.ge.s32.totalorder %s6986_s21, 4   ;;  %s6990_s19 = smov %s6987_s16 }
 0x657   :  { %30 = sbr.rel (!%p28_p8) target bundleno = 8 (0x8), region = 135 }
 0x65e   :  { %4534 = vsyncpa [#allocation3], 1 }
 0x65f   :  { %4536 = vsyncpa [#allocation3 + $0x1], 1 }
 0x660   :  { %4537 = vsyncpa [#allocation6], 1 }
 0x661   :  { %4538 = vsyncpa [#allocation4], 1 }
 0x662   :  { %4540 = vsyncpa [#allocation4 + $0x1], 1 }

</bundles_post_ra>
